<compile_context>
chip_gen: v5e
topology: v5e:2x2
jax: 0.10.0
libtpu: 0.0.40
codegen_flags: <defaults>
</compile_context>

<pallas_src>
import jax
import jax.numpy as jnp
from jax.experimental import pallas as pl
from jax.experimental.pallas import tpu as pltpu


def resnet_block_kernel(x_ref, w1_ref, w2_ref, ws_ref, vecs_ref, o_ref,
                        xpad_ref, hpad_ref, cols1_ref, cols2_ref):
    H, W = o_ref.shape[1], o_ref.shape[2]
    Cout = w1_ref.shape[1]                 # true out_channels (conv1 output width)

    vecs = vecs_ref[...]                   # (3, Cp)
    t1 = vecs[0:1, :Cout]                  # folded BN1 shift (+conv1 bias), (1, Cout)
    t2 = vecs[1:2, :]                      # folded BN2 shift (+conv2 bias), (1, Cp)
    bs = vecs[2:3, :]                      # shortcut bias,                  (1, Cp)

    def conv3x3_bn_relu6(src, pad_ref, cols_ref, w, t):
        """'same' 3x3 conv -> folded BN -> relu6, as a single MXU matmul.

        src: (H, W, C) value; pad_ref: (H+2, W+2, C) VMEM; cols_ref: (H, W, 9*C) VMEM;
        w: (9*C, Co); t: (1, Co).  Returns (H, W, Co) float32.
        """
        C = src.shape[-1]
        # Build the 1-px zero halo: zero only the border strips, store the interior.
        pad_ref[0:1, :, :] = jnp.zeros((1, W + 2, C), jnp.float32)
        pad_ref[H + 1:H + 2, :, :] = jnp.zeros((1, W + 2, C), jnp.float32)
        pad_ref[:, 0:1, :] = jnp.zeros((H + 2, 1, C), jnp.float32)
        pad_ref[:, W + 1:W + 2, :] = jnp.zeros((H + 2, 1, C), jnp.float32)
        pad_ref[1:H + 1, 1:W + 1, :] = src
        p = pad_ref[...]                                   # (H+2, W+2, C)

        # im2col: pack the 9 shifted taps along channels so the whole conv is one
        # matmul with contraction K = 9*C (instead of nine K=C MXU pushes).
        for k in range(9):
            kh, kw = divmod(k, 3)
            cols_ref[:, :, k * C:(k + 1) * C] = p[kh:kh + H, kw:kw + W, :]

        y = jnp.einsum('hwk,kc->hwc', cols_ref[...], w,
                       preferred_element_type=jnp.float32)
        return jnp.clip(y + t, 0.0, 6.0)                   # folded BN + relu6

    x = x_ref[0]                                           # (H, W, Cin)

    h = conv3x3_bn_relu6(x, xpad_ref, cols1_ref, w1_ref[...], t1)    # (H, W, Cout)
    h2 = conv3x3_bn_relu6(h, hpad_ref, cols2_ref, w2_ref[...], t2)   # (H, W, Cp)

    # nin_shortcut (1x1 conv) on the original input + residual add.
    sc = jnp.einsum('hwc,cd->hwd', x, ws_ref[...],
                    preferred_element_type=jnp.float32) + bs         # (H, W, Cp)

    o_ref[0] = (sc + h2).astype(o_ref.dtype)               # lane-dense (Cp % 128 == 0)


def resnet_block(x_nchw, params, eps=1e-5):
    """ResnetBlock forward.  x_nchw: (N, Cin, H, W) float32 -> (N, Cout, H, W)."""
    x = jnp.transpose(x_nchw, (0, 2, 3, 1)).astype(jnp.float32)       # NCHW -> NHWC
    N, H, W, Cin = x.shape
    Cout = params['w1'].shape[0]
    Cp = ((Cout + 127) // 128) * 128        # lane-padded output channels (>= Cout)

    # ---- fold BatchNorm (inference) into conv weights / shifts ----
    s1 = params['g1'] / jnp.sqrt(params['v1'] + eps)
    t1 = params['be1'] + (params['b1'] - params['m1']) * s1
    s2 = params['g2'] / jnp.sqrt(params['v2'] + eps)
    t2 = params['be2'] + (params['b2'] - params['m2']) * s2

    # PyTorch OIHW -> im2col layout (row index = (kh*3+kw)*C + c), BN scale folded in.
    w1 = (jnp.transpose(params['w1'], (2, 3, 1, 0)) * s1).reshape(9 * Cin, Cout)
    w2 = (jnp.transpose(params['w2'], (2, 3, 1, 0)) * s2).reshape(9 * Cout, Cout)
    ws = jnp.transpose(params['ws'][:, :, 0, 0], (1, 0))              # (Cin, Cout)

    # Pad only the *final-stage* output channels (conv2 / shortcut) to Cp so the
    # kernel's stores are lane-dense; padded channels are exact zeros.
    pad_out = [(0, 0), (0, Cp - Cout)]
    w2 = jnp.pad(w2, pad_out)                                         # (9*Cout, Cp)
    ws = jnp.pad(ws, pad_out)                                         # (Cin,    Cp)
    vecs = jnp.stack([
        jnp.pad(t1, (0, Cp - Cout)),            # only first Cout entries used
        jnp.pad(t2, (0, Cp - Cout)),
        jnp.pad(params['bs'], (0, Cp - Cout)),
    ]).astype(jnp.float32)                                            # (3, Cp)

    out = pl.pallas_call(
        resnet_block_kernel,
        out_shape=jax.ShapeDtypeStruct((N, H, W, Cp), jnp.float32),
        grid_spec=pltpu.PrefetchScalarGridSpec(
            num_scalar_prefetch=0,
            grid=(N,),
            in_specs=[
                pl.BlockSpec((1, H, W, Cin), lambda b: (b, 0, 0, 0)),
                pl.BlockSpec((9 * Cin, Cout), lambda b: (0, 0)),
                pl.BlockSpec((9 * Cout, Cp), lambda b: (0, 0)),
                pl.BlockSpec((Cin, Cp), lambda b: (0, 0)),
                pl.BlockSpec((3, Cp), lambda b: (0, 0)),
            ],
            out_specs=pl.BlockSpec((1, H, W, Cp), lambda b: (b, 0, 0, 0)),
            scratch_shapes=[
                pltpu.VMEM((H + 2, W + 2, Cin), jnp.float32),    # conv1 halo buffer
                pltpu.VMEM((H + 2, W + 2, Cout), jnp.float32),   # conv2 halo buffer
                pltpu.VMEM((H, W, 9 * Cin), jnp.float32),        # conv1 im2col columns
                pltpu.VMEM((H, W, 9 * Cout), jnp.float32),       # conv2 im2col columns
            ],
        ),
        compiler_params=pltpu.CompilerParams(dimension_semantics=("parallel",)),
    )(x, w1.astype(jnp.float32), w2.astype(jnp.float32),
      ws.astype(jnp.float32), vecs)

    out = out[..., :Cout]                                             # drop lane padding
    return jnp.transpose(out, (0, 3, 1, 2))                           # NHWC -> NCHW


def resnet_block_reference(x, p):
    """Pure-JAX NCHW reference mirroring the PyTorch forward (eval mode)."""
    def conv(x, w, b, pad):
        y = jax.lax.conv_general_dilated(
            x, w, (1, 1), [(pad, pad), (pad, pad)],
            dimension_numbers=('NCHW', 'OIHW', 'NCHW'))
        return y + b[None, :, None, None]

    def bn(x, g, be, m, v, eps=1e-5):
        s = g / jnp.sqrt(v + eps)
        return x * s[None, :, None, None] + (be - m * s)[None, :, None, None]

    relu6 = lambda z: jnp.clip(z, 0.0, 6.0)
    h = relu6(bn(conv(x, p['w1'], p['b1'], 1), p['g1'], p['be1'], p['m1'], p['v1']))
    h = relu6(bn(conv(h, p['w2'], p['b2'], 1), p['g2'], p['be2'], p['m2'], p['v2']))
    xs = conv(x, p['ws'], p['bs'], 0)
    return xs + h


if __name__ == "__main__":
    N, Cin, Cout, H, W = 2, 4, 8, 16, 16

    key = jax.random.PRNGKey(0)
    ks = jax.random.split(key, 16)
    params = dict(
        w1=0.1 * jax.random.normal(ks[0], (Cout, Cin, 3, 3), jnp.float32),
        b1=0.1 * jax.random.normal(ks[1], (Cout,), jnp.float32),
        g1=1.0 + 0.1 * jax.random.normal(ks[2], (Cout,), jnp.float32),
        be1=0.1 * jax.random.normal(ks[3], (Cout,), jnp.float32),
        m1=0.1 * jax.random.normal(ks[4], (Cout,), jnp.float32),
        v1=0.5 + jax.random.uniform(ks[5], (Cout,), jnp.float32),
        w2=0.1 * jax.random.normal(ks[6], (Cout, Cout, 3, 3), jnp.float32),
        b2=0.1 * jax.random.normal(ks[7], (Cout,), jnp.float32),
        g2=1.0 + 0.1 * jax.random.normal(ks[8], (Cout,), jnp.float32),
        be2=0.1 * jax.random.normal(ks[9], (Cout,), jnp.float32),
        m2=0.1 * jax.random.normal(ks[10], (Cout,), jnp.float32),
        v2=0.5 + jax.random.uniform(ks[11], (Cout,), jnp.float32),
        ws=0.1 * jax.random.normal(ks[12], (Cout, Cin, 1, 1), jnp.float32),
        bs=0.1 * jax.random.normal(ks[13], (Cout,), jnp.float32),
    )
    x = jax.random.normal(ks[14], (N, Cin, H, W), jnp.float32)

    out = jax.block_until_ready(resnet_block(x, params))
    ref = jax.block_until_ready(resnet_block_reference(x, params))

    assert out.shape == (N, Cout, H, W), out.shape
    assert jnp.allclose(out, ref, atol=1e-4, rtol=1e-4), float(jnp.max(jnp.abs(out - ref)))
    print("KERNEL_OK")
</pallas_src>

<mosaic_0001>
module attributes {stable_mosaic.version = 11 : i64} {
  func.func @resnet_block_kernel(%arg0: i32, %arg1: memref<1x16x16x4xf32, #tpu.memory_space<vmem>>, %arg2: memref<36x8xf32, #tpu.memory_space<vmem>>, %arg3: memref<72x128xf32, #tpu.memory_space<vmem>>, %arg4: memref<4x128xf32, #tpu.memory_space<vmem>>, %arg5: memref<3x128xf32, #tpu.memory_space<vmem>>, %arg6: memref<1x16x16x128xf32, #tpu.memory_space<vmem>>, %arg7: memref<18x18x4xf32, #tpu.memory_space<vmem>>, %arg8: memref<18x18x8xf32, #tpu.memory_space<vmem>>, %arg9: memref<16x16x36xf32, #tpu.memory_space<vmem>>, %arg10: memref<16x16x72xf32, #tpu.memory_space<vmem>>) attributes {dimension_semantics = [#tpu.dimension_semantics<parallel>], iteration_bounds = array<i64: 2>, scalar_prefetch = 0 : i64, scratch_operands = 4 : i64, tpu.core_type = #tpu.core_type<tc>, window_params = [{transform_indices = @transform_0, window_bounds = array<i64: 1, 16, 16, 4>}, {pipeline_mode = #tpu.pipeline_mode<synchronous>, transform_indices = @transform_1, window_bounds = array<i64: 36, 8>}, {pipeline_mode = #tpu.pipeline_mode<synchronous>, transform_indices = @transform_2, window_bounds = array<i64: 72, 128>}, {pipeline_mode = #tpu.pipeline_mode<synchronous>, transform_indices = @transform_3, window_bounds = array<i64: 4, 128>}, {pipeline_mode = #tpu.pipeline_mode<synchronous>, transform_indices = @transform_4, window_bounds = array<i64: 3, 128>}, {transform_indices = @transform_5, window_bounds = array<i64: 1, 16, 16, 128>}]} {
    %c0 = arith.constant 0 : index
    %c0_0 = arith.constant 0 : index
    %0 = vector.load %arg5[%c0, %c0_0] : memref<3x128xf32, #tpu.memory_space<vmem>>, vector<3x128xf32>
    %1 = vector.extract_strided_slice %0 {offsets = [0, 0], sizes = [1, 8], strides = [1, 1]} : vector<3x128xf32> to vector<1x8xf32>
    %2 = vector.extract_strided_slice %0 {offsets = [1, 0], sizes = [1, 128], strides = [1, 1]} : vector<3x128xf32> to vector<1x128xf32>
    %3 = vector.extract_strided_slice %0 {offsets = [2, 0], sizes = [1, 128], strides = [1, 1]} : vector<3x128xf32> to vector<1x128xf32>
    %c0_1 = arith.constant 0 : index
    %c0_2 = arith.constant 0 : index
    %c0_3 = arith.constant 0 : index
    %c0_4 = arith.constant 0 : index
    %4 = vector.load %arg1[%c0_1, %c0_2, %c0_3, %c0_4] : memref<1x16x16x4xf32, #tpu.memory_space<vmem>>, vector<1x16x16x4xf32>
    %5 = vector.shape_cast %4 : vector<1x16x16x4xf32> to vector<16x16x4xf32>
    %c0_5 = arith.constant 0 : index
    %c0_6 = arith.constant 0 : index
    %6 = vector.load %arg2[%c0_5, %c0_6] : memref<36x8xf32, #tpu.memory_space<vmem>>, vector<36x8xf32>
    %cst = arith.constant 0.000000e+00 : f32
    %7 = vector.broadcast %cst : f32 to vector<1x18x4xf32>
    %c0_7 = arith.constant 0 : index
    %c0_8 = arith.constant 0 : index
    %c0_9 = arith.constant 0 : index
    %8 = vector.load %arg7[%c0_7, %c0_8, %c0_9] : memref<18x18x4xf32, #tpu.memory_space<vmem>>, vector<1x18x4xf32>
    tpu.vector_store %arg7[%c0_7, %c0_8, %c0_9], %7 {strides = array<i32>} : memref<18x18x4xf32, #tpu.memory_space<vmem>>, vector<1x18x4xf32>,
    %cst_10 = arith.constant 0.000000e+00 : f32
    %9 = vector.broadcast %cst_10 : f32 to vector<1x18x4xf32>
    %c17 = arith.constant 17 : index
    %c0_11 = arith.constant 0 : index
    %c0_12 = arith.constant 0 : index
    %10 = vector.load %arg7[%c17, %c0_11, %c0_12] : memref<18x18x4xf32, #tpu.memory_space<vmem>>, vector<1x18x4xf32>
    tpu.vector_store %arg7[%c17, %c0_11, %c0_12], %9 {strides = array<i32>} : memref<18x18x4xf32, #tpu.memory_space<vmem>>, vector<1x18x4xf32>,
    %cst_13 = arith.constant 0.000000e+00 : f32
    %11 = vector.broadcast %cst_13 : f32 to vector<18x1x4xf32>
    %c0_14 = arith.constant 0 : index
    %c0_15 = arith.constant 0 : index
    %c0_16 = arith.constant 0 : index
    %12 = vector.load %arg7[%c0_14, %c0_15, %c0_16] : memref<18x18x4xf32, #tpu.memory_space<vmem>>, vector<18x1x4xf32>
    tpu.vector_store %arg7[%c0_14, %c0_15, %c0_16], %11 {strides = array<i32>} : memref<18x18x4xf32, #tpu.memory_space<vmem>>, vector<18x1x4xf32>,
    %cst_17 = arith.constant 0.000000e+00 : f32
    %13 = vector.broadcast %cst_17 : f32 to vector<18x1x4xf32>
    %c0_18 = arith.constant 0 : index
    %c17_19 = arith.constant 17 : index
    %c0_20 = arith.constant 0 : index
    %14 = vector.load %arg7[%c0_18, %c17_19, %c0_20] : memref<18x18x4xf32, #tpu.memory_space<vmem>>, vector<18x1x4xf32>
    tpu.vector_store %arg7[%c0_18, %c17_19, %c0_20], %13 {strides = array<i32>} : memref<18x18x4xf32, #tpu.memory_space<vmem>>, vector<18x1x4xf32>,
    %c1 = arith.constant 1 : index
    %c1_21 = arith.constant 1 : index
    %c0_22 = arith.constant 0 : index
    %15 = vector.load %arg7[%c1, %c1_21, %c0_22] : memref<18x18x4xf32, #tpu.memory_space<vmem>>, vector<16x16x4xf32>
    tpu.vector_store %arg7[%c1, %c1_21, %c0_22], %5 {strides = array<i32>} : memref<18x18x4xf32, #tpu.memory_space<vmem>>, vector<16x16x4xf32>,
    %c0_23 = arith.constant 0 : index
    %c0_24 = arith.constant 0 : index
    %c0_25 = arith.constant 0 : index
    %16 = vector.load %arg7[%c0_23, %c0_24, %c0_25] : memref<18x18x4xf32, #tpu.memory_space<vmem>>, vector<18x18x4xf32>
    %17 = vector.extract_strided_slice %16 {offsets = [0, 0, 0], sizes = [16, 16, 4], strides = [1, 1, 1]} : vector<18x18x4xf32> to vector<16x16x4xf32>
    %c0_26 = arith.constant 0 : index
    %c0_27 = arith.constant 0 : index
    %c0_28 = arith.constant 0 : index
    %18 = vector.load %arg9[%c0_26, %c0_27, %c0_28] : memref<16x16x36xf32, #tpu.memory_space<vmem>>, vector<16x16x4xf32>
    tpu.vector_store %arg9[%c0_26, %c0_27, %c0_28], %17 {strides = array<i32>} : memref<16x16x36xf32, #tpu.memory_space<vmem>>, vector<16x16x4xf32>,
    %19 = vector.extract_strided_slice %16 {offsets = [0, 1, 0], sizes = [16, 16, 4], strides = [1, 1, 1]} : vector<18x18x4xf32> to vector<16x16x4xf32>
    %c0_29 = arith.constant 0 : index
    %c0_30 = arith.constant 0 : index
    %c4 = arith.constant 4 : index
    %20 = vector.load %arg9[%c0_29, %c0_30, %c4] : memref<16x16x36xf32, #tpu.memory_space<vmem>>, vector<16x16x4xf32>
    tpu.vector_store %arg9[%c0_29, %c0_30, %c4], %19 {strides = array<i32>} : memref<16x16x36xf32, #tpu.memory_space<vmem>>, vector<16x16x4xf32>,
    %21 = vector.extract_strided_slice %16 {offsets = [0, 2, 0], sizes = [16, 16, 4], strides = [1, 1, 1]} : vector<18x18x4xf32> to vector<16x16x4xf32>
    %c0_31 = arith.constant 0 : index
    %c0_32 = arith.constant 0 : index
    %c8 = arith.constant 8 : index
    %22 = vector.load %arg9[%c0_31, %c0_32, %c8] : memref<16x16x36xf32, #tpu.memory_space<vmem>>, vector<16x16x4xf32>
    tpu.vector_store %arg9[%c0_31, %c0_32, %c8], %21 {strides = array<i32>} : memref<16x16x36xf32, #tpu.memory_space<vmem>>, vector<16x16x4xf32>,
    %23 = vector.extract_strided_slice %16 {offsets = [1, 0, 0], sizes = [16, 16, 4], strides = [1, 1, 1]} : vector<18x18x4xf32> to vector<16x16x4xf32>
    %c0_33 = arith.constant 0 : index
    %c0_34 = arith.constant 0 : index
    %c12 = arith.constant 12 : index
    %24 = vector.load %arg9[%c0_33, %c0_34, %c12] : memref<16x16x36xf32, #tpu.memory_space<vmem>>, vector<16x16x4xf32>
    tpu.vector_store %arg9[%c0_33, %c0_34, %c12], %23 {strides = array<i32>} : memref<16x16x36xf32, #tpu.memory_space<vmem>>, vector<16x16x4xf32>,
    %25 = vector.extract_strided_slice %16 {offsets = [1, 1, 0], sizes = [16, 16, 4], strides = [1, 1, 1]} : vector<18x18x4xf32> to vector<16x16x4xf32>
    %c0_35 = arith.constant 0 : index
    %c0_36 = arith.constant 0 : index
    %c16 = arith.constant 16 : index
    %26 = vector.load %arg9[%c0_35, %c0_36, %c16] : memref<16x16x36xf32, #tpu.memory_space<vmem>>, vector<16x16x4xf32>
    tpu.vector_store %arg9[%c0_35, %c0_36, %c16], %25 {strides = array<i32>} : memref<16x16x36xf32, #tpu.memory_space<vmem>>, vector<16x16x4xf32>,
    %27 = vector.extract_strided_slice %16 {offsets = [1, 2, 0], sizes = [16, 16, 4], strides = [1, 1, 1]} : vector<18x18x4xf32> to vector<16x16x4xf32>
    %c0_37 = arith.constant 0 : index
    %c0_38 = arith.constant 0 : index
    %c20 = arith.constant 20 : index
    %28 = vector.load %arg9[%c0_37, %c0_38, %c20] : memref<16x16x36xf32, #tpu.memory_space<vmem>>, vector<16x16x4xf32>
    tpu.vector_store %arg9[%c0_37, %c0_38, %c20], %27 {strides = array<i32>} : memref<16x16x36xf32, #tpu.memory_space<vmem>>, vector<16x16x4xf32>,
    %29 = vector.extract_strided_slice %16 {offsets = [2, 0, 0], sizes = [16, 16, 4], strides = [1, 1, 1]} : vector<18x18x4xf32> to vector<16x16x4xf32>
    %c0_39 = arith.constant 0 : index
    %c0_40 = arith.constant 0 : index
    %c24 = arith.constant 24 : index
    %30 = vector.load %arg9[%c0_39, %c0_40, %c24] : memref<16x16x36xf32, #tpu.memory_space<vmem>>, vector<16x16x4xf32>
    tpu.vector_store %arg9[%c0_39, %c0_40, %c24], %29 {strides = array<i32>} : memref<16x16x36xf32, #tpu.memory_space<vmem>>, vector<16x16x4xf32>,
    %31 = vector.extract_strided_slice %16 {offsets = [2, 1, 0], sizes = [16, 16, 4], strides = [1, 1, 1]} : vector<18x18x4xf32> to vector<16x16x4xf32>
    %c0_41 = arith.constant 0 : index
    %c0_42 = arith.constant 0 : index
    %c28 = arith.constant 28 : index
    %32 = vector.load %arg9[%c0_41, %c0_42, %c28] : memref<16x16x36xf32, #tpu.memory_space<vmem>>, vector<16x16x4xf32>
    tpu.vector_store %arg9[%c0_41, %c0_42, %c28], %31 {strides = array<i32>} : memref<16x16x36xf32, #tpu.memory_space<vmem>>, vector<16x16x4xf32>,
    %33 = vector.extract_strided_slice %16 {offsets = [2, 2, 0], sizes = [16, 16, 4], strides = [1, 1, 1]} : vector<18x18x4xf32> to vector<16x16x4xf32>
    %c0_43 = arith.constant 0 : index
    %c0_44 = arith.constant 0 : index
    %c32 = arith.constant 32 : index
    %34 = vector.load %arg9[%c0_43, %c0_44, %c32] : memref<16x16x36xf32, #tpu.memory_space<vmem>>, vector<16x16x4xf32>
    tpu.vector_store %arg9[%c0_43, %c0_44, %c32], %33 {strides = array<i32>} : memref<16x16x36xf32, #tpu.memory_space<vmem>>, vector<16x16x4xf32>,
    %c0_45 = arith.constant 0 : index
    %c0_46 = arith.constant 0 : index
    %c0_47 = arith.constant 0 : index
    %35 = vector.load %arg9[%c0_45, %c0_46, %c0_47] : memref<16x16x36xf32, #tpu.memory_space<vmem>>, vector<16x16x36xf32>
    "tpu.trace_start"() <{level = 10 : i32, message = "hwk,kc->hwc"}> : () -> ()
    %cst_48 = arith.constant dense<0.000000e+00> : vector<16x16x8xf32>
    %36 = tpu.matmul %35, %6, %cst_48 {dimension_numbers = #tpu.dot_dimension_numbers<[2], [0], [0, 1], [1], [0, 0, 0, 1, 1, 1], [], []>} : vector<16x16x36xf32>, vector<36x8xf32>, vector<16x16x8xf32> -> vector<16x16x8xf32>
    "tpu.trace_stop"() : () -> ()
    %37 = vector.shape_cast %1 : vector<1x8xf32> to vector<1x1x8xf32>
    %38 = vector.broadcast %37 : vector<1x1x8xf32> to vector<16x16x8xf32>
    %39 = arith.addf %36, %38 : vector<16x16x8xf32>
    %cst_49 = arith.constant 0.000000e+00 : f32
    %cst_50 = arith.constant 6.000000e+00 : f32
    %40 = vector.broadcast %cst_49 : f32 to vector<16x16x8xf32>
    %41 = arith.maximumf %40, %39 : vector<16x16x8xf32>
    %42 = vector.broadcast %cst_50 : f32 to vector<16x16x8xf32>
    %43 = arith.minimumf %42, %41 : vector<16x16x8xf32>
    %c0_51 = arith.constant 0 : index
    %c0_52 = arith.constant 0 : index
    %44 = vector.load %arg3[%c0_51, %c0_52] : memref<72x128xf32, #tpu.memory_space<vmem>>, vector<72x128xf32>
    %cst_53 = arith.constant 0.000000e+00 : f32
    %45 = vector.broadcast %cst_53 : f32 to vector<1x18x8xf32>
    %c0_54 = arith.constant 0 : index
    %c0_55 = arith.constant 0 : index
    %c0_56 = arith.constant 0 : index
    %46 = vector.load %arg8[%c0_54, %c0_55, %c0_56] : memref<18x18x8xf32, #tpu.memory_space<vmem>>, vector<1x18x8xf32>
    tpu.vector_store %arg8[%c0_54, %c0_55, %c0_56], %45 {strides = array<i32>} : memref<18x18x8xf32, #tpu.memory_space<vmem>>, vector<1x18x8xf32>,
    %cst_57 = arith.constant 0.000000e+00 : f32
    %47 = vector.broadcast %cst_57 : f32 to vector<1x18x8xf32>
    %c17_58 = arith.constant 17 : index
    %c0_59 = arith.constant 0 : index
    %c0_60 = arith.constant 0 : index
    %48 = vector.load %arg8[%c17_58, %c0_59, %c0_60] : memref<18x18x8xf32, #tpu.memory_space<vmem>>, vector<1x18x8xf32>
    tpu.vector_store %arg8[%c17_58, %c0_59, %c0_60], %47 {strides = array<i32>} : memref<18x18x8xf32, #tpu.memory_space<vmem>>, vector<1x18x8xf32>,
    %cst_61 = arith.constant 0.000000e+00 : f32
    %49 = vector.broadcast %cst_61 : f32 to vector<18x1x8xf32>
    %c0_62 = arith.constant 0 : index
    %c0_63 = arith.constant 0 : index
    %c0_64 = arith.constant 0 : index
    %50 = vector.load %arg8[%c0_62, %c0_63, %c0_64] : memref<18x18x8xf32, #tpu.memory_space<vmem>>, vector<18x1x8xf32>
    tpu.vector_store %arg8[%c0_62, %c0_63, %c0_64], %49 {strides = array<i32>} : memref<18x18x8xf32, #tpu.memory_space<vmem>>, vector<18x1x8xf32>,
    %cst_65 = arith.constant 0.000000e+00 : f32
    %51 = vector.broadcast %cst_65 : f32 to vector<18x1x8xf32>
    %c0_66 = arith.constant 0 : index
    %c17_67 = arith.constant 17 : index
    %c0_68 = arith.constant 0 : index
    %52 = vector.load %arg8[%c0_66, %c17_67, %c0_68] : memref<18x18x8xf32, #tpu.memory_space<vmem>>, vector<18x1x8xf32>
    tpu.vector_store %arg8[%c0_66, %c17_67, %c0_68], %51 {strides = array<i32>} : memref<18x18x8xf32, #tpu.memory_space<vmem>>, vector<18x1x8xf32>,
    %c1_69 = arith.constant 1 : index
    %c1_70 = arith.constant 1 : index
    %c0_71 = arith.constant 0 : index
    %53 = vector.load %arg8[%c1_69, %c1_70, %c0_71] : memref<18x18x8xf32, #tpu.memory_space<vmem>>, vector<16x16x8xf32>
    tpu.vector_store %arg8[%c1_69, %c1_70, %c0_71], %43 {strides = array<i32>} : memref<18x18x8xf32, #tpu.memory_space<vmem>>, vector<16x16x8xf32>,
    %c0_72 = arith.constant 0 : index
    %c0_73 = arith.constant 0 : index
    %c0_74 = arith.constant 0 : index
    %54 = vector.load %arg8[%c0_72, %c0_73, %c0_74] : memref<18x18x8xf32, #tpu.memory_space<vmem>>, vector<18x18x8xf32>
    %55 = vector.extract_strided_slice %54 {offsets = [0, 0, 0], sizes = [16, 16, 8], strides = [1, 1, 1]} : vector<18x18x8xf32> to vector<16x16x8xf32>
    %c0_75 = arith.constant 0 : index
    %c0_76 = arith.constant 0 : index
    %c0_77 = arith.constant 0 : index
    %56 = vector.load %arg10[%c0_75, %c0_76, %c0_77] : memref<16x16x72xf32, #tpu.memory_space<vmem>>, vector<16x16x8xf32>
    tpu.vector_store %arg10[%c0_75, %c0_76, %c0_77], %55 {strides = array<i32>} : memref<16x16x72xf32, #tpu.memory_space<vmem>>, vector<16x16x8xf32>,
    %57 = vector.extract_strided_slice %54 {offsets = [0, 1, 0], sizes = [16, 16, 8], strides = [1, 1, 1]} : vector<18x18x8xf32> to vector<16x16x8xf32>
    %c0_78 = arith.constant 0 : index
    %c0_79 = arith.constant 0 : index
    %c8_80 = arith.constant 8 : index
    %58 = vector.load %arg10[%c0_78, %c0_79, %c8_80] : memref<16x16x72xf32, #tpu.memory_space<vmem>>, vector<16x16x8xf32>
    tpu.vector_store %arg10[%c0_78, %c0_79, %c8_80], %57 {strides = array<i32>} : memref<16x16x72xf32, #tpu.memory_space<vmem>>, vector<16x16x8xf32>,
    %59 = vector.extract_strided_slice %54 {offsets = [0, 2, 0], sizes = [16, 16, 8], strides = [1, 1, 1]} : vector<18x18x8xf32> to vector<16x16x8xf32>
    %c0_81 = arith.constant 0 : index
    %c0_82 = arith.constant 0 : index
    %c16_83 = arith.constant 16 : index
    %60 = vector.load %arg10[%c0_81, %c0_82, %c16_83] : memref<16x16x72xf32, #tpu.memory_space<vmem>>, vector<16x16x8xf32>
    tpu.vector_store %arg10[%c0_81, %c0_82, %c16_83], %59 {strides = array<i32>} : memref<16x16x72xf32, #tpu.memory_space<vmem>>, vector<16x16x8xf32>,
    %61 = vector.extract_strided_slice %54 {offsets = [1, 0, 0], sizes = [16, 16, 8], strides = [1, 1, 1]} : vector<18x18x8xf32> to vector<16x16x8xf32>
    %c0_84 = arith.constant 0 : index
    %c0_85 = arith.constant 0 : index
    %c24_86 = arith.constant 24 : index
    %62 = vector.load %arg10[%c0_84, %c0_85, %c24_86] : memref<16x16x72xf32, #tpu.memory_space<vmem>>, vector<16x16x8xf32>
    tpu.vector_store %arg10[%c0_84, %c0_85, %c24_86], %61 {strides = array<i32>} : memref<16x16x72xf32, #tpu.memory_space<vmem>>, vector<16x16x8xf32>,
    %63 = vector.extract_strided_slice %54 {offsets = [1, 1, 0], sizes = [16, 16, 8], strides = [1, 1, 1]} : vector<18x18x8xf32> to vector<16x16x8xf32>
    %c0_87 = arith.constant 0 : index
    %c0_88 = arith.constant 0 : index
    %c32_89 = arith.constant 32 : index
    %64 = vector.load %arg10[%c0_87, %c0_88, %c32_89] : memref<16x16x72xf32, #tpu.memory_space<vmem>>, vector<16x16x8xf32>
    tpu.vector_store %arg10[%c0_87, %c0_88, %c32_89], %63 {strides = array<i32>} : memref<16x16x72xf32, #tpu.memory_space<vmem>>, vector<16x16x8xf32>,
    %65 = vector.extract_strided_slice %54 {offsets = [1, 2, 0], sizes = [16, 16, 8], strides = [1, 1, 1]} : vector<18x18x8xf32> to vector<16x16x8xf32>
    %c0_90 = arith.constant 0 : index
    %c0_91 = arith.constant 0 : index
    %c40 = arith.constant 40 : index
    %66 = vector.load %arg10[%c0_90, %c0_91, %c40] : memref<16x16x72xf32, #tpu.memory_space<vmem>>, vector<16x16x8xf32>
    tpu.vector_store %arg10[%c0_90, %c0_91, %c40], %65 {strides = array<i32>} : memref<16x16x72xf32, #tpu.memory_space<vmem>>, vector<16x16x8xf32>,
    %67 = vector.extract_strided_slice %54 {offsets = [2, 0, 0], sizes = [16, 16, 8], strides = [1, 1, 1]} : vector<18x18x8xf32> to vector<16x16x8xf32>
    %c0_92 = arith.constant 0 : index
    %c0_93 = arith.constant 0 : index
    %c48 = arith.constant 48 : index
    %68 = vector.load %arg10[%c0_92, %c0_93, %c48] : memref<16x16x72xf32, #tpu.memory_space<vmem>>, vector<16x16x8xf32>
    tpu.vector_store %arg10[%c0_92, %c0_93, %c48], %67 {strides = array<i32>} : memref<16x16x72xf32, #tpu.memory_space<vmem>>, vector<16x16x8xf32>,
    %69 = vector.extract_strided_slice %54 {offsets = [2, 1, 0], sizes = [16, 16, 8], strides = [1, 1, 1]} : vector<18x18x8xf32> to vector<16x16x8xf32>
    %c0_94 = arith.constant 0 : index
    %c0_95 = arith.constant 0 : index
    %c56 = arith.constant 56 : index
    %70 = vector.load %arg10[%c0_94, %c0_95, %c56] : memref<16x16x72xf32, #tpu.memory_space<vmem>>, vector<16x16x8xf32>
    tpu.vector_store %arg10[%c0_94, %c0_95, %c56], %69 {strides = array<i32>} : memref<16x16x72xf32, #tpu.memory_space<vmem>>, vector<16x16x8xf32>,
    %71 = vector.extract_strided_slice %54 {offsets = [2, 2, 0], sizes = [16, 16, 8], strides = [1, 1, 1]} : vector<18x18x8xf32> to vector<16x16x8xf32>
    %c0_96 = arith.constant 0 : index
    %c0_97 = arith.constant 0 : index
    %c64 = arith.constant 64 : index
    %72 = vector.load %arg10[%c0_96, %c0_97, %c64] : memref<16x16x72xf32, #tpu.memory_space<vmem>>, vector<16x16x8xf32>
    tpu.vector_store %arg10[%c0_96, %c0_97, %c64], %71 {strides = array<i32>} : memref<16x16x72xf32, #tpu.memory_space<vmem>>, vector<16x16x8xf32>,
    %c0_98 = arith.constant 0 : index
    %c0_99 = arith.constant 0 : index
    %c0_100 = arith.constant 0 : index
    %73 = vector.load %arg10[%c0_98, %c0_99, %c0_100] : memref<16x16x72xf32, #tpu.memory_space<vmem>>, vector<16x16x72xf32>
    "tpu.trace_start"() <{level = 10 : i32, message = "hwk,kc->hwc"}> : () -> ()
    %cst_101 = arith.constant dense<0.000000e+00> : vector<16x16x128xf32>
    %74 = tpu.matmul %73, %44, %cst_101 {dimension_numbers = #tpu.dot_dimension_numbers<[2], [0], [0, 1], [1], [0, 0, 0, 1, 1, 1], [], []>} : vector<16x16x72xf32>, vector<72x128xf32>, vector<16x16x128xf32> -> vector<16x16x128xf32>
    "tpu.trace_stop"() : () -> ()
    %75 = vector.shape_cast %2 : vector<1x128xf32> to vector<1x1x128xf32>
    %76 = vector.broadcast %75 : vector<1x1x128xf32> to vector<16x16x128xf32>
    %77 = arith.addf %74, %76 : vector<16x16x128xf32>
    %cst_102 = arith.constant 0.000000e+00 : f32
    %cst_103 = arith.constant 6.000000e+00 : f32
    %78 = vector.broadcast %cst_102 : f32 to vector<16x16x128xf32>
    %79 = arith.maximumf %78, %77 : vector<16x16x128xf32>
    %80 = vector.broadcast %cst_103 : f32 to vector<16x16x128xf32>
    %81 = arith.minimumf %80, %79 : vector<16x16x128xf32>
    %c0_104 = arith.constant 0 : index
    %c0_105 = arith.constant 0 : index
    %82 = vector.load %arg4[%c0_104, %c0_105] : memref<4x128xf32, #tpu.memory_space<vmem>>, vector<4x128xf32>
    "tpu.trace_start"() <{level = 10 : i32, message = "hwc,cd->hwd"}> : () -> ()
    %cst_106 = arith.constant dense<0.000000e+00> : vector<16x16x128xf32>
    %83 = tpu.matmul %5, %82, %cst_106 {dimension_numbers = #tpu.dot_dimension_numbers<[2], [0], [0, 1], [1], [0, 0, 0, 1, 1, 1], [], []>} : vector<16x16x4xf32>, vector<4x128xf32>, vector<16x16x128xf32> -> vector<16x16x128xf32>
    "tpu.trace_stop"() : () -> ()
    %84 = vector.shape_cast %3 : vector<1x128xf32> to vector<1x1x128xf32>
    %85 = vector.broadcast %84 : vector<1x1x128xf32> to vector<16x16x128xf32>
    %86 = arith.addf %83, %85 : vector<16x16x128xf32>
    %87 = arith.addf %86, %81 : vector<16x16x128xf32>
    %c0_107 = arith.constant 0 : index
    %c0_108 = arith.constant 0 : index
    %c0_109 = arith.constant 0 : index
    %c0_110 = arith.constant 0 : index
    %88 = vector.load %arg6[%c0_107, %c0_108, %c0_109, %c0_110] : memref<1x16x16x128xf32, #tpu.memory_space<vmem>>, vector<1x16x16x128xf32>
    %89 = vector.shape_cast %88 : vector<1x16x16x128xf32> to vector<16x16x128xf32>
    %90 = vector.shape_cast %87 : vector<16x16x128xf32> to vector<1x16x16x128xf32>
    tpu.vector_store %arg6[%c0_107, %c0_108, %c0_109, %c0_110], %90 {strides = array<i32>} : memref<1x16x16x128xf32, #tpu.memory_space<vmem>>, vector<1x16x16x128xf32>,
    return
  }
  func.func @transform_0(%arg0: i32) -> (i32, i32, i32, i32) {
    %c0_i32 = arith.constant 0 : i32
    %c0_i32_0 = arith.constant 0 : i32
    %c0_i32_1 = arith.constant 0 : i32
    %c0_i32_2 = arith.constant 0 : i32
    return %arg0, %c0_i32, %c0_i32_0, %c0_i32_1 : i32, i32, i32, i32
  }
  func.func @transform_1(%arg0: i32) -> (i32, i32) {
    %c0_i32 = arith.constant 0 : i32
    %c0_i32_0 = arith.constant 0 : i32
    %c0_i32_1 = arith.constant 0 : i32
    return %c0_i32, %c0_i32_0 : i32, i32
  }
  func.func @transform_2(%arg0: i32) -> (i32, i32) {
    %c0_i32 = arith.constant 0 : i32
    %c0_i32_0 = arith.constant 0 : i32
    %c0_i32_1 = arith.constant 0 : i32
    return %c0_i32, %c0_i32_0 : i32, i32
  }
  func.func @transform_3(%arg0: i32) -> (i32, i32) {
    %c0_i32 = arith.constant 0 : i32
    %c0_i32_0 = arith.constant 0 : i32
    %c0_i32_1 = arith.constant 0 : i32
    return %c0_i32, %c0_i32_0 : i32, i32
  }
  func.func @transform_4(%arg0: i32) -> (i32, i32) {
    %c0_i32 = arith.constant 0 : i32
    %c0_i32_0 = arith.constant 0 : i32
    %c0_i32_1 = arith.constant 0 : i32
    return %c0_i32, %c0_i32_0 : i32, i32
  }
  func.func @transform_5(%arg0: i32) -> (i32, i32, i32, i32) {
    %c0_i32 = arith.constant 0 : i32
    %c0_i32_0 = arith.constant 0 : i32
    %c0_i32_1 = arith.constant 0 : i32
    %c0_i32_2 = arith.constant 0 : i32
    return %arg0, %c0_i32, %c0_i32_0, %c0_i32_1 : i32, i32, i32, i32
  }
}

</mosaic_0001>

<bundles_post_ra>
// kernel: tpu_custom_call.1
= control target key start
LH: loop header
LB: loop body
LE: loop exit
PB: predicated region body
PF: predicated region fallthrough
CT: control target
= control target key end

     0   :  { %10 = vsyncpa [#allocation7], 0  ;;  %s8197_s0 = inlined_call_operand.vmem [shape: f32[2,16,16,4], index: 0, kind: input, shape index: {}]   ;;  %s8198_s1 = inlined_call_operand.vmem [shape: f32[36,8], index: 1, kind: input, shape index: {}]   ;;  %s8199_s2 = inlined_call_operand.vmem [shape: f32[72,128], index: 2, kind: input, shape index: {}]   ;;  %s8200_s3 = inlined_call_operand.vmem [shape: f32[4,128], index: 3, kind: input, shape index: {}]   ;;  %s8201_s4 = inlined_call_operand.vmem [shape: f32[3,128], index: 4, kind: input, shape index: {}]   ;;  %s8202_s5 = inlined_call_operand.hbm [shape: f32[2,16,16,128], index: 5, kind: output, shape index: {}]  }
   0x1   :  { %12 = vsyncpa [#allocation7 + $0x1], 0  ;;  %s4865_s18 = smov 0   ;;  %s4867_s19 = smov 0  }
   0x2   :  { %s4869_s20 = smov 0   ;;  %s4871_s21 = smov 0  }
   0x3 LB: > { %s4886_s22 = sadd.s32 4294967295, %s4819_s21   ;;  %s4538_s23 = sadd.s32 4294967294, %s4819_s21   ;;  %s4819_s21 = sphi %s4871_s21, %s8274_s21   ;;  %s4815_s20 = sphi %s4869_s20, %s8273_s20   ;;  %s4811_s19 = sphi %s4867_s19, %s8272_s19   ;;  %s4807_s18 = sphi %s4865_s18, %s8271_s18  }
   0x4   : > { %s4890_s24 = sadd.s32 1, %s4819_s21   ;;  %s135_s25 = sadd.s32 1, %s4815_s20 }
   0x5   : > { %s132_s26 = ssub.s32 %s4819_s21, %s4890_s24  ;;  %p145_p0 = scmp.ne.s32.totalorder %s4815_s20, %s4811_s19 }
   0x6   : > { %p133_p1 = scmp.eq.s32.totalorder %s132_s26, 0  ;;  %p146_p2 = scmp.eq.s32.totalorder %s4886_s22, 1 }
   0x7   : > { %p151_p3 = scmp.ne.s32.totalorder %s4811_s19, %s4807_s18  ;;  %p152_p4 = scmp.eq.s32.totalorder %s4538_s23, 1 }
   0x8   : > { %s4901_s27 = scalar_select %p133_p1, %s4815_s20, %s135_s25  }
   0x9   : > { %p4903_p5 = por %p146_p2, %p145_p0  ;;  %p4907_p6 = por %p152_p4, %p151_p3 }
   0xa   : > { %p4541_p7 = scmp.ge.s32.totalorder %s4819_s21, 1  ;;  %p190_p8 = scmp.lt.s32.totalorder %s4819_s21, 3 }
   0xc   : > { %p191_p9 = pnand %p4541_p7, %p190_p8 }
   0xe   : > { %194 = sbr.rel (%p191_p9) target bundleno = 2421 (0x975), region = 40 }
  0x13   : > { %vm261_vm0 = vcmask 31744   ;;  %v8203_v0 = vmov 0.0   ;;  %vm264_vm1 = vcmask 25600   ;;  %vm270_vm2 = vcmask 24576   ;;  %s4822_s30 = smov 4   ;;  %p218_p10 = scmp.lt.s32.totalorder %s4886_s22, 1 }
  0x14   : > { %263 = vst.msk [vmem:[#allocation2 + $0x8] sm:$0xff] %vm261_vm0, %v8203_v0  ;;  %vm620_vm3 = vcmask 64544   ;;  %vm622_vm4 = vcmask 57376   ;;  %vm618_vm5 = vcmask 64545   ;;  %s4823_s11 = smov 8   ;;  %vm817_vm6 = vcmask 91200  }
  0x15   : > { %262 = vst.msk [vmem:[#allocation2] sm:$0xff] %vm261_vm0, %v8203_v0  ;;  %s219_s6 = scalar_select %p218_p10, %s4886_s22, 1  ;;  %vm813_vm7 = vcmask 97346   ;;  %vm815_vm8 = vcmask 97344   ;;  %vm962_vm9 = vcmask 130144   ;;  %vm1140_vm10 = vcmask 162945  }
  0x16   : > { %267 = vst.msk [vmem:[#allocation2 + $0x198] sm:$0xff] %vm261_vm0, %v8203_v0  ;;  %s4824_s12 = smov 12   ;;  %s4825_s13 = smov 16   ;;  %vm1142_vm11 = vcmask 162944   ;;  %vm1144_vm12 = vcmask 155776   ;;  %vm1335_vm13 = vcmask 195746  }
  0x17   : > { %268 = vst.msk [vmem:[#allocation2 + $0x1a0] sm:$0xff] %vm261_vm0, %v8203_v0  ;;  %s4648_s7 = sshll.u32 %s219_s6, 8  ;;  %s4826_s14 = smov 20   ;;  %vm1337_vm14 = vcmask 195744   ;;  %vm1339_vm15 = vcmask 189600  }
  0x18   : > { %265 = vst.msk [vmem:[#allocation2 + $0x10] sm:$0x3] %vm264_vm1, %v8203_v0  ;;  %s5006_s10 = scalar_lea.vmem %s8197_s0, %s4648_s7  ;;  %s4827_s15 = smov 24  }
  0x19   : > { %269 = vst.msk [vmem:[#allocation2 + $0x1a8] sm:$0x3] %vm264_vm1, %v8203_v0  ;;  %v5015_v4 = vld [vmem:[%s5006_s10] sm:$0xff]  ;;  %v5020_v5 = vld [vmem:[%s5006_s10 + $0x10] sm:$0xff]  ;;  %v5025_v6 = vld [vmem:[%s5006_s10 + $0x18] sm:$0xff]  ;;  %s4828_s16 = smov 28  }
  0x1a   : > { %289 = vst.msk [vmem:[#allocation2 + $0x11] sm:$0x1] %vm270_vm2, %v8203_v0  ;;  %v5030_v7 = vld [vmem:[%s5006_s10 + $0x20] sm:$0xff]  ;;  %v5035_v8 = vld [vmem:[%s5006_s10 + $0x8] sm:$0xff]  ;;  %v5045_v10 = vld [vmem:[%s5006_s10 + $0x30] sm:$0xff]  ;;  %vm1484_vm1 = vcmask 228544  }
  0x1b   : > { %v4925_v1 = vld [vmem:[#allocation2 + $0x8] sm:$0xff]  ;;  %271 = vst.msk [vmem:[#allocation2] sm:$0x1] %vm270_vm2, %v8203_v0  ;;  %v5050_v11 = vld [vmem:[%s5006_s10 + $0x38] sm:$0xff]  ;;  %v5091_v19 = vld [vmem:[%s5006_s10 + $0x40] sm:$0xff]  ;;  %s4829_s17 = smov 32  }
  0x1c   : > { %476 = vrot.lane.b32.xlu0 %v4925_v1, %s4822_s30  ;;  %395 = vst.msk [vmem:[#allocation4 + $0x8] sm:$0xff] %vm261_vm0, %v4925_v1  ;;  %v5040_v9 = vld [vmem:[%s5006_s10 + $0x28] sm:$0xff]  ;;  %v5103_v22 = vld [vmem:[%s5006_s10 + $0x50] sm:$0xff]  ;;  %v5110_v23 = vld [vmem:[%s5006_s10 + $0x58] sm:$0xff]  ;;  %s4832_s25 = smov 56   ;;  %s4833_s26 = smov 64  }
  0x1d   : > { %272 = vst.msk [vmem:[#allocation2 + $0x18] sm:$0x1] %vm270_vm2, %v8203_v0  ;;  %v5098_v21 = vld [vmem:[%s5006_s10 + $0x48] sm:$0xff]  ;;  %v5119_v25 = vld [vmem:[%s5006_s10 + $0x60] sm:$0xff]  ;;  %v5135_v27 = vld [vmem:[%s5006_s10 + $0x70] sm:$0xff] }
  0x1e   : > { %273 = vst.msk [vmem:[#allocation2 + $0x30] sm:$0x1] %vm270_vm2, %v8203_v0  ;;  %v5124_v26 = vld [vmem:[%s5006_s10 + $0x68] sm:$0xff]  ;;  %v5164_v34 = vld [vmem:[%s5006_s10 + $0x78] sm:$0xff]  ;;  %v5179_v37 = vld [vmem:[%s5006_s10 + $0x80] sm:$0xff] }
  0x1f   : > { %274 = vst.msk [vmem:[#allocation2 + $0x48] sm:$0x1] %vm270_vm2, %v8203_v0  ;;  %v5184_v38 = vld [vmem:[%s5006_s10 + $0x88] sm:$0xff]  ;;  %v5203_v41 = vld [vmem:[%s5006_s10 + $0x90] sm:$0xff]  ;;  %v5210_v43 = vld [vmem:[%s5006_s10 + $0x98] sm:$0xff] }
  0x20   : > { %275 = vst.msk [vmem:[#allocation2 + $0x60] sm:$0x1] %vm270_vm2, %v8203_v0  ;;  %v5231_v47 = vld [vmem:[%s5006_s10 + $0xa0] sm:$0xff]  ;;  %v5236_v48 = vld [vmem:[%s5006_s10 + $0xa8] sm:$0xff]  ;;  %v5255_v51 = vld [vmem:[%s5006_s10 + $0xb0] sm:$0xff] }
  0x21   : > { %v4941_v2 = vld [vmem:[#allocation2 + $0x10] sm:$0x3]  ;;  %276 = vst.msk [vmem:[#allocation2 + $0x78] sm:$0x1] %vm270_vm2, %v8203_v0  ;;  %v5262_v53 = vld [vmem:[%s5006_s10 + $0xb8] sm:$0xff]  ;;  %v5283_v57 = vld [vmem:[%s5006_s10 + $0xc0] sm:$0xff] }
  0x22   : > { %478 = vrot.lane.b32.xlu1 %v4941_v2, %s4822_s30  ;;  %277 = vst.msk [vmem:[#allocation2 + $0x90] sm:$0x1] %vm270_vm2, %v8203_v0  ;;  %v4949_v3 = vld [vmem:[#allocation2] sm:$0xff]  ;;  %v5288_v58 = vld [vmem:[%s5006_s10 + $0xc8] sm:$0xff]  ;;  %v5307_v61 = vld [vmem:[%s5006_s10 + $0xd0] sm:$0xff] }
  0x23   : > { %278 = vst.msk [vmem:[#allocation2 + $0xa8] sm:$0x1] %vm270_vm2, %v8203_v0  ;;  %v5314_v63 = vld [vmem:[%s5006_s10 + $0xd8] sm:$0xff] }
  0x24   : > { %279 = vst.msk [vmem:[#allocation2 + $0xc0] sm:$0x1] %vm270_vm2, %v8203_v0  ;;  %474 = vrot.lane.b32.xlu0 %v4949_v3, %s4822_s30 }
  0x25   : > { %280 = vst.msk [vmem:[#allocation2 + $0xd8] sm:$0x1] %vm270_vm2, %v8203_v0 }
  0x26   : > { %281 = vst.msk [vmem:[#allocation2 + $0xf0] sm:$0x1] %vm270_vm2, %v8203_v0 }
  0x27   : > { %282 = vst.msk [vmem:[#allocation2 + $0x108] sm:$0x1] %vm270_vm2, %v8203_v0 }
  0x28   : > { %283 = vst.msk [vmem:[#allocation2 + $0x120] sm:$0x1] %vm270_vm2, %v8203_v0 }
  0x29   : > { %284 = vst.msk [vmem:[#allocation2 + $0x138] sm:$0x1] %vm270_vm2, %v8203_v0 }
  0x2a   : > { %285 = vst.msk [vmem:[#allocation2 + $0x150] sm:$0x1] %vm270_vm2, %v8203_v0 }
  0x2b   : > { %286 = vst.msk [vmem:[#allocation2 + $0x168] sm:$0x1] %vm270_vm2, %v8203_v0 }
  0x2c   : > { %287 = vst.msk [vmem:[#allocation2 + $0x180] sm:$0x1] %vm270_vm2, %v8203_v0 }
  0x2d   : > { %288 = vst.msk [vmem:[#allocation2 + $0x198] sm:$0x1] %vm270_vm2, %v8203_v0 }
  0x2e   : > { %290 = vst.msk [vmem:[#allocation2 + $0x29] sm:$0x1] %vm270_vm2, %v8203_v0 }
  0x2f   : > { %291 = vst.msk [vmem:[#allocation2 + $0x41] sm:$0x1] %vm270_vm2, %v8203_v0 }
  0x30   : > { %292 = vst.msk [vmem:[#allocation2 + $0x59] sm:$0x1] %vm270_vm2, %v8203_v0 }
  0x31   : > { %293 = vst.msk [vmem:[#allocation2 + $0x71] sm:$0x1] %vm270_vm2, %v8203_v0 }
  0x32   : > { %294 = vst.msk [vmem:[#allocation2 + $0x89] sm:$0x1] %vm270_vm2, %v8203_v0 }
  0x33   : > { %295 = vst.msk [vmem:[#allocation2 + $0xa1] sm:$0x1] %vm270_vm2, %v8203_v0 }
  0x34   : > { %296 = vst.msk [vmem:[#allocation2 + $0xb9] sm:$0x1] %vm270_vm2, %v8203_v0 }
  0x35   : > { %297 = vst.msk [vmem:[#allocation2 + $0xd1] sm:$0x1] %vm270_vm2, %v8203_v0 }
  0x36   : > { %298 = vst.msk [vmem:[#allocation2 + $0xe9] sm:$0x1] %vm270_vm2, %v8203_v0 }
  0x37   : > { %299 = vst.msk [vmem:[#allocation2 + $0x101] sm:$0x1] %vm270_vm2, %v8203_v0 }
  0x38   : > { %300 = vst.msk [vmem:[#allocation2 + $0x119] sm:$0x1] %vm270_vm2, %v8203_v0 }
  0x39   : > { %301 = vst.msk [vmem:[#allocation2 + $0x131] sm:$0x1] %vm270_vm2, %v8203_v0 }
  0x3a   : > { %302 = vst.msk [vmem:[#allocation2 + $0x149] sm:$0x1] %vm270_vm2, %v8203_v0 }
  0x3b   : > { %303 = vst.msk [vmem:[#allocation2 + $0x161] sm:$0x1] %vm270_vm2, %v8203_v0 }
  0x3c   : > { %304 = vst.msk [vmem:[#allocation2 + $0x179] sm:$0x1] %vm270_vm2, %v8203_v0 }
  0x3d   : > { %305 = vst.msk [vmem:[#allocation2 + $0x191] sm:$0x1] %vm270_vm2, %v8203_v0 }
  0x3e   : > { %306 = vst.msk [vmem:[#allocation2 + $0x1a9] sm:$0x1] %vm270_vm2, %v8203_v0  ;;  %vm1664_vm2 = vcmask 261344  }
  0x3f   : > { %394 = vst.msk [vmem:[#allocation4] sm:$0xff] %vm261_vm0, %v4949_v3 }
  0x40   : > { %308 = vst.msk [vmem:[#allocation2 + $0x19] sm:$0xff] %vm261_vm0, %v5015_v4 }
  0x41   : > { %310 = vst.msk [vmem:[#allocation2 + $0x31] sm:$0xff] %vm261_vm0, %v5020_v5 }
  0x42   : > { %311 = vst.msk [vmem:[#allocation2 + $0x39] sm:$0xff] %vm261_vm0, %v5025_v6 }
  0x43   : > { %312 = vst.msk [vmem:[#allocation2 + $0x49] sm:$0xff] %vm261_vm0, %v5030_v7 }
  0x44   : > { %309 = vst.msk [vmem:[#allocation2 + $0x21] sm:$0xff] %vm261_vm0, %v5035_v8 }
  0x45   : > { %313 = vst.msk [vmem:[#allocation2 + $0x51] sm:$0xff] %vm261_vm0, %v5040_v9 }
  0x46   : > { %314 = vst.msk [vmem:[#allocation2 + $0x61] sm:$0xff] %vm261_vm0, %v5045_v10 }
  0x47   : > { %v5056_v12 = vld [vmem:[#allocation2 + $0x18] sm:$0xff]  ;;  %315 = vst.msk [vmem:[#allocation2 + $0x69] sm:$0xff] %vm261_vm0, %v5050_v11 }
  0x48   : > { %480 = vrot.lane.b32.xlu1 %v5056_v12, %s4822_s30  ;;  %396 = vst.msk [vmem:[#allocation4 + $0x10] sm:$0xff] %vm261_vm0, %v5056_v12  ;;  %v5064_v13 = vld [vmem:[#allocation2 + $0x30] sm:$0xff] }
  0x49   : > { %486 = vrot.lane.b32.xlu0 %v5064_v13, %s4822_s30  ;;  %398 = vst.msk [vmem:[#allocation4 + $0x20] sm:$0xff] %vm261_vm0, %v5064_v13  ;;  %v5070_v14 = vld [vmem:[#allocation2 + $0x38] sm:$0xff]  ;;  %v5149_v30 = vld [vmem:[#allocation2 + $0x40] sm:$0x3] }
  0x4a   : > { %399 = vst.msk [vmem:[#allocation4 + $0x28] sm:$0xff] %vm261_vm0, %v5070_v14  ;;  %v5074_v15 = vld [vmem:[#allocation2 + $0x48] sm:$0xff] }
  0x4b   : > { %400 = vst.msk [vmem:[#allocation4 + $0x30] sm:$0xff] %vm261_vm0, %v5074_v15  ;;  %v5078_v16 = vld [vmem:[#allocation2 + $0x20] sm:$0xff]  ;;  %v5114_v24 = vld [vmem:[#allocation2 + $0x28] sm:$0x3] }
  0x4c   : > { %482 = vrot.lane.b32.xlu2 %v5078_v16, %s4822_s30  ;;  %397 = vst.msk [vmem:[#allocation4 + $0x18] sm:$0xff] %vm261_vm0, %v5078_v16  ;;  %v5084_v17 = vld [vmem:[#allocation2 + $0x50] sm:$0xff]  ;;  %v5192_v39 = vld [vmem:[#allocation2 + $0x58] sm:$0x3] }
  0x4d   : > { %401 = vst.msk [vmem:[#allocation4 + $0x38] sm:$0xff] %vm261_vm0, %v5084_v17  ;;  %v5088_v18 = vld [vmem:[#allocation2 + $0x60] sm:$0xff] }
  0x4e   : > { %402 = vst.msk [vmem:[#allocation4 + $0x40] sm:$0xff] %vm261_vm0, %v5088_v18  ;;  %v5095_v20 = vld [vmem:[#allocation2 + $0x68] sm:$0xff]  ;;  %v5220_v45 = vld [vmem:[#allocation2 + $0x70] sm:$0x3] }
  0x4f   : > { %403 = vst.msk [vmem:[#allocation4 + $0x48] sm:$0xff] %vm261_vm0, %v5095_v20 }
  0x50   : > { %488 = vrot.lane.b32.xlu1 %v5070_v14, %s4822_s30  ;;  %316 = vst.msk [vmem:[#allocation2 + $0x79] sm:$0xff] %vm261_vm0, %v5091_v19 }
  0x51   : > { %8228 = vst [vmem:[#allocation9_spill] sm:$0xff] %v5110_v23  ;;  %492 = vrot.lane.b32.xlu0 %v5074_v15, %s4822_s30 }
  0x52   : > { %317 = vst.msk [vmem:[#allocation2 + $0x81] sm:$0xff] %vm261_vm0, %v5098_v21 }
  0x53   : > { %8229 = vst [vmem:[#allocation10_spill] sm:$0xff] %v5119_v25 }
  0x54   : > { %318 = vst.msk [vmem:[#allocation2 + $0x91] sm:$0xff] %vm261_vm0, %v5103_v22  ;;  %484 = vrot.lane.b32.xlu2 %v5114_v24, %s4822_s30 }
  0x55   : > { %8230 = vst [vmem:[#allocation11_spill] sm:$0xff] %v5124_v26 }
  0x56   : > { %319 = vst.msk [vmem:[#allocation2 + $0x99] sm:$0xff] %vm261_vm0, %v5110_v23 }
  0x57   : > { %320 = vst.msk [vmem:[#allocation2 + $0xa9] sm:$0xff] %vm261_vm0, %v5119_v25  ;;  %v5137_v28 = vld [vmem:[#allocation2 + $0x78] sm:$0xff] }
  0x58   : > { %321 = vst.msk [vmem:[#allocation2 + $0xb1] sm:$0xff] %vm261_vm0, %v5124_v26  ;;  %494 = vrot.lane.b32.xlu1 %v5084_v17, %s4822_s30 }
  0x59   : > { %8231 = vst [vmem:[#allocation12_spill] sm:$0xff] %v5135_v27  ;;  %v5145_v29 = vld [vmem:[#allocation2 + $0x80] sm:$0xff]  ;;  %498 = vrot.lane.b32.xlu0 %v5088_v18, %s4822_s30  ;;  %v5244_v49 = vld [vmem:[#allocation2 + $0x88] sm:$0x3] }
  0x5a   : > { %322 = vst.msk [vmem:[#allocation2 + $0xc1] sm:$0xff] %vm261_vm0, %v5135_v27 }
  0x5b   : > { %404 = vst.msk [vmem:[#allocation4 + $0x50] sm:$0xff] %vm261_vm0, %v5137_v28  ;;  %v5153_v31 = vld [vmem:[#allocation2 + $0x90] sm:$0xff] }
  0x5c   : > { %405 = vst.msk [vmem:[#allocation4 + $0x58] sm:$0xff] %vm261_vm0, %v5145_v29  ;;  %490 = vrot.lane.b32.xlu2 %v5149_v30, %s4822_s30 }
  0x5d   : > { %406 = vst.msk [vmem:[#allocation4 + $0x60] sm:$0xff] %vm261_vm0, %v5153_v31  ;;  %v5157_v32 = vld [vmem:[#allocation2 + $0x98] sm:$0xff]  ;;  %v5272_v55 = vld [vmem:[#allocation2 + $0xa0] sm:$0x3] }
  0x5e   : > { %407 = vst.msk [vmem:[#allocation4 + $0x68] sm:$0xff] %vm261_vm0, %v5157_v32  ;;  %v5161_v33 = vld [vmem:[#allocation2 + $0xa8] sm:$0xff] }
  0x5f   : > { %8232 = vst [vmem:[#allocation13_spill] sm:$0xff] %v5164_v34  ;;  %v5170_v35 = vld [vmem:[#allocation2 + $0xb0] sm:$0xff]  ;;  %v5296_v59 = vld [vmem:[#allocation2 + $0xb8] sm:$0x3] }
  0x60   : > { %408 = vst.msk [vmem:[#allocation4 + $0x70] sm:$0xff] %vm261_vm0, %v5161_v33  ;;  %500 = vrot.lane.b32.xlu1 %v5095_v20, %s4822_s30 }
  0x61   : > { %409 = vst.msk [vmem:[#allocation4 + $0x78] sm:$0xff] %vm261_vm0, %v5170_v35  ;;  %v5174_v36 = vld [vmem:[#allocation2 + $0xc0] sm:$0xff]  ;;  %504 = vrot.lane.b32.xlu0 %v5137_v28, %s4822_s30 }
  0x62   : > { %323 = vst.msk [vmem:[#allocation2 + $0xc9] sm:$0xff] %vm261_vm0, %v5164_v34 }
  0x63   : > { %8233 = vst [vmem:[#allocation14_spill] sm:$0xff] %v5179_v37 }
  0x64   : > { %410 = vst.msk [vmem:[#allocation4 + $0x80] sm:$0xff] %vm261_vm0, %v5174_v36  ;;  %496 = vrot.lane.b32.xlu2 %v5192_v39, %s4822_s30 }
  0x65   : > { %8234 = vst [vmem:[#allocation15_spill] sm:$0xff] %v5184_v38 }
  0x66   : > { %324 = vst.msk [vmem:[#allocation2 + $0xd9] sm:$0xff] %vm261_vm0, %v5179_v37 }
  0x67   : > { %325 = vst.msk [vmem:[#allocation2 + $0xe1] sm:$0xff] %vm261_vm0, %v5184_v38 }
  0x68   : > { %8235 = vst [vmem:[#allocation16_spill] sm:$0xff] %v5203_v41  ;;  %506 = vrot.lane.b32.xlu1 %v5145_v29, %s4822_s30 }
  0x69   : > { %v5198_v40 = vld [vmem:[#allocation2 + $0xc8] sm:$0xff]  ;;  %326 = vst.msk [vmem:[#allocation2 + $0xf1] sm:$0xff] %vm261_vm0, %v5203_v41  ;;  %510 = vrot.lane.b32.xlu0 %v5153_v31, %s4822_s30 }
  0x6a   : > { %411 = vst.msk [vmem:[#allocation4 + $0x88] sm:$0xff] %vm261_vm0, %v5198_v40 }
  0x6b   : > { %8236 = vst [vmem:[#allocation17_spill] sm:$0xff] %v5210_v43 }
  0x6c   : > { %327 = vst.msk [vmem:[#allocation2 + $0xf9] sm:$0xff] %vm261_vm0, %v5210_v43  ;;  %502 = vrot.lane.b32.xlu2 %v5220_v45, %s4822_s30 }
  0x6d   : > { %v5205_v42 = vld [vmem:[#allocation2 + $0xd8] sm:$0xff]  ;;  %8237 = vst [vmem:[#allocation18_spill] sm:$0xff] %v5231_v47 }
  0x6e   : > { %412 = vst.msk [vmem:[#allocation4 + $0x90] sm:$0xff] %vm261_vm0, %v5205_v42  ;;  %v5216_v44 = vld [vmem:[#allocation2 + $0xe0] sm:$0xff] }
  0x6f   : > { %413 = vst.msk [vmem:[#allocation4 + $0x98] sm:$0xff] %vm261_vm0, %v5216_v44 }
  0x70   : > { %v5228_v46 = vld [vmem:[#allocation2 + $0xf0] sm:$0xff]  ;;  %8238 = vst [vmem:[#allocation19_spill] sm:$0xff] %v5236_v48  ;;  %512 = vrot.lane.b32.xlu1 %v5157_v32, %s4822_s30 }
  0x71   : > { %414 = vst.msk [vmem:[#allocation4 + $0xa0] sm:$0xff] %vm261_vm0, %v5228_v46  ;;  %516 = vrot.lane.b32.xlu0 %v5161_v33, %s4822_s30 }
  0x72   : > { %328 = vst.msk [vmem:[#allocation2 + $0x109] sm:$0xff] %vm261_vm0, %v5231_v47 }
  0x73   : > { %v5246_v50 = vld [vmem:[#allocation2 + $0xf8] sm:$0xff]  ;;  %329 = vst.msk [vmem:[#allocation2 + $0x111] sm:$0xff] %vm261_vm0, %v5236_v48 }
  0x74   : > { %415 = vst.msk [vmem:[#allocation4 + $0xa8] sm:$0xff] %vm261_vm0, %v5246_v50  ;;  %508 = vrot.lane.b32.xlu2 %v5244_v49, %s4822_s30 }
  0x75   : > { %8239 = vst [vmem:[#allocation20_spill] sm:$0xff] %v5255_v51 }
  0x76   : > { %330 = vst.msk [vmem:[#allocation2 + $0x121] sm:$0xff] %vm261_vm0, %v5255_v51  ;;  %v5344_v51 = vld [vmem:[%s5006_s10 + $0xe8] sm:$0xff] }
  0x77   : > { %8240 = vst [vmem:[#allocation21_spill] sm:$0xff] %v5262_v53 }
  0x78   : > { %518 = vrot.lane.b32.xlu1 %v5170_v35, %s4822_s30  ;;  %331 = vst.msk [vmem:[#allocation2 + $0x129] sm:$0xff] %vm261_vm0, %v5262_v53 }
  0x79   : > { %v5257_v52 = vld [vmem:[#allocation2 + $0x108] sm:$0xff]  ;;  %522 = vrot.lane.b32.xlu0 %v5174_v36, %s4822_s30  ;;  %8241 = vst [vmem:[#allocation22_spill] sm:$0xff] %v5283_v57 }
  0x7a   : > { %416 = vst.msk [vmem:[#allocation4 + $0xb0] sm:$0xff] %vm261_vm0, %v5257_v52  ;;  %v5268_v54 = vld [vmem:[#allocation2 + $0x110] sm:$0xff] }
  0x7b   : > { %417 = vst.msk [vmem:[#allocation4 + $0xb8] sm:$0xff] %vm261_vm0, %v5268_v54 }
  0x7c   : > { %514 = vrot.lane.b32.xlu2 %v5272_v55, %s4822_s30  ;;  %8242 = vst [vmem:[#allocation23_spill] sm:$0xff] %v5288_v58 }
  0x7d   : > { %v5280_v56 = vld [vmem:[#allocation2 + $0x120] sm:$0xff]  ;;  %332 = vst.msk [vmem:[#allocation2 + $0x139] sm:$0xff] %vm261_vm0, %v5283_v57 }
  0x7e   : > { %418 = vst.msk [vmem:[#allocation4 + $0xc0] sm:$0xff] %vm261_vm0, %v5280_v56  ;;  %v5335_v57 = vld [vmem:[%s5006_s10 + $0xe0] sm:$0xff] }
  0x7f   : > { %v5298_v60 = vld [vmem:[#allocation2 + $0x128] sm:$0xff]  ;;  %333 = vst.msk [vmem:[#allocation2 + $0x141] sm:$0xff] %vm261_vm0, %v5288_v58  ;;  %v5324_v58 = vld [vmem:[#allocation2 + $0xd0] sm:$0x3] }
  0x80   : > { %524 = vrot.lane.b32.xlu1 %v5198_v40, %s4822_s30  ;;  %419 = vst.msk [vmem:[#allocation4 + $0xc8] sm:$0xff] %vm261_vm0, %v5298_v60  ;;  %v5390_v41 = vld [vmem:[#allocation2 + $0x130] sm:$0x3] }
  0x81   : > { %528 = vrot.lane.b32.xlu0 %v5205_v42, %s4822_s30  ;;  %8243 = vst [vmem:[#allocation24_spill] sm:$0xff] %v5307_v61 }
  0x82   : > { %334 = vst.msk [vmem:[#allocation2 + $0x151] sm:$0xff] %vm261_vm0, %v5307_v61 }
  0x83   : > { %8244 = vst [vmem:[#allocation25_spill] sm:$0xff] %v5314_v63 }
  0x84   : > { %520 = vrot.lane.b32.xlu2 %v5296_v59, %s4822_s30  ;;  %v5309_v62 = vld [vmem:[#allocation2 + $0x138] sm:$0xff]  ;;  %335 = vst.msk [vmem:[#allocation2 + $0x159] sm:$0xff] %vm261_vm0, %v5314_v63  ;;  %v5348_v63 = vld [vmem:[#allocation2 + $0xe8] sm:$0x3] }
  0x85   : > { %420 = vst.msk [vmem:[#allocation4 + $0xd0] sm:$0xff] %vm261_vm0, %v5309_v62 }
  0x86   : > { %v5320_v0 = vld [vmem:[#allocation2 + $0x140] sm:$0xff]  ;;  %8245 = vst [vmem:[#allocation26_spill] sm:$0xff] %v5335_v57 }
  0x87   : > { %421 = vst.msk [vmem:[#allocation4 + $0xd8] sm:$0xff] %vm261_vm0, %v5320_v0 }
  0x88   : > { %530 = vrot.lane.b32.xlu1 %v5216_v44, %s4822_s30  ;;  %336 = vst.msk [vmem:[#allocation2 + $0x169] sm:$0xff] %vm261_vm0, %v5335_v57 }
  0x89   : > { %534 = vrot.lane.b32.xlu0 %v5228_v46, %s4822_s30  ;;  %v5332_v61 = vld [vmem:[#allocation2 + $0x150] sm:$0xff]  ;;  %8246 = vst [vmem:[#allocation27_spill] sm:$0xff] %v5344_v51 }
  0x8a   : > { %422 = vst.msk [vmem:[#allocation4 + $0xe0] sm:$0xff] %vm261_vm0, %v5332_v61 }
  0x8b   : > { %v5350_v48 = vld [vmem:[#allocation2 + $0x158] sm:$0xff]  ;;  %337 = vst.msk [vmem:[#allocation2 + $0x171] sm:$0xff] %vm261_vm0, %v5344_v51  ;;  %v5368_v51 = vld [vmem:[#allocation2 + $0x100] sm:$0x3] }
  0x8c   : > { %526 = vrot.lane.b32.xlu2 %v5324_v58, %s4822_s30  ;;  %423 = vst.msk [vmem:[#allocation4 + $0xe8] sm:$0xff] %vm261_vm0, %v5350_v48 }
  0x8e   : > { %v477_v53 = vpop.permute.xlu0 %476 }
  0x8f   : > { %621 = vst.msk [vmem:[#allocation4 + $0x7] sm:$0xff] %vm620_vm3, %v477_v53  ;;  %v5360_v47 = vld [vmem:[#allocation2 + $0x168] sm:$0xff] }
  0x90   : > { %536 = vrot.lane.b32.xlu1 %v5246_v50, %s4822_s30  ;;  %424 = vst.msk [vmem:[#allocation4 + $0xf0] sm:$0xff] %vm261_vm0, %v5360_v47 }
  0x91   : > { %540 = vrot.lane.b32.xlu0 %v5257_v52, %s4822_s30 }
  0x92   : > { %v5371_v43 = vld [vmem:[#allocation2 + $0x170] sm:$0xff] }
  0x93   : > { %425 = vst.msk [vmem:[#allocation4 + $0xf8] sm:$0xff] %vm261_vm0, %v5371_v43 }
  0x94   : > { %532 = vrot.lane.b32.xlu2 %v5348_v63, %s4822_s30  ;;  %v479_v57 = vpop.permute.xlu1 %478 }
  0x95   : > { %623 = vst.msk [vmem:[#allocation4 + $0xf] sm:$0x1] %vm622_vm4, %v479_v57  ;;  %v5381_v57 = vld [vmem:[#allocation2 + $0x118] sm:$0x3] }
  0x96   : > { %v475_v53 = vpop.permute.xlu0 %474 }
  0x97   : > { %619 = vst.msk [vmem:[#allocation4 - $0x1] sm:$0xfe] %vm618_vm5, %v475_v53 }
  0x98   : > { %542 = vrot.lane.b32.xlu1 %v5268_v54, %s4822_s30 }
  0x99   : > { %546 = vrot.lane.b32.xlu0 %v5280_v56, %s4822_s30 }
  0x9c   : > { %538 = vrot.lane.b32.xlu2 %v5368_v51, %s4822_s30 }
  0xa0   : > { %548 = vrot.lane.b32.xlu1 %v5298_v60, %s4822_s30 }
  0xa1   : > { %552 = vrot.lane.b32.xlu0 %v5309_v62, %s4822_s30 }
  0xa4   : > { %544 = vrot.lane.b32.xlu2 %v5381_v57, %s4822_s30 }
  0xa6   : > { %v483_v53 = vpop.permute.xlu2 %482 }
  0xa7   : > { %625 = vst.msk [vmem:[#allocation4 + $0x17] sm:$0xff] %vm620_vm3, %v483_v53  ;;  %v5399_v53 = vld [vmem:[#allocation2 + $0x148] sm:$0x3] }
  0xa8   : > { %554 = vrot.lane.b32.xlu1 %v5320_v0, %s4822_s30 }
  0xa9   : > { %558 = vrot.lane.b32.xlu0 %v5332_v61, %s4822_s30 }
  0xac   : > { %550 = vrot.lane.b32.xlu2 %v5390_v41, %s4822_s30 }
  0xae   : > { %v485_v38 = vpop.permute.xlu2 %484 }
  0xaf   : > { %626 = vst.msk [vmem:[#allocation4 + $0x1f] sm:$0x1] %vm622_vm4, %v485_v38  ;;  %v5408_v38 = vld [vmem:[#allocation2 + $0x160] sm:$0x3] }
  0xb0   : > { %560 = vrot.lane.b32.xlu1 %v5350_v48, %s4822_s30 }
  0xb1   : > { %564 = vrot.lane.b32.xlu0 %v5360_v47, %s4822_s30 }
  0xb4   : > { %556 = vrot.lane.b32.xlu2 %v5399_v53, %s4822_s30 }
  0xb6   : > { %v491_v37 = vpop.permute.xlu2 %490 }
  0xb7   : > { %629 = vst.msk [vmem:[#allocation4 + $0x2f] sm:$0x1] %vm622_vm4, %v491_v37 }
  0xb8   : > { %566 = vrot.lane.b32.xlu1 %v5371_v43, %s4822_s30 }
  0xb9   : > { %669 = vrot.lane.b32.xlu0 %v4949_v3, %s4823_s11  ;;  %v5419_v3 = vld [vmem:[#allocation2 + $0x178] sm:$0x3] }
  0xba   : > { %v481_v34 = vpop.permute.xlu1 %480 }
  0xbb   : > { %624 = vst.msk [vmem:[#allocation4 + $0xf] sm:$0xfe] %vm618_vm5, %v481_v34  ;;  %v487_v27 = vpop.permute.xlu0 %486 }
  0xbc   : > { %627 = vst.msk [vmem:[#allocation4 + $0x1f] sm:$0xfe] %vm618_vm5, %v487_v27  ;;  %562 = vrot.lane.b32.xlu2 %v5408_v38, %s4822_s30 }
  0xbe   : > { %v497_v26 = vpop.permute.xlu2 %496 }
  0xbf   : > { %632 = vst.msk [vmem:[#allocation4 + $0x3f] sm:$0x1] %vm622_vm4, %v497_v26 }
  0xc0   : > { %671 = vrot.lane.b32.xlu1 %v4925_v1, %s4823_s11 }
  0xc1   : > { %675 = vrot.lane.b32.xlu0 %v5056_v12, %s4823_s11 }
  0xc2   : > { %v489_v37 = vpop.permute.xlu1 %488 }
  0xc3   : > { %628 = vst.msk [vmem:[#allocation4 + $0x27] sm:$0xff] %vm620_vm3, %v489_v37  ;;  %v493_v34 = vpop.permute.xlu0 %492 }
  0xc4   : > { %630 = vst.msk [vmem:[#allocation4 + $0x2f] sm:$0xfe] %vm618_vm5, %v493_v34  ;;  %568 = vrot.lane.b32.xlu2 %v5419_v3, %s4822_s30 }
  0xc6   : > { %v503_v27 = vpop.permute.xlu2 %502 }
  0xc7   : > { %635 = vst.msk [vmem:[#allocation4 + $0x4f] sm:$0x1] %vm622_vm4, %v503_v27 }
  0xc8   : > { %677 = vrot.lane.b32.xlu1 %v5078_v16, %s4823_s11 }
  0xc9   : > { %681 = vrot.lane.b32.xlu0 %v5064_v13, %s4823_s11 }
  0xca   : > { %v495_v1 = vpop.permute.xlu1 %494 }
  0xcb   : > { %631 = vst.msk [vmem:[#allocation4 + $0x37] sm:$0xff] %vm620_vm3, %v495_v1  ;;  %v499_v26 = vpop.permute.xlu0 %498 }
  0xcc   : > { %633 = vst.msk [vmem:[#allocation4 + $0x3f] sm:$0xfe] %vm618_vm5, %v499_v26  ;;  %673 = vrot.lane.b32.xlu2 %v4941_v2, %s4823_s11 }
  0xce   : > { %v509_v37 = vpop.permute.xlu2 %508 }
  0xcf   : > { %638 = vst.msk [vmem:[#allocation4 + $0x5f] sm:$0x1] %vm622_vm4, %v509_v37 }
  0xd0   : > { %683 = vrot.lane.b32.xlu1 %v5070_v14, %s4823_s11 }
  0xd1   : > { %687 = vrot.lane.b32.xlu0 %v5074_v15, %s4823_s11 }
  0xd2   : > { %v501_v34 = vpop.permute.xlu1 %500 }
  0xd3   : > { %634 = vst.msk [vmem:[#allocation4 + $0x47] sm:$0xff] %vm620_vm3, %v501_v34  ;;  %v505_v27 = vpop.permute.xlu0 %504 }
  0xd4   : > { %636 = vst.msk [vmem:[#allocation4 + $0x4f] sm:$0xfe] %vm618_vm5, %v505_v27  ;;  %679 = vrot.lane.b32.xlu2 %v5114_v24, %s4823_s11 }
  0xd6   : > { %v515_v1 = vpop.permute.xlu2 %514 }
  0xd7   : > { %641 = vst.msk [vmem:[#allocation4 + $0x6f] sm:$0x1] %vm622_vm4, %v515_v1 }
  0xd8   : > { %689 = vrot.lane.b32.xlu1 %v5084_v17, %s4823_s11 }
  0xd9   : > { %693 = vrot.lane.b32.xlu0 %v5088_v18, %s4823_s11 }
  0xda   : > { %v507_v2 = vpop.permute.xlu1 %506 }
  0xdb   : > { %637 = vst.msk [vmem:[#allocation4 + $0x57] sm:$0xff] %vm620_vm3, %v507_v2  ;;  %v511_v26 = vpop.permute.xlu0 %510 }
  0xdc   : > { %639 = vst.msk [vmem:[#allocation4 + $0x5f] sm:$0xfe] %vm618_vm5, %v511_v26  ;;  %685 = vrot.lane.b32.xlu2 %v5149_v30, %s4823_s11 }
  0xde   : > { %v521_v37 = vpop.permute.xlu2 %520 }
  0xdf   : > { %644 = vst.msk [vmem:[#allocation4 + $0x7f] sm:$0x1] %vm622_vm4, %v521_v37 }
  0xe0   : > { %695 = vrot.lane.b32.xlu1 %v5095_v20, %s4823_s11 }
  0xe1   : > { %699 = vrot.lane.b32.xlu0 %v5137_v28, %s4823_s11 }
  0xe2   : > { %v513_v34 = vpop.permute.xlu1 %512 }
  0xe3   : > { %640 = vst.msk [vmem:[#allocation4 + $0x67] sm:$0xff] %vm620_vm3, %v513_v34  ;;  %v517_v27 = vpop.permute.xlu0 %516 }
  0xe4   : > { %642 = vst.msk [vmem:[#allocation4 + $0x6f] sm:$0xfe] %vm618_vm5, %v517_v27  ;;  %691 = vrot.lane.b32.xlu2 %v5192_v39, %s4823_s11 }
  0xe6   : > { %v527_v1 = vpop.permute.xlu2 %526 }
  0xe7   : > { %647 = vst.msk [vmem:[#allocation4 + $0x8f] sm:$0x1] %vm622_vm4, %v527_v1 }
  0xe8   : > { %701 = vrot.lane.b32.xlu1 %v5145_v29, %s4823_s11 }
  0xe9   : > { %705 = vrot.lane.b32.xlu0 %v5153_v31, %s4823_s11 }
  0xea   : > { %v519_v2 = vpop.permute.xlu1 %518 }
  0xeb   : > { %643 = vst.msk [vmem:[#allocation4 + $0x77] sm:$0xff] %vm620_vm3, %v519_v2  ;;  %v523_v26 = vpop.permute.xlu0 %522 }
  0xec   : > { %645 = vst.msk [vmem:[#allocation4 + $0x7f] sm:$0xfe] %vm618_vm5, %v523_v26  ;;  %697 = vrot.lane.b32.xlu2 %v5220_v45, %s4823_s11 }
  0xee   : > { %v533_v37 = vpop.permute.xlu2 %532 }
  0xef   : > { %650 = vst.msk [vmem:[#allocation4 + $0x9f] sm:$0x1] %vm622_vm4, %v533_v37 }
  0xf0   : > { %707 = vrot.lane.b32.xlu1 %v5157_v32, %s4823_s11 }
  0xf1   : > { %711 = vrot.lane.b32.xlu0 %v5161_v33, %s4823_s11 }
  0xf2   : > { %v525_v34 = vpop.permute.xlu1 %524 }
  0xf3   : > { %646 = vst.msk [vmem:[#allocation4 + $0x87] sm:$0xff] %vm620_vm3, %v525_v34  ;;  %v529_v27 = vpop.permute.xlu0 %528 }
  0xf4   : > { %648 = vst.msk [vmem:[#allocation4 + $0x8f] sm:$0xfe] %vm618_vm5, %v529_v27  ;;  %703 = vrot.lane.b32.xlu2 %v5244_v49, %s4823_s11 }
  0xf6   : > { %v539_v1 = vpop.permute.xlu2 %538 }
  0xf7   : > { %653 = vst.msk [vmem:[#allocation4 + $0xaf] sm:$0x1] %vm622_vm4, %v539_v1 }
  0xf8   : > { %713 = vrot.lane.b32.xlu1 %v5170_v35, %s4823_s11 }
  0xf9   : > { %717 = vrot.lane.b32.xlu0 %v5174_v36, %s4823_s11 }
  0xfa   : > { %v531_v2 = vpop.permute.xlu1 %530 }
  0xfb   : > { %649 = vst.msk [vmem:[#allocation4 + $0x97] sm:$0xff] %vm620_vm3, %v531_v2  ;;  %v535_v26 = vpop.permute.xlu0 %534 }
  0xfc   : > { %651 = vst.msk [vmem:[#allocation4 + $0x9f] sm:$0xfe] %vm618_vm5, %v535_v26  ;;  %709 = vrot.lane.b32.xlu2 %v5272_v55, %s4823_s11 }
  0xfe   : > { %v545_v37 = vpop.permute.xlu2 %544 }
  0xff   : > { %656 = vst.msk [vmem:[#allocation4 + $0xbf] sm:$0x1] %vm622_vm4, %v545_v37 }
 0x100   : > { %719 = vrot.lane.b32.xlu1 %v5198_v40, %s4823_s11 }
 0x101   : > { %723 = vrot.lane.b32.xlu0 %v5205_v42, %s4823_s11 }
 0x102   : > { %v537_v34 = vpop.permute.xlu1 %536 }
 0x103   : > { %652 = vst.msk [vmem:[#allocation4 + $0xa7] sm:$0xff] %vm620_vm3, %v537_v34  ;;  %v541_v27 = vpop.permute.xlu0 %540 }
 0x104   : > { %654 = vst.msk [vmem:[#allocation4 + $0xaf] sm:$0xfe] %vm618_vm5, %v541_v27  ;;  %715 = vrot.lane.b32.xlu2 %v5296_v59, %s4823_s11 }
 0x106   : > { %v551_v1 = vpop.permute.xlu2 %550 }
 0x107   : > { %659 = vst.msk [vmem:[#allocation4 + $0xcf] sm:$0x1] %vm622_vm4, %v551_v1 }
 0x108   : > { %725 = vrot.lane.b32.xlu1 %v5216_v44, %s4823_s11 }
 0x109   : > { %729 = vrot.lane.b32.xlu0 %v5228_v46, %s4823_s11 }
 0x10a   : > { %v543_v2 = vpop.permute.xlu1 %542 }
 0x10b   : > { %655 = vst.msk [vmem:[#allocation4 + $0xb7] sm:$0xff] %vm620_vm3, %v543_v2  ;;  %v547_v26 = vpop.permute.xlu0 %546 }
 0x10c   : > { %657 = vst.msk [vmem:[#allocation4 + $0xbf] sm:$0xfe] %vm618_vm5, %v547_v26  ;;  %721 = vrot.lane.b32.xlu2 %v5324_v58, %s4823_s11 }
 0x10e   : > { %v557_v37 = vpop.permute.xlu2 %556 }
 0x10f   : > { %662 = vst.msk [vmem:[#allocation4 + $0xdf] sm:$0x1] %vm622_vm4, %v557_v37 }
 0x110   : > { %731 = vrot.lane.b32.xlu1 %v5246_v50, %s4823_s11 }
 0x111   : > { %735 = vrot.lane.b32.xlu0 %v5257_v52, %s4823_s11 }
 0x112   : > { %v549_v34 = vpop.permute.xlu1 %548 }
 0x113   : > { %658 = vst.msk [vmem:[#allocation4 + $0xc7] sm:$0xff] %vm620_vm3, %v549_v34  ;;  %v553_v27 = vpop.permute.xlu0 %552 }
 0x114   : > { %660 = vst.msk [vmem:[#allocation4 + $0xcf] sm:$0xfe] %vm618_vm5, %v553_v27  ;;  %727 = vrot.lane.b32.xlu2 %v5348_v63, %s4823_s11 }
 0x116   : > { %v563_v1 = vpop.permute.xlu2 %562 }
 0x117   : > { %665 = vst.msk [vmem:[#allocation4 + $0xef] sm:$0x1] %vm622_vm4, %v563_v1 }
 0x118   : > { %737 = vrot.lane.b32.xlu1 %v5268_v54, %s4823_s11 }
 0x119   : > { %741 = vrot.lane.b32.xlu0 %v5280_v56, %s4823_s11 }
 0x11a   : > { %v555_v2 = vpop.permute.xlu1 %554 }
 0x11b   : > { %661 = vst.msk [vmem:[#allocation4 + $0xd7] sm:$0xff] %vm620_vm3, %v555_v2  ;;  %v559_v26 = vpop.permute.xlu0 %558 }
 0x11c   : > { %663 = vst.msk [vmem:[#allocation4 + $0xdf] sm:$0xfe] %vm618_vm5, %v559_v26  ;;  %733 = vrot.lane.b32.xlu2 %v5368_v51, %s4823_s11 }
 0x11e   : > { %v569_v37 = vpop.permute.xlu2 %568 }
 0x11f   : > { %668 = vst.msk [vmem:[#allocation4 + $0xff] sm:$0x1] %vm622_vm4, %v569_v37  ;;  %vm1666_vm4 = vcmask 254176  }
 0x120   : > { %743 = vrot.lane.b32.xlu1 %v5298_v60, %s4823_s11 }
 0x121   : > { %747 = vrot.lane.b32.xlu0 %v5309_v62, %s4823_s11 }
 0x122   : > { %v561_v34 = vpop.permute.xlu1 %560 }
 0x123   : > { %664 = vst.msk [vmem:[#allocation4 + $0xe7] sm:$0xff] %vm620_vm3, %v561_v34  ;;  %v565_v27 = vpop.permute.xlu0 %564 }
 0x124   : > { %666 = vst.msk [vmem:[#allocation4 + $0xef] sm:$0xfe] %vm618_vm5, %v565_v27  ;;  %739 = vrot.lane.b32.xlu2 %v5381_v57, %s4823_s11  ;;  %vm2038_vm5 = vcmask 1043456  }
 0x126   : > { %v674_v1 = vpop.permute.xlu2 %673 }
 0x127   : > { %818 = vst.msk [vmem:[#allocation4 + $0xe] sm:$0x3] %vm817_vm6, %v674_v1 }
 0x128   : > { %749 = vrot.lane.b32.xlu1 %v5320_v0, %s4823_s11 }
 0x129   : > { %753 = vrot.lane.b32.xlu0 %v5332_v61, %s4823_s11 }
 0x12a   : > { %v567_v2 = vpop.permute.xlu1 %566 }
 0x12b   : > { %667 = vst.msk [vmem:[#allocation4 + $0xf7] sm:$0xff] %vm620_vm3, %v567_v2  ;;  %v670_v26 = vpop.permute.xlu0 %669  ;;  %vm1662_vm3 = vcmask 261345  }
 0x12c   : > { %814 = vst.msk [vmem:[#allocation4 - $0x2] sm:$0xfc] %vm813_vm7, %v670_v26  ;;  %745 = vrot.lane.b32.xlu2 %v5390_v41, %s4823_s11 }
 0x12e   : > { %v680_v37 = vpop.permute.xlu2 %679 }
 0x12f   : > { %821 = vst.msk [vmem:[#allocation4 + $0x1e] sm:$0x3] %vm817_vm6, %v680_v37 }
 0x130   : > { %755 = vrot.lane.b32.xlu1 %v5350_v48, %s4823_s11 }
 0x131   : > { %759 = vrot.lane.b32.xlu0 %v5360_v47, %s4823_s11 }
 0x132   : > { %v672_v34 = vpop.permute.xlu1 %671 }
 0x133   : > { %816 = vst.msk [vmem:[#allocation4 + $0x6] sm:$0xff] %vm815_vm8, %v672_v34  ;;  %v676_v27 = vpop.permute.xlu0 %675 }
 0x134   : > { %819 = vst.msk [vmem:[#allocation4 + $0xe] sm:$0xfc] %vm813_vm7, %v676_v27  ;;  %751 = vrot.lane.b32.xlu2 %v5399_v53, %s4823_s11 }
 0x136   : > { %v686_v1 = vpop.permute.xlu2 %685 }
 0x137   : > { %824 = vst.msk [vmem:[#allocation4 + $0x2e] sm:$0x3] %vm817_vm6, %v686_v1 }
 0x138   : > { %761 = vrot.lane.b32.xlu1 %v5371_v43, %s4823_s11 }
 0x139   : > { %866 = vrot.lane.b32.xlu0 %v5056_v12, %s4824_s12 }
 0x13a   : > { %v678_v2 = vpop.permute.xlu1 %677 }
 0x13b   : > { %820 = vst.msk [vmem:[#allocation4 + $0x16] sm:$0xff] %vm815_vm8, %v678_v2  ;;  %v682_v26 = vpop.permute.xlu0 %681 }
 0x13c   : > { %822 = vst.msk [vmem:[#allocation4 + $0x1e] sm:$0xfc] %vm813_vm7, %v682_v26  ;;  %757 = vrot.lane.b32.xlu2 %v5408_v38, %s4823_s11 }
 0x13e   : > { %v692_v37 = vpop.permute.xlu2 %691 }
 0x13f   : > { %827 = vst.msk [vmem:[#allocation4 + $0x3e] sm:$0x3] %vm817_vm6, %v692_v37 }
 0x140   : > { %868 = vrot.lane.b32.xlu1 %v5078_v16, %s4824_s12 }
 0x141   : > { %872 = vrot.lane.b32.xlu0 %v5070_v14, %s4824_s12 }
 0x142   : > { %v684_v34 = vpop.permute.xlu1 %683 }
 0x143   : > { %823 = vst.msk [vmem:[#allocation4 + $0x26] sm:$0xff] %vm815_vm8, %v684_v34  ;;  %v688_v27 = vpop.permute.xlu0 %687 }
 0x144   : > { %825 = vst.msk [vmem:[#allocation4 + $0x2e] sm:$0xfc] %vm813_vm7, %v688_v27  ;;  %763 = vrot.lane.b32.xlu2 %v5419_v3, %s4823_s11 }
 0x146   : > { %v698_v1 = vpop.permute.xlu2 %697 }
 0x147   : > { %830 = vst.msk [vmem:[#allocation4 + $0x4e] sm:$0x3] %vm817_vm6, %v698_v1 }
 0x148   : > { %874 = vrot.lane.b32.xlu1 %v5074_v15, %s4824_s12 }
 0x149   : > { %878 = vrot.lane.b32.xlu0 %v5088_v18, %s4824_s12 }
 0x14a   : > { %v690_v2 = vpop.permute.xlu1 %689 }
 0x14b   : > { %826 = vst.msk [vmem:[#allocation4 + $0x36] sm:$0xff] %vm815_vm8, %v690_v2  ;;  %v694_v26 = vpop.permute.xlu0 %693 }
 0x14c   : > { %828 = vst.msk [vmem:[#allocation4 + $0x3e] sm:$0xfc] %vm813_vm7, %v694_v26  ;;  %870 = vrot.lane.b32.xlu2 %v5064_v13, %s4824_s12 }
 0x14e   : > { %v704_v37 = vpop.permute.xlu2 %703 }
 0x14f   : > { %833 = vst.msk [vmem:[#allocation4 + $0x5e] sm:$0x3] %vm817_vm6, %v704_v37 }
 0x150   : > { %880 = vrot.lane.b32.xlu1 %v5095_v20, %s4824_s12 }
 0x151   : > { %884 = vrot.lane.b32.xlu0 %v5145_v29, %s4824_s12 }
 0x152   : > { %v696_v34 = vpop.permute.xlu1 %695 }
 0x153   : > { %829 = vst.msk [vmem:[#allocation4 + $0x46] sm:$0xff] %vm815_vm8, %v696_v34  ;;  %v700_v27 = vpop.permute.xlu0 %699 }
 0x154   : > { %831 = vst.msk [vmem:[#allocation4 + $0x4e] sm:$0xfc] %vm813_vm7, %v700_v27  ;;  %876 = vrot.lane.b32.xlu2 %v5084_v17, %s4824_s12 }
 0x156   : > { %v710_v1 = vpop.permute.xlu2 %709 }
 0x157   : > { %836 = vst.msk [vmem:[#allocation4 + $0x6e] sm:$0x3] %vm817_vm6, %v710_v1 }
 0x158   : > { %886 = vrot.lane.b32.xlu1 %v5153_v31, %s4824_s12 }
 0x159   : > { %890 = vrot.lane.b32.xlu0 %v5161_v33, %s4824_s12 }
 0x15a   : > { %v702_v2 = vpop.permute.xlu1 %701 }
 0x15b   : > { %832 = vst.msk [vmem:[#allocation4 + $0x56] sm:$0xff] %vm815_vm8, %v702_v2  ;;  %v706_v26 = vpop.permute.xlu0 %705  ;;  %v5606_v2 = vld [vmem:[%s5006_s10 + $0xf0] sm:$0xff] }
 0x15c   : > { %834 = vst.msk [vmem:[#allocation4 + $0x5e] sm:$0xfc] %vm813_vm7, %v706_v26  ;;  %882 = vrot.lane.b32.xlu2 %v5137_v28, %s4824_s12  ;;  %v5610_v26 = vld [vmem:[%s5006_s10 + $0xf8] sm:$0xff] }
 0x15d   : > { %8247 = vst [vmem:[#allocation28_spill] sm:$0xff] %v5606_v2 }
 0x15e   : > { %v716_v37 = vpop.permute.xlu2 %715  ;;  %8248 = vst [vmem:[#allocation29_spill] sm:$0xff] %v5610_v26 }
 0x15f   : > { %839 = vst.msk [vmem:[#allocation4 + $0x7e] sm:$0x3] %vm817_vm6, %v716_v37 }
 0x160   : > { %892 = vrot.lane.b32.xlu1 %v5170_v35, %s4824_s12  ;;  %338 = vst.msk [vmem:[#allocation2 + $0x181] sm:$0xff] %vm261_vm0, %v5606_v2 }
 0x161   : > { %896 = vrot.lane.b32.xlu0 %v5198_v40, %s4824_s12  ;;  %339 = vst.msk [vmem:[#allocation2 + $0x189] sm:$0xff] %vm261_vm0, %v5610_v26 }
 0x162   : > { %v708_v34 = vpop.permute.xlu1 %707 }
 0x163   : > { %835 = vst.msk [vmem:[#allocation4 + $0x66] sm:$0xff] %vm815_vm8, %v708_v34  ;;  %v712_v27 = vpop.permute.xlu0 %711 }
 0x164   : > { %837 = vst.msk [vmem:[#allocation4 + $0x6e] sm:$0xfc] %vm813_vm7, %v712_v27  ;;  %888 = vrot.lane.b32.xlu2 %v5157_v32, %s4824_s12 }
 0x166   : > { %v722_v1 = vpop.permute.xlu2 %721 }
 0x167   : > { %842 = vst.msk [vmem:[#allocation4 + $0x8e] sm:$0x3] %vm817_vm6, %v722_v1 }
 0x168   : > { %898 = vrot.lane.b32.xlu1 %v5205_v42, %s4824_s12 }
 0x169   : > { %902 = vrot.lane.b32.xlu0 %v5228_v46, %s4824_s12 }
 0x16a   : > { %v714_v37 = vpop.permute.xlu1 %713 }
 0x16b   : > { %838 = vst.msk [vmem:[#allocation4 + $0x76] sm:$0xff] %vm815_vm8, %v714_v37  ;;  %v718_v34 = vpop.permute.xlu0 %717 }
 0x16c   : > { %840 = vst.msk [vmem:[#allocation4 + $0x7e] sm:$0xfc] %vm813_vm7, %v718_v34  ;;  %894 = vrot.lane.b32.xlu2 %v5174_v36, %s4824_s12 }
 0x16e   : > { %v728_v27 = vpop.permute.xlu2 %727 }
 0x16f   : > { %845 = vst.msk [vmem:[#allocation4 + $0x9e] sm:$0x3] %vm817_vm6, %v728_v27 }
 0x170   : > { %904 = vrot.lane.b32.xlu1 %v5246_v50, %s4824_s12 }
 0x171   : > { %908 = vrot.lane.b32.xlu0 %v5268_v54, %s4824_s12 }
 0x172   : > { %v720_v1 = vpop.permute.xlu1 %719 }
 0x173   : > { %841 = vst.msk [vmem:[#allocation4 + $0x86] sm:$0xff] %vm815_vm8, %v720_v1  ;;  %v724_v26 = vpop.permute.xlu0 %723 }
 0x174   : > { %843 = vst.msk [vmem:[#allocation4 + $0x8e] sm:$0xfc] %vm813_vm7, %v724_v26  ;;  %900 = vrot.lane.b32.xlu2 %v5216_v44, %s4824_s12 }
 0x176   : > { %v734_v37 = vpop.permute.xlu2 %733 }
 0x177   : > { %848 = vst.msk [vmem:[#allocation4 + $0xae] sm:$0x3] %vm817_vm6, %v734_v37 }
 0x178   : > { %910 = vrot.lane.b32.xlu1 %v5280_v56, %s4824_s12 }
 0x179   : > { %914 = vrot.lane.b32.xlu0 %v5309_v62, %s4824_s12 }
 0x17a   : > { %v726_v34 = vpop.permute.xlu1 %725 }
 0x17b   : > { %844 = vst.msk [vmem:[#allocation4 + $0x96] sm:$0xff] %vm815_vm8, %v726_v34  ;;  %v730_v27 = vpop.permute.xlu0 %729  ;;  %v5651_v34 = vld [vmem:[#allocation2 + $0x180] sm:$0xff] }
 0x17c   : > { %846 = vst.msk [vmem:[#allocation4 + $0x9e] sm:$0xfc] %vm813_vm7, %v730_v27  ;;  %906 = vrot.lane.b32.xlu2 %v5257_v52, %s4824_s12 }
 0x17e   : > { %v740_v26 = vpop.permute.xlu2 %739 }
 0x17f   : > { %851 = vst.msk [vmem:[#allocation4 + $0xbe] sm:$0x3] %vm817_vm6, %v740_v26 }
 0x180   : > { %916 = vrot.lane.b32.xlu1 %v5320_v0, %s4824_s12 }
 0x181   : > { %920 = vrot.lane.b32.xlu0 %v5350_v48, %s4824_s12 }
 0x182   : > { %v732_v1 = vpop.permute.xlu1 %731 }
 0x183   : > { %847 = vst.msk [vmem:[#allocation4 + $0xa6] sm:$0xff] %vm815_vm8, %v732_v1  ;;  %v736_v37 = vpop.permute.xlu0 %735 }
 0x184   : > { %849 = vst.msk [vmem:[#allocation4 + $0xae] sm:$0xfc] %vm813_vm7, %v736_v37  ;;  %912 = vrot.lane.b32.xlu2 %v5298_v60, %s4824_s12  ;;  %v5662_v37 = vld [vmem:[#allocation2 + $0x188] sm:$0xff] }
 0x186   : > { %v746_v27 = vpop.permute.xlu2 %745 }
 0x187   : > { %854 = vst.msk [vmem:[#allocation4 + $0xce] sm:$0x3] %vm817_vm6, %v746_v27 }
 0x188   : > { %922 = vrot.lane.b32.xlu1 %v5360_v47, %s4824_s12 }
 0x189   : > { %926 = vrot.lane.b32.xlu0 %v5651_v34, %s4824_s12 }
 0x18a   : > { %v738_v26 = vpop.permute.xlu1 %737 }
 0x18b   : > { %850 = vst.msk [vmem:[#allocation4 + $0xb6] sm:$0xff] %vm815_vm8, %v738_v26  ;;  %v742_v1 = vpop.permute.xlu0 %741 }
 0x18c   : > { %852 = vst.msk [vmem:[#allocation4 + $0xbe] sm:$0xfc] %vm813_vm7, %v742_v1  ;;  %918 = vrot.lane.b32.xlu2 %v5332_v61, %s4824_s12 }
 0x18e   : > { %v752_v2 = vpop.permute.xlu2 %751 }
 0x18f   : > { %857 = vst.msk [vmem:[#allocation4 + $0xde] sm:$0x3] %vm817_vm6, %v752_v2 }
 0x190   : > { %928 = vrot.lane.b32.xlu1 %v5662_v37, %s4824_s12 }
 0x191   : > { %998 = vrot.lane.b32.xlu0 %v5078_v16, %s4825_s13 }
 0x192   : > { %v744_v27 = vpop.permute.xlu1 %743 }
 0x193   : > { %853 = vst.msk [vmem:[#allocation4 + $0xc6] sm:$0xff] %vm815_vm8, %v744_v27  ;;  %v748_v26 = vpop.permute.xlu0 %747 }
 0x194   : > { %855 = vst.msk [vmem:[#allocation4 + $0xce] sm:$0xfc] %vm813_vm7, %v748_v26  ;;  %924 = vrot.lane.b32.xlu2 %v5371_v43, %s4824_s12  ;;  %s4777_s12 = scalar_lea.hbm %s8202_s5, 512 }
 0x196   : > { %v758_v1 = vpop.permute.xlu2 %757 }
 0x197   : > { %860 = vst.msk [vmem:[#allocation4 + $0xee] sm:$0x3] %vm817_vm6, %v758_v1 }
 0x198   : > { %1000 = vrot.lane.b32.xlu1 %v5114_v24, %s4825_s13 }
 0x199   : > { %1004 = vrot.lane.b32.xlu0 %v5070_v14, %s4825_s13 }
 0x19a   : > { %v750_v2 = vpop.permute.xlu1 %749 }
 0x19b   : > { %856 = vst.msk [vmem:[#allocation4 + $0xd6] sm:$0xff] %vm815_vm8, %v750_v2  ;;  %v754_v25 = vpop.permute.xlu0 %753 }
 0x19c   : > { %858 = vst.msk [vmem:[#allocation4 + $0xde] sm:$0xfc] %vm813_vm7, %v754_v25  ;;  %996 = vrot.lane.b32.xlu2 %v5056_v12, %s4825_s13 }
 0x19e   : > { %v764_v27 = vpop.permute.xlu2 %763 }
 0x19f   : > { %863 = vst.msk [vmem:[#allocation4 + $0xfe] sm:$0x3] %vm817_vm6, %v764_v27  ;;  %vm1859_vm6 = vcmask 294144  }
 0x1a0   : > { %1006 = vrot.lane.b32.xlu1 %v5149_v30, %s4825_s13 }
 0x1a1   : > { %1010 = vrot.lane.b32.xlu0 %v5084_v17, %s4825_s13 }
 0x1a2   : > { %v756_v24 = vpop.permute.xlu1 %755 }
 0x1a3   : > { %859 = vst.msk [vmem:[#allocation4 + $0xe6] sm:$0xff] %vm815_vm8, %v756_v24  ;;  %v760_v26 = vpop.permute.xlu0 %759 }
 0x1a4   : > { %861 = vst.msk [vmem:[#allocation4 + $0xee] sm:$0xfc] %vm813_vm7, %v760_v26  ;;  %1002 = vrot.lane.b32.xlu2 %v5064_v13, %s4825_s13  ;;  %vm1857_vm7 = vcmask 294146  }
 0x1a6   : > { %v871_v25 = vpop.permute.xlu2 %870 }
 0x1a7   : > { %965 = vst.msk [vmem:[#allocation4 + $0x10] sm:$0xff] %vm962_vm9, %v871_v25 }
 0x1a8   : > { %1012 = vrot.lane.b32.xlu1 %v5192_v39, %s4825_s13 }
 0x1a9   : > { %1016 = vrot.lane.b32.xlu0 %v5095_v20, %s4825_s13 }
 0x1aa   : > { %v762_v30 = vpop.permute.xlu1 %761 }
 0x1ab   : > { %862 = vst.msk [vmem:[#allocation4 + $0xf6] sm:$0xff] %vm815_vm8, %v762_v30  ;;  %v867_v1 = vpop.permute.xlu0 %866  ;;  %vm1861_vm8 = vcmask 288000  }
 0x1ac   : > { %963 = vst.msk [vmem:[#allocation4] sm:$0xff] %vm962_vm9, %v867_v1  ;;  %1008 = vrot.lane.b32.xlu2 %v5074_v15, %s4825_s13 }
 0x1ae   : > { %v877_v2 = vpop.permute.xlu2 %876 }
 0x1af   : > { %968 = vst.msk [vmem:[#allocation4 + $0x28] sm:$0xff] %vm962_vm9, %v877_v2 }
 0x1b0   : > { %1018 = vrot.lane.b32.xlu1 %v5220_v45, %s4825_s13 }
 0x1b1   : > { %1022 = vrot.lane.b32.xlu0 %v5145_v29, %s4825_s13 }
 0x1b2   : > { %v869_v39 = vpop.permute.xlu1 %868 }
 0x1b3   : > { %964 = vst.msk [vmem:[#allocation4 + $0x8] sm:$0xff] %vm962_vm9, %v869_v39  ;;  %v873_v27 = vpop.permute.xlu0 %872 }
 0x1b4   : > { %966 = vst.msk [vmem:[#allocation4 + $0x18] sm:$0xff] %vm962_vm9, %v873_v27  ;;  %1014 = vrot.lane.b32.xlu2 %v5088_v18, %s4825_s13 }
 0x1b6   : > { %v883_v24 = vpop.permute.xlu2 %882 }
 0x1b7   : > { %971 = vst.msk [vmem:[#allocation4 + $0x40] sm:$0xff] %vm962_vm9, %v883_v24 }
 0x1b8   : > { %1024 = vrot.lane.b32.xlu1 %v5244_v49, %s4825_s13 }
 0x1b9   : > { %1028 = vrot.lane.b32.xlu0 %v5157_v32, %s4825_s13 }
 0x1ba   : > { %v875_v45 = vpop.permute.xlu1 %874 }
 0x1bb   : > { %967 = vst.msk [vmem:[#allocation4 + $0x20] sm:$0xff] %vm962_vm9, %v875_v45  ;;  %v879_v26 = vpop.permute.xlu0 %878 }
 0x1bc   : > { %969 = vst.msk [vmem:[#allocation4 + $0x30] sm:$0xff] %vm962_vm9, %v879_v26  ;;  %1020 = vrot.lane.b32.xlu2 %v5137_v28, %s4825_s13 }
 0x1be   : > { %v889_v25 = vpop.permute.xlu2 %888 }
 0x1bf   : > { %974 = vst.msk [vmem:[#allocation4 + $0x58] sm:$0xff] %vm962_vm9, %v889_v25 }
 0x1c0   : > { %1030 = vrot.lane.b32.xlu1 %v5272_v55, %s4825_s13 }
 0x1c1   : > { %1034 = vrot.lane.b32.xlu0 %v5170_v35, %s4825_s13 }
 0x1c2   : > { %v881_v49 = vpop.permute.xlu1 %880 }
 0x1c3   : > { %970 = vst.msk [vmem:[#allocation4 + $0x38] sm:$0xff] %vm962_vm9, %v881_v49  ;;  %v885_v30 = vpop.permute.xlu0 %884 }
 0x1c4   : > { %972 = vst.msk [vmem:[#allocation4 + $0x48] sm:$0xff] %vm962_vm9, %v885_v30  ;;  %1026 = vrot.lane.b32.xlu2 %v5153_v31, %s4825_s13 }
 0x1c6   : > { %v895_v1 = vpop.permute.xlu2 %894 }
 0x1c7   : > { %977 = vst.msk [vmem:[#allocation4 + $0x70] sm:$0xff] %vm962_vm9, %v895_v1 }
 0x1c8   : > { %1036 = vrot.lane.b32.xlu1 %v5296_v59, %s4825_s13 }
 0x1c9   : > { %1040 = vrot.lane.b32.xlu0 %v5198_v40, %s4825_s13 }
 0x1ca   : > { %v887_v55 = vpop.permute.xlu1 %886 }
 0x1cb   : > { %973 = vst.msk [vmem:[#allocation4 + $0x50] sm:$0xff] %vm962_vm9, %v887_v55  ;;  %v891_v2 = vpop.permute.xlu0 %890 }
 0x1cc   : > { %975 = vst.msk [vmem:[#allocation4 + $0x60] sm:$0xff] %vm962_vm9, %v891_v2  ;;  %1032 = vrot.lane.b32.xlu2 %v5161_v33, %s4825_s13 }
 0x1ce   : > { %v901_v39 = vpop.permute.xlu2 %900 }
 0x1cf   : > { %980 = vst.msk [vmem:[#allocation4 + $0x88] sm:$0xff] %vm962_vm9, %v901_v39 }
 0x1d0   : > { %1042 = vrot.lane.b32.xlu1 %v5324_v58, %s4825_s13 }
 0x1d1   : > { %1046 = vrot.lane.b32.xlu0 %v5216_v44, %s4825_s13 }
 0x1d2   : > { %v893_v59 = vpop.permute.xlu1 %892 }
 0x1d3   : > { %976 = vst.msk [vmem:[#allocation4 + $0x68] sm:$0xff] %vm962_vm9, %v893_v59  ;;  %v897_v27 = vpop.permute.xlu0 %896 }
 0x1d4   : > { %978 = vst.msk [vmem:[#allocation4 + $0x78] sm:$0xff] %vm962_vm9, %v897_v27  ;;  %1038 = vrot.lane.b32.xlu2 %v5174_v36, %s4825_s13 }
 0x1d6   : > { %v907_v24 = vpop.permute.xlu2 %906 }
 0x1d7   : > { %983 = vst.msk [vmem:[#allocation4 + $0xa0] sm:$0xff] %vm962_vm9, %v907_v24 }
 0x1d8   : > { %1048 = vrot.lane.b32.xlu1 %v5348_v63, %s4825_s13 }
 0x1d9   : > { %1052 = vrot.lane.b32.xlu0 %v5246_v50, %s4825_s13 }
 0x1da   : > { %v899_v58 = vpop.permute.xlu1 %898 }
 0x1db   : > { %979 = vst.msk [vmem:[#allocation4 + $0x80] sm:$0xff] %vm962_vm9, %v899_v58  ;;  %v903_v45 = vpop.permute.xlu0 %902 }
 0x1dc   : > { %981 = vst.msk [vmem:[#allocation4 + $0x90] sm:$0xff] %vm962_vm9, %v903_v45  ;;  %1044 = vrot.lane.b32.xlu2 %v5205_v42, %s4825_s13  ;;  %v5808_v45 = vld [vmem:[#allocation2 + $0x190] sm:$0x3] }
 0x1de   : > { %v913_v26 = vpop.permute.xlu2 %912 }
 0x1df   : > { %986 = vst.msk [vmem:[#allocation4 + $0xb8] sm:$0xff] %vm962_vm9, %v913_v26 }
 0x1e0   : > { %1054 = vrot.lane.b32.xlu1 %v5368_v51, %s4825_s13 }
 0x1e1   : > { %1058 = vrot.lane.b32.xlu0 %v5268_v54, %s4825_s13 }
 0x1e2   : > { %v905_v63 = vpop.permute.xlu1 %904 }
 0x1e3   : > { %982 = vst.msk [vmem:[#allocation4 + $0x98] sm:$0xff] %vm962_vm9, %v905_v63  ;;  %v909_v25 = vpop.permute.xlu0 %908 }
 0x1e4   : > { %984 = vst.msk [vmem:[#allocation4 + $0xa8] sm:$0xff] %vm962_vm9, %v909_v25  ;;  %1050 = vrot.lane.b32.xlu2 %v5228_v46, %s4825_s13 }
 0x1e6   : > { %v919_v49 = vpop.permute.xlu2 %918 }
 0x1e7   : > { %989 = vst.msk [vmem:[#allocation4 + $0xd0] sm:$0xff] %vm962_vm9, %v919_v49  ;;  %v4718_v49 = vld [vmem:[#allocation2 + $0x28] sm:$0x3] }
 0x1e8   : > { %1060 = vrot.lane.b32.xlu1 %v5381_v57, %s4825_s13 }
 0x1e9   : > { %1064 = vrot.lane.b32.xlu0 %v5298_v60, %s4825_s13 }
 0x1ea   : > { %v911_v51 = vpop.permute.xlu1 %910 }
 0x1eb   : > { %985 = vst.msk [vmem:[#allocation4 + $0xb0] sm:$0xff] %vm962_vm9, %v911_v51  ;;  %v915_v30 = vpop.permute.xlu0 %914 }
 0x1ec   : > { %987 = vst.msk [vmem:[#allocation4 + $0xc0] sm:$0xff] %vm962_vm9, %v915_v30  ;;  %1056 = vrot.lane.b32.xlu2 %v5257_v52, %s4825_s13 }
 0x1ee   : > { %v925_v1 = vpop.permute.xlu2 %924 }
 0x1ef   : > { %992 = vst.msk [vmem:[#allocation4 + $0xe8] sm:$0xff] %vm962_vm9, %v925_v1  ;;  %v5828_v1 = vld [vmem:[#allocation2 + $0x40] sm:$0x3] }
 0x1f0   : > { %1066 = vrot.lane.b32.xlu1 %v5390_v41, %s4825_s13 }
 0x1f1   : > { %1070 = vrot.lane.b32.xlu0 %v5320_v0, %s4825_s13 }
 0x1f2   : > { %v917_v57 = vpop.permute.xlu1 %916 }
 0x1f3   : > { %988 = vst.msk [vmem:[#allocation4 + $0xc8] sm:$0xff] %vm962_vm9, %v917_v57  ;;  %v921_v55 = vpop.permute.xlu0 %920 }
 0x1f4   : > { %990 = vst.msk [vmem:[#allocation4 + $0xd8] sm:$0xff] %vm962_vm9, %v921_v55  ;;  %1062 = vrot.lane.b32.xlu2 %v5280_v56, %s4825_s13 }
 0x1f6   : > { %v997_v2 = vpop.permute.xlu2 %996 }
 0x1f7   : > { %1141 = vst.msk [vmem:[#allocation4 - $0x1] sm:$0xfe] %vm1140_vm10, %v997_v2  ;;  %v5839_v2 = vld [vmem:[#allocation2 + $0x58] sm:$0x3] }
 0x1f8   : > { %1072 = vrot.lane.b32.xlu1 %v5399_v53, %s4825_s13 }
 0x1f9   : > { %1076 = vrot.lane.b32.xlu0 %v5350_v48, %s4825_s13 }
 0x1fa   : > { %v923_v41 = vpop.permute.xlu1 %922 }
 0x1fb   : > { %991 = vst.msk [vmem:[#allocation4 + $0xe0] sm:$0xff] %vm962_vm9, %v923_v41  ;;  %v927_v39 = vpop.permute.xlu0 %926 }
 0x1fc   : > { %993 = vst.msk [vmem:[#allocation4 + $0xf0] sm:$0xff] %vm962_vm9, %v927_v39  ;;  %1068 = vrot.lane.b32.xlu2 %v5309_v62, %s4825_s13 }
 0x1fe   : > { %v1003_v59 = vpop.permute.xlu2 %1002 }
 0x1ff   : > { %1146 = vst.msk [vmem:[#allocation4 + $0xf] sm:$0xfe] %vm1140_vm10, %v1003_v59 }
 0x200   : > { %1078 = vrot.lane.b32.xlu1 %v5408_v38, %s4825_s13 }
 0x201   : > { %1082 = vrot.lane.b32.xlu0 %v5371_v43, %s4825_s13 }
 0x202   : > { %v929_v53 = vpop.permute.xlu1 %928 }
 0x203   : > { %994 = vst.msk [vmem:[#allocation4 + $0xf8] sm:$0xff] %vm962_vm9, %v929_v53  ;;  %v999_v27 = vpop.permute.xlu0 %998  ;;  %v5850_v53 = vld [vmem:[#allocation2 + $0x70] sm:$0x3]  ;;  %vm1941_vm9 = vcmask 293888  }
 0x204   : > { %1143 = vst.msk [vmem:[#allocation4 + $0x7] sm:$0xff] %vm1142_vm11, %v999_v27  ;;  %1074 = vrot.lane.b32.xlu2 %v5332_v61, %s4825_s13 }
 0x206   : > { %v1009_v24 = vpop.permute.xlu2 %1008 }
 0x207   : > { %1149 = vst.msk [vmem:[#allocation4 + $0x1f] sm:$0xfe] %vm1140_vm10, %v1009_v24 }
 0x208   : > { %1084 = vrot.lane.b32.xlu1 %v5419_v3, %s4825_s13 }
 0x209   : > { %1088 = vrot.lane.b32.xlu0 %v5662_v37, %s4825_s13 }
 0x20a   : > { %v1001_v38 = vpop.permute.xlu1 %1000 }
 0x20b   : > { %1145 = vst.msk [vmem:[#allocation4 + $0xf] sm:$0x1] %vm1144_vm12, %v1001_v38  ;;  %v1005_v58 = vpop.permute.xlu0 %1004 }
 0x20c   : > { %1147 = vst.msk [vmem:[#allocation4 + $0x17] sm:$0xff] %vm1142_vm11, %v1005_v58  ;;  %1080 = vrot.lane.b32.xlu2 %v5360_v47, %s4825_s13  ;;  %v5861_v58 = vld [vmem:[#allocation2 + $0x88] sm:$0x3] }
 0x20e   : > { %v1015_v26 = vpop.permute.xlu2 %1014 }
 0x20f   : > { %1152 = vst.msk [vmem:[#allocation4 + $0x2f] sm:$0xfe] %vm1140_vm10, %v1015_v26 }
 0x210   : > { %1090 = vrot.lane.b32.xlu1 %v5808_v45, %s4825_s13 }
 0x211   : > { %1193 = vrot.lane.b32.xlu0 %v5078_v16, %s4826_s14 }
 0x212   : > { %v1007_v3 = vpop.permute.xlu1 %1006 }
 0x213   : > { %1148 = vst.msk [vmem:[#allocation4 + $0x1f] sm:$0x1] %vm1144_vm12, %v1007_v3  ;;  %v1011_v63 = vpop.permute.xlu0 %1010 }
 0x214   : > { %1150 = vst.msk [vmem:[#allocation4 + $0x27] sm:$0xff] %vm1142_vm11, %v1011_v63  ;;  %1086 = vrot.lane.b32.xlu2 %v5651_v34, %s4825_s13 }
 0x216   : > { %v1021_v25 = vpop.permute.xlu2 %1020 }
 0x217   : > { %1155 = vst.msk [vmem:[#allocation4 + $0x3f] sm:$0xfe] %vm1140_vm10, %v1021_v25  ;;  %v5872_v25 = vld [vmem:[#allocation2 + $0xa0] sm:$0x3] }
 0x218   : > { %1195 = vrot.lane.b32.xlu1 %v4718_v49, %s4826_s14 }
 0x219   : > { %1199 = vrot.lane.b32.xlu0 %v5070_v14, %s4826_s14 }
 0x21a   : > { %v1013_v51 = vpop.permute.xlu1 %1012 }
 0x21b   : > { %1151 = vst.msk [vmem:[#allocation4 + $0x2f] sm:$0x1] %vm1144_vm12, %v1013_v51  ;;  %v1017_v16 = vpop.permute.xlu0 %1016 }
 0x21c   : > { %1153 = vst.msk [vmem:[#allocation4 + $0x37] sm:$0xff] %vm1142_vm11, %v1017_v16  ;;  %1191 = vrot.lane.b32.xlu2 %v5056_v12, %s4826_s14 }
 0x21e   : > { %v1027_v30 = vpop.permute.xlu2 %1026 }
 0x21f   : > { %1158 = vst.msk [vmem:[#allocation4 + $0x4f] sm:$0xfe] %vm1140_vm10, %v1027_v30  ;;  %v5883_v30 = vld [vmem:[#allocation2 + $0xb8] sm:$0x3] }
 0x220   : > { %1201 = vrot.lane.b32.xlu1 %v5828_v1, %s4826_s14 }
 0x221   : > { %1205 = vrot.lane.b32.xlu0 %v5084_v17, %s4826_s14 }
 0x222   : > { %v1019_v57 = vpop.permute.xlu1 %1018 }
 0x223   : > { %1154 = vst.msk [vmem:[#allocation4 + $0x3f] sm:$0x1] %vm1144_vm12, %v1019_v57  ;;  %v1023_v55 = vpop.permute.xlu0 %1022 }
 0x224   : > { %1156 = vst.msk [vmem:[#allocation4 + $0x47] sm:$0xff] %vm1142_vm11, %v1023_v55  ;;  %1197 = vrot.lane.b32.xlu2 %v5064_v13, %s4826_s14 }
 0x226   : > { %v1033_v12 = vpop.permute.xlu2 %1032 }
 0x227   : > { %1161 = vst.msk [vmem:[#allocation4 + $0x5f] sm:$0xfe] %vm1140_vm10, %v1033_v12 }
 0x228   : > { %1207 = vrot.lane.b32.xlu1 %v5839_v2, %s4826_s14 }
 0x229   : > { %1211 = vrot.lane.b32.xlu0 %v5095_v20, %s4826_s14 }
 0x22a   : > { %v1025_v41 = vpop.permute.xlu1 %1024 }
 0x22b   : > { %1157 = vst.msk [vmem:[#allocation4 + $0x4f] sm:$0x1] %vm1144_vm12, %v1025_v41  ;;  %v1029_v39 = vpop.permute.xlu0 %1028  ;;  %v5894_v41 = vld [vmem:[#allocation2 + $0xd0] sm:$0x3] }
 0x22c   : > { %1159 = vst.msk [vmem:[#allocation4 + $0x57] sm:$0xff] %vm1142_vm11, %v1029_v39  ;;  %1203 = vrot.lane.b32.xlu2 %v5074_v15, %s4826_s14 }
 0x22e   : > { %v1039_v59 = vpop.permute.xlu2 %1038 }
 0x22f   : > { %1164 = vst.msk [vmem:[#allocation4 + $0x6f] sm:$0xfe] %vm1140_vm10, %v1039_v59 }
 0x230   : > { %1213 = vrot.lane.b32.xlu1 %v5850_v53, %s4826_s14 }
 0x231   : > { %1217 = vrot.lane.b32.xlu0 %v5145_v29, %s4826_s14 }
 0x232   : > { %v1031_v27 = vpop.permute.xlu1 %1030 }
 0x233   : > { %1160 = vst.msk [vmem:[#allocation4 + $0x5f] sm:$0x1] %vm1144_vm12, %v1031_v27  ;;  %v1035_v24 = vpop.permute.xlu0 %1034 }
 0x234   : > { %1162 = vst.msk [vmem:[#allocation4 + $0x67] sm:$0xff] %vm1142_vm11, %v1035_v24  ;;  %1209 = vrot.lane.b32.xlu2 %v5088_v18, %s4826_s14  ;;  %v5905_v24 = vld [vmem:[#allocation2 + $0xe8] sm:$0x3] }
 0x236   : > { %v1045_v38 = vpop.permute.xlu2 %1044 }
 0x237   : > { %1167 = vst.msk [vmem:[#allocation4 + $0x7f] sm:$0xfe] %vm1140_vm10, %v1045_v38 }
 0x238   : > { %1219 = vrot.lane.b32.xlu1 %v5861_v58, %s4826_s14 }
 0x239   : > { %1223 = vrot.lane.b32.xlu0 %v5157_v32, %s4826_s14 }
 0x23a   : > { %v1037_v26 = vpop.permute.xlu1 %1036 }
 0x23b   : > { %1163 = vst.msk [vmem:[#allocation4 + $0x6f] sm:$0x1] %vm1144_vm12, %v1037_v26  ;;  %v1041_v3 = vpop.permute.xlu0 %1040 }
 0x23c   : > { %1165 = vst.msk [vmem:[#allocation4 + $0x77] sm:$0xff] %vm1142_vm11, %v1041_v3  ;;  %1215 = vrot.lane.b32.xlu2 %v5137_v28, %s4826_s14 }
 0x23e   : > { %v1051_v63 = vpop.permute.xlu2 %1050 }
 0x23f   : > { %1170 = vst.msk [vmem:[#allocation4 + $0x8f] sm:$0xfe] %vm1140_vm10, %v1051_v63  ;;  %v5916_v63 = vld [vmem:[#allocation2 + $0x100] sm:$0x3] }
 0x240   : > { %1225 = vrot.lane.b32.xlu1 %v5872_v25, %s4826_s14 }
 0x241   : > { %1229 = vrot.lane.b32.xlu0 %v5170_v35, %s4826_s14 }
 0x242   : > { %v1043_v49 = vpop.permute.xlu1 %1042 }
 0x243   : > { %1166 = vst.msk [vmem:[#allocation4 + $0x7f] sm:$0x1] %vm1144_vm12, %v1043_v49  ;;  %v1047_v51 = vpop.permute.xlu0 %1046 }
 0x244   : > { %1168 = vst.msk [vmem:[#allocation4 + $0x87] sm:$0xff] %vm1142_vm11, %v1047_v51  ;;  %1221 = vrot.lane.b32.xlu2 %v5153_v31, %s4826_s14 }
 0x246   : > { %v1057_v16 = vpop.permute.xlu2 %1056 }
 0x247   : > { %1173 = vst.msk [vmem:[#allocation4 + $0x9f] sm:$0xfe] %vm1140_vm10, %v1057_v16 }
 0x248   : > { %1231 = vrot.lane.b32.xlu1 %v5883_v30, %s4826_s14 }
 0x249   : > { %1235 = vrot.lane.b32.xlu0 %v5198_v40, %s4826_s14 }
 0x24a   : > { %v1049_v57 = vpop.permute.xlu1 %1048 }
 0x24b   : > { %1169 = vst.msk [vmem:[#allocation4 + $0x8f] sm:$0x1] %vm1144_vm12, %v1049_v57  ;;  %v1053_v55 = vpop.permute.xlu0 %1052  ;;  %v5927_v57 = vld [vmem:[#allocation2 + $0x118] sm:$0x3] }
 0x24c   : > { %1171 = vst.msk [vmem:[#allocation4 + $0x97] sm:$0xff] %vm1142_vm11, %v1053_v55  ;;  %1227 = vrot.lane.b32.xlu2 %v5161_v33, %s4826_s14 }
 0x24e   : > { %v1063_v12 = vpop.permute.xlu2 %1062 }
 0x24f   : > { %1176 = vst.msk [vmem:[#allocation4 + $0xaf] sm:$0xfe] %vm1140_vm10, %v1063_v12 }
 0x250   : > { %1237 = vrot.lane.b32.xlu1 %v5894_v41, %s4826_s14 }
 0x251   : > { %1241 = vrot.lane.b32.xlu0 %v5216_v44, %s4826_s14 }
 0x252   : > { %v1055_v39 = vpop.permute.xlu1 %1054 }
 0x253   : > { %1172 = vst.msk [vmem:[#allocation4 + $0x9f] sm:$0x1] %vm1144_vm12, %v1055_v39  ;;  %v1059_v59 = vpop.permute.xlu0 %1058 }
 0x254   : > { %1174 = vst.msk [vmem:[#allocation4 + $0xa7] sm:$0xff] %vm1142_vm11, %v1059_v59  ;;  %1233 = vrot.lane.b32.xlu2 %v5174_v36, %s4826_s14  ;;  %v5938_v59 = vld [vmem:[#allocation2 + $0x130] sm:$0x3] }
 0x256   : > { %v1069_v27 = vpop.permute.xlu2 %1068 }
 0x257   : > { %1179 = vst.msk [vmem:[#allocation4 + $0xbf] sm:$0xfe] %vm1140_vm10, %v1069_v27 }
 0x258   : > { %1243 = vrot.lane.b32.xlu1 %v5905_v24, %s4826_s14 }
 0x259   : > { %1247 = vrot.lane.b32.xlu0 %v5246_v50, %s4826_s14 }
 0x25a   : > { %v1061_v38 = vpop.permute.xlu1 %1060 }
 0x25b   : > { %1175 = vst.msk [vmem:[#allocation4 + $0xaf] sm:$0x1] %vm1144_vm12, %v1061_v38  ;;  %v1065_v26 = vpop.permute.xlu0 %1064 }
 0x25c   : > { %1177 = vst.msk [vmem:[#allocation4 + $0xb7] sm:$0xff] %vm1142_vm11, %v1065_v26  ;;  %1239 = vrot.lane.b32.xlu2 %v5205_v42, %s4826_s14 }
 0x25e   : > { %v1075_v3 = vpop.permute.xlu2 %1074 }
 0x25f   : > { %1182 = vst.msk [vmem:[#allocation4 + $0xcf] sm:$0xfe] %vm1140_vm10, %v1075_v3  ;;  %v5949_v3 = vld [vmem:[#allocation2 + $0x148] sm:$0x3] }
 0x260   : > { %1249 = vrot.lane.b32.xlu1 %v5916_v63, %s4826_s14 }
 0x261   : > { %1253 = vrot.lane.b32.xlu0 %v5268_v54, %s4826_s14 }
 0x262   : > { %v1067_v49 = vpop.permute.xlu1 %1066 }
 0x263   : > { %1178 = vst.msk [vmem:[#allocation4 + $0xbf] sm:$0x1] %vm1144_vm12, %v1067_v49  ;;  %v1071_v51 = vpop.permute.xlu0 %1070 }
 0x264   : > { %1180 = vst.msk [vmem:[#allocation4 + $0xc7] sm:$0xff] %vm1142_vm11, %v1071_v51  ;;  %1245 = vrot.lane.b32.xlu2 %v5228_v46, %s4826_s14 }
 0x266   : > { %v1081_v16 = vpop.permute.xlu2 %1080 }
 0x267   : > { %1185 = vst.msk [vmem:[#allocation4 + $0xdf] sm:$0xfe] %vm1140_vm10, %v1081_v16 }
 0x268   : > { %1255 = vrot.lane.b32.xlu1 %v5927_v57, %s4826_s14 }
 0x269   : > { %1259 = vrot.lane.b32.xlu0 %v5298_v60, %s4826_s14 }
 0x26a   : > { %v1073_v55 = vpop.permute.xlu1 %1072 }
 0x26b   : > { %1181 = vst.msk [vmem:[#allocation4 + $0xcf] sm:$0x1] %vm1144_vm12, %v1073_v55  ;;  %v1077_v12 = vpop.permute.xlu0 %1076  ;;  %v5960_v55 = vld [vmem:[#allocation2 + $0x160] sm:$0x3] }
 0x26c   : > { %1183 = vst.msk [vmem:[#allocation4 + $0xd7] sm:$0xff] %vm1142_vm11, %v1077_v12  ;;  %1251 = vrot.lane.b32.xlu2 %v5257_v52, %s4826_s14 }
 0x26e   : > { %v1087_v39 = vpop.permute.xlu2 %1086 }
 0x26f   : > { %1188 = vst.msk [vmem:[#allocation4 + $0xef] sm:$0xfe] %vm1140_vm10, %v1087_v39  ;;  %vm2228_vm10 = vcmask 64512  }
 0x270   : > { %1261 = vrot.lane.b32.xlu1 %v5938_v59, %s4826_s14 }
 0x271   : > { %1265 = vrot.lane.b32.xlu0 %v5320_v0, %s4826_s14 }
 0x272   : > { %v1079_v27 = vpop.permute.xlu1 %1078 }
 0x273   : > { %1184 = vst.msk [vmem:[#allocation4 + $0xdf] sm:$0x1] %vm1144_vm12, %v1079_v27  ;;  %v1083_v38 = vpop.permute.xlu0 %1082 }
 0x274   : > { %1186 = vst.msk [vmem:[#allocation4 + $0xe7] sm:$0xff] %vm1142_vm11, %v1083_v38  ;;  %1257 = vrot.lane.b32.xlu2 %v5280_v56, %s4826_s14  ;;  %v5971_v38 = vld [vmem:[#allocation2 + $0x178] sm:$0x3] }
 0x276   : > { %v1192_v26 = vpop.permute.xlu2 %1191 }
 0x277   : > { %1336 = vst.msk [vmem:[#allocation4 - $0x2] sm:$0xfc] %vm1335_vm13, %v1192_v26 }
 0x278   : > { %1267 = vrot.lane.b32.xlu1 %v5949_v3, %s4826_s14 }
 0x279   : > { %1271 = vrot.lane.b32.xlu0 %v5350_v48, %s4826_s14 }
 0x27a   : > { %v1085_v49 = vpop.permute.xlu1 %1084 }
 0x27b   : > { %1187 = vst.msk [vmem:[#allocation4 + $0xef] sm:$0x1] %vm1144_vm12, %v1085_v49  ;;  %v1089_v51 = vpop.permute.xlu0 %1088 }
 0x27c   : > { %1189 = vst.msk [vmem:[#allocation4 + $0xf7] sm:$0xff] %vm1142_vm11, %v1089_v51  ;;  %1263 = vrot.lane.b32.xlu2 %v5309_v62, %s4826_s14  ;;  %vm2237_vm11 = vcmask 57344  }
 0x27e   : > { %v1198_v16 = vpop.permute.xlu2 %1197 }
 0x27f   : > { %1341 = vst.msk [vmem:[#allocation4 + $0xe] sm:$0xfc] %vm1335_vm13, %v1198_v16 }
 0x280   : > { %1273 = vrot.lane.b32.xlu1 %v5960_v55, %s4826_s14 }
 0x281   : > { %1277 = vrot.lane.b32.xlu0 %v5371_v43, %s4826_s14 }
 0x282   : > { %v1091_v12 = vpop.permute.xlu1 %1090 }
 0x283   : > { %1190 = vst.msk [vmem:[#allocation4 + $0xff] sm:$0x1] %vm1144_vm12, %v1091_v12  ;;  %v1194_v39 = vpop.permute.xlu0 %1193  ;;  %vm2231_vm12 = vcmask 58368  }
 0x284   : > { %1338 = vst.msk [vmem:[#allocation4 + $0x6] sm:$0xff] %vm1337_vm14, %v1194_v39  ;;  %1269 = vrot.lane.b32.xlu2 %v5332_v61, %s4826_s14 }
 0x286   : > { %v1204_v27 = vpop.permute.xlu2 %1203 }
 0x287   : > { %1344 = vst.msk [vmem:[#allocation4 + $0x1e] sm:$0xfc] %vm1335_vm13, %v1204_v27 }
 0x288   : > { %1279 = vrot.lane.b32.xlu1 %v5971_v38, %s4826_s14 }
 0x289   : > { %1283 = vrot.lane.b32.xlu0 %v5662_v37, %s4826_s14 }
 0x28a   : > { %v1196_v26 = vpop.permute.xlu1 %1195 }
 0x28b   : > { %1340 = vst.msk [vmem:[#allocation4 + $0xe] sm:$0x3] %vm1339_vm15, %v1196_v26  ;;  %v1200_v49 = vpop.permute.xlu0 %1199 }
 0x28c   : > { %1342 = vst.msk [vmem:[#allocation4 + $0x16] sm:$0xff] %vm1337_vm14, %v1200_v49  ;;  %1275 = vrot.lane.b32.xlu2 %v5360_v47, %s4826_s14 }
 0x28e   : > { %v1210_v51 = vpop.permute.xlu2 %1209 }
 0x28f   : > { %1347 = vst.msk [vmem:[#allocation4 + $0x2e] sm:$0xfc] %vm1335_vm13, %v1210_v51 }
 0x290   : > { %1285 = vrot.lane.b32.xlu1 %v5808_v45, %s4826_s14 }
 0x291   : > { %1390 = vrot.lane.b32.xlu0 %v5070_v14, %s4827_s15 }
 0x292   : > { %v1202_v16 = vpop.permute.xlu1 %1201 }
 0x293   : > { %1343 = vst.msk [vmem:[#allocation4 + $0x1e] sm:$0x3] %vm1339_vm15, %v1202_v16  ;;  %v1206_v12 = vpop.permute.xlu0 %1205 }
 0x294   : > { %1345 = vst.msk [vmem:[#allocation4 + $0x26] sm:$0xff] %vm1337_vm14, %v1206_v12  ;;  %1281 = vrot.lane.b32.xlu2 %v5651_v34, %s4826_s14 }
 0x296   : > { %v1216_v39 = vpop.permute.xlu2 %1215 }
 0x297   : > { %1350 = vst.msk [vmem:[#allocation4 + $0x3e] sm:$0xfc] %vm1335_vm13, %v1216_v39 }
 0x298   : > { %1392 = vrot.lane.b32.xlu1 %v5074_v15, %s4827_s15 }
 0x299   : > { %1396 = vrot.lane.b32.xlu0 %v5088_v18, %s4827_s15 }
 0x29a   : > { %v1208_v27 = vpop.permute.xlu1 %1207 }
 0x29b   : > { %1346 = vst.msk [vmem:[#allocation4 + $0x2e] sm:$0x3] %vm1339_vm15, %v1208_v27  ;;  %v1212_v26 = vpop.permute.xlu0 %1211 }
 0x29c   : > { %1348 = vst.msk [vmem:[#allocation4 + $0x36] sm:$0xff] %vm1337_vm14, %v1212_v26  ;;  %1388 = vrot.lane.b32.xlu2 %v5064_v13, %s4827_s15 }
 0x29e   : > { %v1222_v49 = vpop.permute.xlu2 %1221 }
 0x29f   : > { %1353 = vst.msk [vmem:[#allocation4 + $0x4e] sm:$0xfc] %vm1335_vm13, %v1222_v49 }
 0x2a0   : > { %1398 = vrot.lane.b32.xlu1 %v5095_v20, %s4827_s15 }
 0x2a1   : > { %1402 = vrot.lane.b32.xlu0 %v5145_v29, %s4827_s15 }
 0x2a2   : > { %v1214_v51 = vpop.permute.xlu1 %1213 }
 0x2a3   : > { %1349 = vst.msk [vmem:[#allocation4 + $0x3e] sm:$0x3] %vm1339_vm15, %v1214_v51  ;;  %v1218_v16 = vpop.permute.xlu0 %1217 }
 0x2a4   : > { %1351 = vst.msk [vmem:[#allocation4 + $0x46] sm:$0xff] %vm1337_vm14, %v1218_v16  ;;  %1394 = vrot.lane.b32.xlu2 %v5084_v17, %s4827_s15 }
 0x2a6   : > { %v1228_v12 = vpop.permute.xlu2 %1227 }
 0x2a7   : > { %1356 = vst.msk [vmem:[#allocation4 + $0x5e] sm:$0xfc] %vm1335_vm13, %v1228_v12 }
 0x2a8   : > { %1404 = vrot.lane.b32.xlu1 %v5153_v31, %s4827_s15 }
 0x2a9   : > { %1408 = vrot.lane.b32.xlu0 %v5161_v33, %s4827_s15 }
 0x2aa   : > { %v1220_v39 = vpop.permute.xlu1 %1219 }
 0x2ab   : > { %1352 = vst.msk [vmem:[#allocation4 + $0x4e] sm:$0x3] %vm1339_vm15, %v1220_v39  ;;  %v1224_v27 = vpop.permute.xlu0 %1223 }
 0x2ac   : > { %1354 = vst.msk [vmem:[#allocation4 + $0x56] sm:$0xff] %vm1337_vm14, %v1224_v27  ;;  %1400 = vrot.lane.b32.xlu2 %v5137_v28, %s4827_s15 }
 0x2ae   : > { %v1234_v26 = vpop.permute.xlu2 %1233 }
 0x2af   : > { %1359 = vst.msk [vmem:[#allocation4 + $0x6e] sm:$0xfc] %vm1335_vm13, %v1234_v26 }
 0x2b0   : > { %1410 = vrot.lane.b32.xlu1 %v5170_v35, %s4827_s15 }
 0x2b1   : > { %1414 = vrot.lane.b32.xlu0 %v5198_v40, %s4827_s15 }
 0x2b2   : > { %v1226_v49 = vpop.permute.xlu1 %1225 }
 0x2b3   : > { %1355 = vst.msk [vmem:[#allocation4 + $0x5e] sm:$0x3] %vm1339_vm15, %v1226_v49  ;;  %v1230_v51 = vpop.permute.xlu0 %1229 }
 0x2b4   : > { %1357 = vst.msk [vmem:[#allocation4 + $0x66] sm:$0xff] %vm1337_vm14, %v1230_v51  ;;  %1406 = vrot.lane.b32.xlu2 %v5157_v32, %s4827_s15 }
 0x2b6   : > { %v1240_v16 = vpop.permute.xlu2 %1239 }
 0x2b7   : > { %1362 = vst.msk [vmem:[#allocation4 + $0x7e] sm:$0xfc] %vm1335_vm13, %v1240_v16 }
 0x2b8   : > { %1416 = vrot.lane.b32.xlu1 %v5205_v42, %s4827_s15 }
 0x2b9   : > { %1420 = vrot.lane.b32.xlu0 %v5228_v46, %s4827_s15 }
 0x2ba   : > { %v1232_v12 = vpop.permute.xlu1 %1231 }
 0x2bb   : > { %1358 = vst.msk [vmem:[#allocation4 + $0x6e] sm:$0x3] %vm1339_vm15, %v1232_v12  ;;  %v1236_v39 = vpop.permute.xlu0 %1235 }
 0x2bc   : > { %1360 = vst.msk [vmem:[#allocation4 + $0x76] sm:$0xff] %vm1337_vm14, %v1236_v39  ;;  %1412 = vrot.lane.b32.xlu2 %v5174_v36, %s4827_s15 }
 0x2be   : > { %v1246_v27 = vpop.permute.xlu2 %1245 }
 0x2bf   : > { %1365 = vst.msk [vmem:[#allocation4 + $0x8e] sm:$0xfc] %vm1335_vm13, %v1246_v27 }
 0x2c0   : > { %1422 = vrot.lane.b32.xlu1 %v5246_v50, %s4827_s15 }
 0x2c1   : > { %1426 = vrot.lane.b32.xlu0 %v5268_v54, %s4827_s15 }
 0x2c2   : > { %v1238_v26 = vpop.permute.xlu1 %1237 }
 0x2c3   : > { %1361 = vst.msk [vmem:[#allocation4 + $0x7e] sm:$0x3] %vm1339_vm15, %v1238_v26  ;;  %v1242_v49 = vpop.permute.xlu0 %1241 }
 0x2c4   : > { %1363 = vst.msk [vmem:[#allocation4 + $0x86] sm:$0xff] %vm1337_vm14, %v1242_v49  ;;  %1418 = vrot.lane.b32.xlu2 %v5216_v44, %s4827_s15 }
 0x2c6   : > { %v1252_v51 = vpop.permute.xlu2 %1251 }
 0x2c7   : > { %1368 = vst.msk [vmem:[#allocation4 + $0x9e] sm:$0xfc] %vm1335_vm13, %v1252_v51 }
 0x2c8   : > { %1428 = vrot.lane.b32.xlu1 %v5280_v56, %s4827_s15 }
 0x2c9   : > { %1432 = vrot.lane.b32.xlu0 %v5309_v62, %s4827_s15 }
 0x2ca   : > { %v1244_v16 = vpop.permute.xlu1 %1243 }
 0x2cb   : > { %1364 = vst.msk [vmem:[#allocation4 + $0x8e] sm:$0x3] %vm1339_vm15, %v1244_v16  ;;  %v1248_v12 = vpop.permute.xlu0 %1247 }
 0x2cc   : > { %1366 = vst.msk [vmem:[#allocation4 + $0x96] sm:$0xff] %vm1337_vm14, %v1248_v12  ;;  %1424 = vrot.lane.b32.xlu2 %v5257_v52, %s4827_s15  ;;  %v6071_v12 = vld [vmem:[#allocation2 + $0x1a0] sm:$0xff] }
 0x2ce   : > { %v1258_v39 = vpop.permute.xlu2 %1257 }
 0x2cf   : > { %1371 = vst.msk [vmem:[#allocation4 + $0xae] sm:$0xfc] %vm1335_vm13, %v1258_v39 }
 0x2d0   : > { %1434 = vrot.lane.b32.xlu1 %v5320_v0, %s4827_s15 }
 0x2d1   : > { %1438 = vrot.lane.b32.xlu0 %v5350_v48, %s4827_s15 }
 0x2d2   : > { %v1250_v27 = vpop.permute.xlu1 %1249 }
 0x2d3   : > { %1367 = vst.msk [vmem:[#allocation4 + $0x9e] sm:$0x3] %vm1339_vm15, %v1250_v27  ;;  %v1254_v26 = vpop.permute.xlu0 %1253 }
 0x2d4   : > { %1369 = vst.msk [vmem:[#allocation4 + $0xa6] sm:$0xff] %vm1337_vm14, %v1254_v26  ;;  %1430 = vrot.lane.b32.xlu2 %v5298_v60, %s4827_s15 }
 0x2d6   : > { %v1264_v49 = vpop.permute.xlu2 %1263 }
 0x2d7   : > { %1374 = vst.msk [vmem:[#allocation4 + $0xbe] sm:$0xfc] %vm1335_vm13, %v1264_v49 }
 0x2d8   : > { %1440 = vrot.lane.b32.xlu1 %v5360_v47, %s4827_s15 }
 0x2d9   : > { %1444 = vrot.lane.b32.xlu0 %v5651_v34, %s4827_s15 }
 0x2da   : > { %v1256_v51 = vpop.permute.xlu1 %1255 }
 0x2db   : > { %1370 = vst.msk [vmem:[#allocation4 + $0xae] sm:$0x3] %vm1339_vm15, %v1256_v51  ;;  %v1260_v16 = vpop.permute.xlu0 %1259 }
 0x2dc   : > { %1372 = vst.msk [vmem:[#allocation4 + $0xb6] sm:$0xff] %vm1337_vm14, %v1260_v16  ;;  %1436 = vrot.lane.b32.xlu2 %v5332_v61, %s4827_s15 }
 0x2de   : > { %v1270_v39 = vpop.permute.xlu2 %1269 }
 0x2df   : > { %1377 = vst.msk [vmem:[#allocation4 + $0xce] sm:$0xfc] %vm1335_vm13, %v1270_v39 }
 0x2e0   : > { %1446 = vrot.lane.b32.xlu1 %v5662_v37, %s4827_s15  ;;  %v6087_v37 = vld [vmem:[#allocation2 + $0x198] sm:$0xff] }
 0x2e1   : > { %1450 = vrot.lane.b32.xlu0 %v6071_v12, %s4827_s15 }
 0x2e2   : > { %v1262_v34 = vpop.permute.xlu1 %1261 }
 0x2e3   : > { %1373 = vst.msk [vmem:[#allocation4 + $0xbe] sm:$0x3] %vm1339_vm15, %v1262_v34  ;;  %v1266_v27 = vpop.permute.xlu0 %1265 }
 0x2e4   : > { %1375 = vst.msk [vmem:[#allocation4 + $0xc6] sm:$0xff] %vm1337_vm14, %v1266_v27  ;;  %1442 = vrot.lane.b32.xlu2 %v5371_v43, %s4827_s15 }
 0x2e6   : > { %v1276_v26 = vpop.permute.xlu2 %1275 }
 0x2e7   : > { %1380 = vst.msk [vmem:[#allocation4 + $0xde] sm:$0xfc] %vm1335_vm13, %v1276_v26 }
 0x2e8   : > { %1518 = vrot.lane.b32.xlu1 %v5064_v13, %s4828_s16 }
 0x2e9   : > { %1522 = vrot.lane.b32.xlu0 %v5828_v1, %s4828_s16 }
 0x2ea   : > { %v1268_v49 = vpop.permute.xlu1 %1267 }
 0x2eb   : > { %1376 = vst.msk [vmem:[#allocation4 + $0xce] sm:$0x3] %vm1339_vm15, %v1268_v49  ;;  %v1272_v51 = vpop.permute.xlu0 %1271 }
 0x2ec   : > { %1378 = vst.msk [vmem:[#allocation4 + $0xd6] sm:$0xff] %vm1337_vm14, %v1272_v51  ;;  %1448 = vrot.lane.b32.xlu2 %v6087_v37, %s4827_s15 }
 0x2ee   : > { %v1282_v16 = vpop.permute.xlu2 %1281 }
 0x2ef   : > { %1383 = vst.msk [vmem:[#allocation4 + $0xee] sm:$0xfc] %vm1335_vm13, %v1282_v16  ;;  %vm2587_vm13 = vcmask 130112  }
 0x2f0   : > { %1524 = vrot.lane.b32.xlu1 %v5074_v15, %s4828_s16 }
 0x2f1   : > { %1528 = vrot.lane.b32.xlu0 %v5839_v2, %s4828_s16 }
 0x2f2   : > { %v1274_v39 = vpop.permute.xlu1 %1273 }
 0x2f3   : > { %1379 = vst.msk [vmem:[#allocation4 + $0xde] sm:$0x3] %vm1339_vm15, %v1274_v39  ;;  %v1278_v34 = vpop.permute.xlu0 %1277 }
 0x2f4   : > { %1381 = vst.msk [vmem:[#allocation4 + $0xe6] sm:$0xff] %vm1337_vm14, %v1278_v34  ;;  %1520 = vrot.lane.b32.xlu2 %v5070_v14, %s4828_s16 }
 0x2f6   : > { %v1389_v27 = vpop.permute.xlu2 %1388 }
 0x2f7   : > { %1485 = vst.msk [vmem:[#allocation4] sm:$0xff] %vm1484_vm1, %v1389_v27 }
 0x2f8   : > { %1530 = vrot.lane.b32.xlu1 %v5088_v18, %s4828_s16 }
 0x2f9   : > { %1534 = vrot.lane.b32.xlu0 %v5850_v53, %s4828_s16 }
 0x2fa   : > { %v1280_v26 = vpop.permute.xlu1 %1279 }
 0x2fb   : > { %1382 = vst.msk [vmem:[#allocation4 + $0xee] sm:$0x3] %vm1339_vm15, %v1280_v26  ;;  %v1284_v49 = vpop.permute.xlu0 %1283 }
 0x2fc   : > { %1384 = vst.msk [vmem:[#allocation4 + $0xf6] sm:$0xff] %vm1337_vm14, %v1284_v49  ;;  %1526 = vrot.lane.b32.xlu2 %v5084_v17, %s4828_s16  ;;  %vm2585_vm14 = vcmask 130113  }
 0x2fe   : > { %v1395_v51 = vpop.permute.xlu2 %1394 }
 0x2ff   : > { %1488 = vst.msk [vmem:[#allocation4 + $0x18] sm:$0xff] %vm1484_vm1, %v1395_v51 }
 0x300   : > { %1536 = vrot.lane.b32.xlu1 %v5137_v28, %s4828_s16 }
 0x301   : > { %1540 = vrot.lane.b32.xlu0 %v5861_v58, %s4828_s16 }
 0x302   : > { %v1286_v16 = vpop.permute.xlu1 %1285 }
 0x303   : > { %1385 = vst.msk [vmem:[#allocation4 + $0xfe] sm:$0x3] %vm1339_vm15, %v1286_v16  ;;  %v1391_v39 = vpop.permute.xlu0 %1390  ;;  %vm2589_vm15 = vcmask 122944  }
 0x304   : > { %1486 = vst.msk [vmem:[#allocation4 + $0x8] sm:$0xff] %vm1484_vm1, %v1391_v39  ;;  %1532 = vrot.lane.b32.xlu2 %v5095_v20, %s4828_s16 }
 0x306   : > { %v1401_v34 = vpop.permute.xlu2 %1400 }
 0x307   : > { %1491 = vst.msk [vmem:[#allocation4 + $0x30] sm:$0xff] %vm1484_vm1, %v1401_v34 }
 0x308   : > { %1542 = vrot.lane.b32.xlu1 %v5153_v31, %s4828_s16 }
 0x309   : > { %1546 = vrot.lane.b32.xlu0 %v5872_v25, %s4828_s16 }
 0x30a   : > { %v1393_v27 = vpop.permute.xlu1 %1392 }
 0x30b   : > { %1487 = vst.msk [vmem:[#allocation4 + $0x10] sm:$0xff] %vm1484_vm1, %v1393_v27  ;;  %v1397_v26 = vpop.permute.xlu0 %1396 }
 0x30c   : > { %1489 = vst.msk [vmem:[#allocation4 + $0x20] sm:$0xff] %vm1484_vm1, %v1397_v26  ;;  %1538 = vrot.lane.b32.xlu2 %v5145_v29, %s4828_s16 }
 0x30e   : > { %v1407_v49 = vpop.permute.xlu2 %1406 }
 0x30f   : > { %1494 = vst.msk [vmem:[#allocation4 + $0x48] sm:$0xff] %vm1484_vm1, %v1407_v49 }
 0x310   : > { %1548 = vrot.lane.b32.xlu1 %v5161_v33, %s4828_s16 }
 0x311   : > { %1552 = vrot.lane.b32.xlu0 %v5883_v30, %s4828_s16 }
 0x312   : > { %v1399_v51 = vpop.permute.xlu1 %1398 }
 0x313   : > { %1490 = vst.msk [vmem:[#allocation4 + $0x28] sm:$0xff] %vm1484_vm1, %v1399_v51  ;;  %v1403_v16 = vpop.permute.xlu0 %1402 }
 0x314   : > { %1492 = vst.msk [vmem:[#allocation4 + $0x38] sm:$0xff] %vm1484_vm1, %v1403_v16  ;;  %1544 = vrot.lane.b32.xlu2 %v5157_v32, %s4828_s16 }
 0x316   : > { %v1413_v39 = vpop.permute.xlu2 %1412 }
 0x317   : > { %1497 = vst.msk [vmem:[#allocation4 + $0x60] sm:$0xff] %vm1484_vm1, %v1413_v39 }
 0x318   : > { %1554 = vrot.lane.b32.xlu1 %v5174_v36, %s4828_s16 }
 0x319   : > { %1558 = vrot.lane.b32.xlu0 %v5894_v41, %s4828_s16 }
 0x31a   : > { %v1405_v34 = vpop.permute.xlu1 %1404 }
 0x31b   : > { %1493 = vst.msk [vmem:[#allocation4 + $0x40] sm:$0xff] %vm1484_vm1, %v1405_v34  ;;  %v1409_v27 = vpop.permute.xlu0 %1408 }
 0x31c   : > { %1495 = vst.msk [vmem:[#allocation4 + $0x50] sm:$0xff] %vm1484_vm1, %v1409_v27  ;;  %1550 = vrot.lane.b32.xlu2 %v5170_v35, %s4828_s16 }
 0x31e   : > { %v1419_v26 = vpop.permute.xlu2 %1418 }
 0x31f   : > { %1500 = vst.msk [vmem:[#allocation4 + $0x78] sm:$0xff] %vm1484_vm1, %v1419_v26 }
 0x320   : > { %1560 = vrot.lane.b32.xlu1 %v5205_v42, %s4828_s16 }
 0x321   : > { %1564 = vrot.lane.b32.xlu0 %v5905_v24, %s4828_s16 }
 0x322   : > { %v1411_v49 = vpop.permute.xlu1 %1410 }
 0x323   : > { %1496 = vst.msk [vmem:[#allocation4 + $0x58] sm:$0xff] %vm1484_vm1, %v1411_v49  ;;  %v1415_v51 = vpop.permute.xlu0 %1414 }
 0x324   : > { %1498 = vst.msk [vmem:[#allocation4 + $0x68] sm:$0xff] %vm1484_vm1, %v1415_v51  ;;  %1556 = vrot.lane.b32.xlu2 %v5198_v40, %s4828_s16 }
 0x326   : > { %v1425_v16 = vpop.permute.xlu2 %1424 }
 0x327   : > { %1503 = vst.msk [vmem:[#allocation4 + $0x90] sm:$0xff] %vm1484_vm1, %v1425_v16 }
 0x328   : > { %1566 = vrot.lane.b32.xlu1 %v5228_v46, %s4828_s16 }
 0x329   : > { %1570 = vrot.lane.b32.xlu0 %v5916_v63, %s4828_s16 }
 0x32a   : > { %v1417_v39 = vpop.permute.xlu1 %1416 }
 0x32b   : > { %1499 = vst.msk [vmem:[#allocation4 + $0x70] sm:$0xff] %vm1484_vm1, %v1417_v39  ;;  %v1421_v34 = vpop.permute.xlu0 %1420 }
 0x32c   : > { %1501 = vst.msk [vmem:[#allocation4 + $0x80] sm:$0xff] %vm1484_vm1, %v1421_v34  ;;  %1562 = vrot.lane.b32.xlu2 %v5216_v44, %s4828_s16 }
 0x32e   : > { %v1431_v27 = vpop.permute.xlu2 %1430 }
 0x32f   : > { %1506 = vst.msk [vmem:[#allocation4 + $0xa8] sm:$0xff] %vm1484_vm1, %v1431_v27 }
 0x330   : > { %1572 = vrot.lane.b32.xlu1 %v5257_v52, %s4828_s16 }
 0x331   : > { %1576 = vrot.lane.b32.xlu0 %v5927_v57, %s4828_s16 }
 0x332   : > { %v1423_v26 = vpop.permute.xlu1 %1422 }
 0x333   : > { %1502 = vst.msk [vmem:[#allocation4 + $0x88] sm:$0xff] %vm1484_vm1, %v1423_v26  ;;  %v1427_v49 = vpop.permute.xlu0 %1426 }
 0x334   : > { %1504 = vst.msk [vmem:[#allocation4 + $0x98] sm:$0xff] %vm1484_vm1, %v1427_v49  ;;  %1568 = vrot.lane.b32.xlu2 %v5246_v50, %s4828_s16 }
 0x336   : > { %v1437_v51 = vpop.permute.xlu2 %1436 }
 0x337   : > { %1509 = vst.msk [vmem:[#allocation4 + $0xc0] sm:$0xff] %vm1484_vm1, %v1437_v51 }
 0x338   : > { %1578 = vrot.lane.b32.xlu1 %v5280_v56, %s4828_s16 }
 0x339   : > { %1582 = vrot.lane.b32.xlu0 %v5938_v59, %s4828_s16 }
 0x33a   : > { %v1429_v16 = vpop.permute.xlu1 %1428 }
 0x33b   : > { %1505 = vst.msk [vmem:[#allocation4 + $0xa0] sm:$0xff] %vm1484_vm1, %v1429_v16  ;;  %v1433_v39 = vpop.permute.xlu0 %1432 }
 0x33c   : > { %1507 = vst.msk [vmem:[#allocation4 + $0xb0] sm:$0xff] %vm1484_vm1, %v1433_v39  ;;  %1574 = vrot.lane.b32.xlu2 %v5268_v54, %s4828_s16 }
 0x33e   : > { %v1443_v34 = vpop.permute.xlu2 %1442 }
 0x33f   : > { %1512 = vst.msk [vmem:[#allocation4 + $0xd8] sm:$0xff] %vm1484_vm1, %v1443_v34 }
 0x340   : > { %1584 = vrot.lane.b32.xlu1 %v5309_v62, %s4828_s16 }
 0x341   : > { %1588 = vrot.lane.b32.xlu0 %v5949_v3, %s4828_s16 }
 0x342   : > { %v1435_v27 = vpop.permute.xlu1 %1434 }
 0x343   : > { %1508 = vst.msk [vmem:[#allocation4 + $0xb8] sm:$0xff] %vm1484_vm1, %v1435_v27  ;;  %v1439_v26 = vpop.permute.xlu0 %1438 }
 0x344   : > { %1510 = vst.msk [vmem:[#allocation4 + $0xc8] sm:$0xff] %vm1484_vm1, %v1439_v26  ;;  %1580 = vrot.lane.b32.xlu2 %v5298_v60, %s4828_s16 }
 0x346   : > { %v1449_v49 = vpop.permute.xlu2 %1448 }
 0x347   : > { %1515 = vst.msk [vmem:[#allocation4 + $0xf0] sm:$0xff] %vm1484_vm1, %v1449_v49  ;;  %v6211_v49 = vld [vmem:[#allocation2 + $0x180] sm:$0xff] }
 0x348   : > { %1590 = vrot.lane.b32.xlu1 %v5332_v61, %s4828_s16 }
 0x349   : > { %1594 = vrot.lane.b32.xlu0 %v5960_v55, %s4828_s16 }
 0x34a   : > { %v1441_v51 = vpop.permute.xlu1 %1440 }
 0x34b   : > { %1511 = vst.msk [vmem:[#allocation4 + $0xd0] sm:$0xff] %vm1484_vm1, %v1441_v51  ;;  %v1445_v16 = vpop.permute.xlu0 %1444 }
 0x34c   : > { %1513 = vst.msk [vmem:[#allocation4 + $0xe0] sm:$0xff] %vm1484_vm1, %v1445_v16  ;;  %1586 = vrot.lane.b32.xlu2 %v5320_v0, %s4828_s16 }
 0x34e   : > { %v1521_v39 = vpop.permute.xlu2 %1520 }
 0x34f   : > { %1665 = vst.msk [vmem:[#allocation4 + $0x7] sm:$0xff] %vm1664_vm2, %v1521_v39  ;;  %v6221_v39 = vld [vmem:[#allocation2 + $0x1a8] sm:$0x3] }
 0x350   : > { %1596 = vrot.lane.b32.xlu1 %v5360_v47, %s4828_s16 }
 0x351   : > { %1600 = vrot.lane.b32.xlu0 %v5971_v38, %s4828_s16 }
 0x352   : > { %v1447_v34 = vpop.permute.xlu1 %1446 }
 0x353   : > { %1514 = vst.msk [vmem:[#allocation4 + $0xe8] sm:$0xff] %vm1484_vm1, %v1447_v34  ;;  %v1451_v27 = vpop.permute.xlu0 %1450 }
 0x354   : > { %1516 = vst.msk [vmem:[#allocation4 + $0xf8] sm:$0xff] %vm1484_vm1, %v1451_v27  ;;  %1592 = vrot.lane.b32.xlu2 %v5350_v48, %s4828_s16  ;;  %vm2782_vm1 = vcmask 195712  }
 0x356   : > { %v1527_v26 = vpop.permute.xlu2 %1526 }
 0x357   : > { %1669 = vst.msk [vmem:[#allocation4 + $0x17] sm:$0xff] %vm1664_vm2, %v1527_v26  ;;  %v6230_v26 = vld [vmem:[#allocation2 + $0x188] sm:$0xff] }
 0x358   : > { %1602 = vrot.lane.b32.xlu1 %v6211_v49, %s4828_s16 }
 0x359   : > { %1606 = vrot.lane.b32.xlu0 %v5808_v45, %s4828_s16 }
 0x35a   : > { %v1519_v51 = vpop.permute.xlu1 %1518 }
 0x35b   : > { %1663 = vst.msk [vmem:[#allocation4 - $0x1] sm:$0xfe] %vm1662_vm3, %v1519_v51  ;;  %v1523_v16 = vpop.permute.xlu0 %1522 }
 0x35c   : > { %1667 = vst.msk [vmem:[#allocation4 + $0xf] sm:$0x1] %vm1666_vm4, %v1523_v16  ;;  %1598 = vrot.lane.b32.xlu2 %v5371_v43, %s4828_s16 }
 0x35e   : > { %v1533_v34 = vpop.permute.xlu2 %1532 }
 0x35f   : > { %1672 = vst.msk [vmem:[#allocation4 + $0x27] sm:$0xff] %vm1664_vm2, %v1533_v34 }
 0x360   : > { %1608 = vrot.lane.b32.xlu1 %v6087_v37, %s4828_s16 }
 0x361   : > { %1612 = vrot.lane.b32.xlu0 %v6221_v39, %s4828_s16 }
 0x362   : > { %v1525_v45 = vpop.permute.xlu1 %1524 }
 0x363   : > { %1668 = vst.msk [vmem:[#allocation4 + $0xf] sm:$0xfe] %vm1662_vm3, %v1525_v45  ;;  %v1529_v27 = vpop.permute.xlu0 %1528 }
 0x364   : > { %1670 = vst.msk [vmem:[#allocation4 + $0x1f] sm:$0x1] %vm1666_vm4, %v1529_v27  ;;  %1604 = vrot.lane.b32.xlu2 %v6230_v26, %s4828_s16 }
 0x366   : > { %v1539_v51 = vpop.permute.xlu2 %1538 }
 0x367   : > { %1675 = vst.msk [vmem:[#allocation4 + $0x37] sm:$0xff] %vm1664_vm2, %v1539_v51 }
 0x368   : > { %1713 = vrot.lane.b32.xlu1 %v5064_v13, %s4829_s17 }
 0x369   : > { %1717 = vrot.lane.b32.xlu0 %v5828_v1, %s4829_s17 }
 0x36a   : > { %v1531_v16 = vpop.permute.xlu1 %1530 }
 0x36b   : > { %1671 = vst.msk [vmem:[#allocation4 + $0x1f] sm:$0xfe] %vm1662_vm3, %v1531_v16  ;;  %v1535_v34 = vpop.permute.xlu0 %1534  ;;  %v258_v16 = vld [vmem:[%s8198_s1 + $0x10] sm:$0xff] }
 0x36c   : > { %1673 = vst.msk [vmem:[#allocation4 + $0x2f] sm:$0x1] %vm1666_vm4, %v1535_v34  ;;  %1610 = vrot.lane.b32.xlu2 %v6071_v12, %s4828_s16  ;;  %v256_v34 = vld [vmem:[%s8198_s1] sm:$0xff]  ;;  %s215_s16 = sand.u32 1, %s4811_s19  }
 0x36e   : > { %v1545_v45 = vpop.permute.xlu2 %1544 }
 0x36f   : > { %1678 = vst.msk [vmem:[#allocation4 + $0x47] sm:$0xff] %vm1664_vm2, %v1545_v45 }
 0x370   : > { %1719 = vrot.lane.b32.xlu1 %v5074_v15, %s4829_s17 }
 0x371   : > { %1723 = vrot.lane.b32.xlu0 %v5839_v2, %s4829_s17 }
 0x372   : > { %v1537_v13 = vpop.permute.xlu1 %1536 }
 0x373   : > { %1674 = vst.msk [vmem:[#allocation4 + $0x2f] sm:$0xfe] %vm1662_vm3, %v1537_v13  ;;  %v1541_v1 = vpop.permute.xlu0 %1540 }
 0x374   : > { %1676 = vst.msk [vmem:[#allocation4 + $0x3f] sm:$0x1] %vm1666_vm4, %v1541_v1  ;;  %1715 = vrot.lane.b32.xlu2 %v5070_v14, %s4829_s17 }
 0x376   : > { %v1551_v27 = vpop.permute.xlu2 %1550 }
 0x377   : > { %1681 = vst.msk [vmem:[#allocation4 + $0x57] sm:$0xff] %vm1664_vm2, %v1551_v27 }
 0x378   : > { %1725 = vrot.lane.b32.xlu1 %v5088_v18, %s4829_s17 }
 0x379   : > { %1729 = vrot.lane.b32.xlu0 %v5850_v53, %s4829_s17 }
 0x37a   : > { %v1543_v15 = vpop.permute.xlu1 %1542 }
 0x37b   : > { %1677 = vst.msk [vmem:[#allocation4 + $0x3f] sm:$0xfe] %vm1662_vm3, %v1543_v15  ;;  %v1547_v2 = vpop.permute.xlu0 %1546 }
 0x37c   : > { %1679 = vst.msk [vmem:[#allocation4 + $0x4f] sm:$0x1] %vm1666_vm4, %v1547_v2  ;;  %1721 = vrot.lane.b32.xlu2 %v5084_v17, %s4829_s17 }
 0x37e   : > { %v1557_v51 = vpop.permute.xlu2 %1556 }
 0x37f   : > { %1684 = vst.msk [vmem:[#allocation4 + $0x67] sm:$0xff] %vm1664_vm2, %v1557_v51 }
 0x380   : > { %1731 = vrot.lane.b32.xlu1 %v5137_v28, %s4829_s17 }
 0x381   : > { %1735 = vrot.lane.b32.xlu0 %v5861_v58, %s4829_s17 }
 0x382   : > { %v1549_v14 = vpop.permute.xlu1 %1548 }
 0x383   : > { %1680 = vst.msk [vmem:[#allocation4 + $0x4f] sm:$0xfe] %vm1662_vm3, %v1549_v14  ;;  %v1553_v18 = vpop.permute.xlu0 %1552 }
 0x384   : > { %1682 = vst.msk [vmem:[#allocation4 + $0x5f] sm:$0x1] %vm1666_vm4, %v1553_v18  ;;  %1727 = vrot.lane.b32.xlu2 %v5095_v20, %s4829_s17 }
 0x386   : > { %v1563_v53 = vpop.permute.xlu2 %1562 }
 0x387   : > { %1687 = vst.msk [vmem:[#allocation4 + $0x77] sm:$0xff] %vm1664_vm2, %v1563_v53 }
 0x388   : > { %1737 = vrot.lane.b32.xlu1 %v5153_v31, %s4829_s17 }
 0x389   : > { %1741 = vrot.lane.b32.xlu0 %v5872_v25, %s4829_s17 }
 0x38a   : > { %v1555_v17 = vpop.permute.xlu1 %1554 }
 0x38b   : > { %1683 = vst.msk [vmem:[#allocation4 + $0x5f] sm:$0xfe] %vm1662_vm3, %v1555_v17  ;;  %v1559_v28 = vpop.permute.xlu0 %1558 }
 0x38c   : > { %1685 = vst.msk [vmem:[#allocation4 + $0x6f] sm:$0x1] %vm1666_vm4, %v1559_v28  ;;  %1733 = vrot.lane.b32.xlu2 %v5145_v29, %s4829_s17 }
 0x38e   : > { %v1569_v58 = vpop.permute.xlu2 %1568 }
 0x38f   : > { %1690 = vst.msk [vmem:[#allocation4 + $0x87] sm:$0xff] %vm1664_vm2, %v1569_v58 }
 0x390   : > { %1743 = vrot.lane.b32.xlu1 %v5161_v33, %s4829_s17 }
 0x391   : > { %1747 = vrot.lane.b32.xlu0 %v5883_v30, %s4829_s17 }
 0x392   : > { %v1561_v20 = vpop.permute.xlu1 %1560 }
 0x393   : > { %1686 = vst.msk [vmem:[#allocation4 + $0x6f] sm:$0xfe] %vm1662_vm3, %v1561_v20  ;;  %v1565_v31 = vpop.permute.xlu0 %1564 }
 0x394   : > { %1688 = vst.msk [vmem:[#allocation4 + $0x7f] sm:$0x1] %vm1666_vm4, %v1565_v31  ;;  %1739 = vrot.lane.b32.xlu2 %v5157_v32, %s4829_s17 }
 0x396   : > { %v1575_v25 = vpop.permute.xlu2 %1574 }
 0x397   : > { %1693 = vst.msk [vmem:[#allocation4 + $0x97] sm:$0xff] %vm1664_vm2, %v1575_v25 }
 0x398   : > { %1749 = vrot.lane.b32.xlu1 %v5174_v36, %s4829_s17 }
 0x399   : > { %1753 = vrot.lane.b32.xlu0 %v5894_v41, %s4829_s17 }
 0x39a   : > { %v1567_v29 = vpop.permute.xlu1 %1566 }
 0x39b   : > { %1689 = vst.msk [vmem:[#allocation4 + $0x7f] sm:$0xfe] %vm1662_vm3, %v1567_v29  ;;  %v1571_v33 = vpop.permute.xlu0 %1570 }
 0x39c   : > { %1691 = vst.msk [vmem:[#allocation4 + $0x8f] sm:$0x1] %vm1666_vm4, %v1571_v33  ;;  %1745 = vrot.lane.b32.xlu2 %v5170_v35, %s4829_s17 }
 0x39e   : > { %v1581_v30 = vpop.permute.xlu2 %1580 }
 0x39f   : > { %1696 = vst.msk [vmem:[#allocation4 + $0xa7] sm:$0xff] %vm1664_vm2, %v1581_v30 }
 0x3a0   : > { %1755 = vrot.lane.b32.xlu1 %v5205_v42, %s4829_s17 }
 0x3a1   : > { %1759 = vrot.lane.b32.xlu0 %v5905_v24, %s4829_s17 }
 0x3a2   : > { %v1573_v32 = vpop.permute.xlu1 %1572 }
 0x3a3   : > { %1692 = vst.msk [vmem:[#allocation4 + $0x8f] sm:$0xfe] %vm1662_vm3, %v1573_v32  ;;  %v1577_v36 = vpop.permute.xlu0 %1576 }
 0x3a4   : > { %1694 = vst.msk [vmem:[#allocation4 + $0x9f] sm:$0x1] %vm1666_vm4, %v1577_v36  ;;  %1751 = vrot.lane.b32.xlu2 %v5198_v40, %s4829_s17 }
 0x3a6   : > { %v1587_v41 = vpop.permute.xlu2 %1586 }
 0x3a7   : > { %1699 = vst.msk [vmem:[#allocation4 + $0xb7] sm:$0xff] %vm1664_vm2, %v1587_v41 }
 0x3a8   : > { %1761 = vrot.lane.b32.xlu1 %v5228_v46, %s4829_s17 }
 0x3a9   : > { %1765 = vrot.lane.b32.xlu0 %v5916_v63, %s4829_s17  ;;  %v260_v63 = vld [vmem:[%s8198_s1 + $0x20] sm:$0xf] }
 0x3aa   : > { %v1579_v35 = vpop.permute.xlu1 %1578  ;;  %4545 = vmatpush.msk.msra.mxu0 %vm2038_vm5, %v260_v63  ;;  %4650 = vmatpush.msk.msra.mxu3 %vm2038_vm5, %v260_v63 }
 0x3ab   : > { %1695 = vst.msk [vmem:[#allocation4 + $0x9f] sm:$0xfe] %vm1662_vm3, %v1579_v35  ;;  %v1583_v42 = vpop.permute.xlu0 %1582 }
 0x3ac   : > { %1697 = vst.msk [vmem:[#allocation4 + $0xaf] sm:$0x1] %vm1666_vm4, %v1583_v42  ;;  %1757 = vrot.lane.b32.xlu2 %v5216_v44, %s4829_s17 }
 0x3ae   : > { %v1593_v24 = vpop.permute.xlu2 %1592 }
 0x3af   : > { %1702 = vst.msk [vmem:[#allocation4 + $0xc7] sm:$0xff] %vm1664_vm2, %v1593_v24 }
 0x3b0   : > { %1767 = vrot.lane.b32.xlu1 %v5257_v52, %s4829_s17 }
 0x3b1   : > { %1771 = vrot.lane.b32.xlu0 %v5927_v57, %s4829_s17 }
 0x3b2   : > { %v1585_v40 = vpop.permute.xlu1 %1584 }
 0x3b3   : > { %1698 = vst.msk [vmem:[#allocation4 + $0xaf] sm:$0xfe] %vm1662_vm3, %v1585_v40  ;;  %v1589_v46 = vpop.permute.xlu0 %1588 }
 0x3b4   : > { %1700 = vst.msk [vmem:[#allocation4 + $0xbf] sm:$0x1] %vm1666_vm4, %v1589_v46  ;;  %1763 = vrot.lane.b32.xlu2 %v5246_v50, %s4829_s17  ;;  %v259_v50 = vld [vmem:[%s8198_s1 + $0x18] sm:$0xff] }
 0x3b5   : > { %2054 = vmatpush.msra.mxu0 %v259_v50  ;;  %4651 = vmatpush.msra.mxu3 %v259_v50 }
 0x3b6   : > { %v1599_v44 = vpop.permute.xlu2 %1598 }
 0x3b7   : > { %1705 = vst.msk [vmem:[#allocation4 + $0xd7] sm:$0xff] %vm1664_vm2, %v1599_v44  ;;  %2055 = vmatpush.msra.mxu0 %v258_v16  ;;  %4652 = vmatpush.msra.mxu3 %v258_v16 }
 0x3b8   : > { %1773 = vrot.lane.b32.xlu1 %v5280_v56, %s4829_s17  ;;  %v257_v56 = vld [vmem:[%s8198_s1 + $0x8] sm:$0xff] }
 0x3b9   : > { %1777 = vrot.lane.b32.xlu0 %v5938_v59, %s4829_s17  ;;  %2056 = vmatpush.msra.mxu0 %v257_v56 }
 0x3ba   : > { %v1591_v52 = vpop.permute.xlu1 %1590  ;;  %4653 = vmatpush.msra.mxu3 %v257_v56  ;;  %v8249_v56 = vmov 0.0  }
 0x3bb   : > { %1701 = vst.msk [vmem:[#allocation4 + $0xbf] sm:$0xfe] %vm1662_vm3, %v1591_v52  ;;  %v1595_v57 = vpop.permute.xlu0 %1594  ;;  %2057 = vmatpush.msra.mxu0 %v256_v34 }
 0x3bc   : > { %1703 = vst.msk [vmem:[#allocation4 + $0xcf] sm:$0x1] %vm1666_vm4, %v1595_v57  ;;  %1769 = vrot.lane.b32.xlu2 %v5268_v54, %s4829_s17  ;;  %4654 = vmatpush.msra.mxu3 %v256_v34 }
 0x3bd   : > { %2229 = vst.msk [vmem:[#allocation3] sm:$0xff] %vm2228_vm10, %v8249_v56 }
 0x3be   : > { %v1605_v59 = vpop.permute.xlu2 %1604  ;;  %2230 = vst.msk [vmem:[#allocation3 + $0x8] sm:$0xff] %vm2228_vm10, %v8249_v56 }
 0x3bf   : > { %1708 = vst.msk [vmem:[#allocation4 + $0xe7] sm:$0xff] %vm1664_vm2, %v1605_v59 }
 0x3c0   : > { %1779 = vrot.lane.b32.xlu1 %v5309_v62, %s4829_s17  ;;  %2234 = vst.msk [vmem:[#allocation3 + $0x198] sm:$0xff] %vm2228_vm10, %v8249_v56 }
 0x3c1   : > { %1783 = vrot.lane.b32.xlu0 %v5949_v3, %s4829_s17  ;;  %2235 = vst.msk [vmem:[#allocation3 + $0x1a0] sm:$0xff] %vm2228_vm10, %v8249_v56 }
 0x3c2   : > { %v1597_v54 = vpop.permute.xlu1 %1596  ;;  %2238 = vst.msk [vmem:[#allocation3] sm:$0x1] %vm2237_vm11, %v8249_v56 }
 0x3c3   : > { %1704 = vst.msk [vmem:[#allocation4 + $0xcf] sm:$0xfe] %vm1662_vm3, %v1597_v54  ;;  %v1601_v45 = vpop.permute.xlu0 %1600 }
 0x3c4   : > { %1706 = vst.msk [vmem:[#allocation4 + $0xdf] sm:$0x1] %vm1666_vm4, %v1601_v45  ;;  %1775 = vrot.lane.b32.xlu2 %v5298_v60, %s4829_s17 }
 0x3c5   : > { %2239 = vst.msk [vmem:[#allocation3 + $0x18] sm:$0x1] %vm2237_vm11, %v8249_v56 }
 0x3c6   : > { %v1611_v13 = vpop.permute.xlu2 %1610  ;;  %2240 = vst.msk [vmem:[#allocation3 + $0x30] sm:$0x1] %vm2237_vm11, %v8249_v56 }
 0x3c7   : > { %1711 = vst.msk [vmem:[#allocation4 + $0xf7] sm:$0xff] %vm1664_vm2, %v1611_v13  ;;  %vm2780_vm2 = vcmask 195714  }
 0x3c8   : > { %1785 = vrot.lane.b32.xlu1 %v5332_v61, %s4829_s17  ;;  %2241 = vst.msk [vmem:[#allocation3 + $0x48] sm:$0x1] %vm2237_vm11, %v8249_v56 }
 0x3c9   : > { %1789 = vrot.lane.b32.xlu0 %v5960_v55, %s4829_s17  ;;  %v6450_v13 = vld [vmem:[#allocation3] sm:$0xff]  ;;  %2242 = vst.msk [vmem:[#allocation3 + $0x60] sm:$0x1] %vm2237_vm11, %v8249_v56 }
 0x3ca   : > { %v1603_v62 = vpop.permute.xlu1 %1602  ;;  %2361 = vst.msk [vmem:[#allocation5] sm:$0xff] %vm2228_vm10, %v6450_v13 }
 0x3cb   : > { %1707 = vst.msk [vmem:[#allocation4 + $0xdf] sm:$0xfe] %vm1662_vm3, %v1603_v62  ;;  %v1607_v3 = vpop.permute.xlu0 %1606 }
 0x3cc   : > { %1709 = vst.msk [vmem:[#allocation4 + $0xef] sm:$0x1] %vm1666_vm4, %v1607_v3  ;;  %1781 = vrot.lane.b32.xlu2 %v5320_v0, %s4829_s17  ;;  %v4735_v0 = vld [vmem:[#allocation2 + $0x190] sm:$0x3]  ;;  %v6467_v3 = vld [vmem:[#allocation3 + $0x8] sm:$0xff] }
 0x3cd   : > { %2243 = vst.msk [vmem:[#allocation3 + $0x78] sm:$0x1] %vm2237_vm11, %v8249_v56 }
 0x3ce   : > { %v1716_v60 = vpop.permute.xlu2 %1715  ;;  %2244 = vst.msk [vmem:[#allocation3 + $0x90] sm:$0x1] %vm2237_vm11, %v8249_v56 }
 0x3cf   : > { %1860 = vst.msk [vmem:[#allocation4 + $0x6] sm:$0xff] %vm1859_vm6, %v1716_v60 }
 0x3d0   : > { %1791 = vrot.lane.b32.xlu1 %v5360_v47, %s4829_s17  ;;  %2245 = vst.msk [vmem:[#allocation3 + $0xa8] sm:$0x1] %vm2237_vm11, %v8249_v56 }
 0x3d1   : > { %1795 = vrot.lane.b32.xlu0 %v5971_v38, %s4829_s17  ;;  %2246 = vst.msk [vmem:[#allocation3 + $0xc0] sm:$0x1] %vm2237_vm11, %v8249_v56 }
 0x3d2   : > { %v1609_v61 = vpop.permute.xlu1 %1608  ;;  %2247 = vst.msk [vmem:[#allocation3 + $0xd8] sm:$0x1] %vm2237_vm11, %v8249_v56 }
 0x3d3   : > { %1710 = vst.msk [vmem:[#allocation4 + $0xef] sm:$0xfe] %vm1662_vm3, %v1609_v61  ;;  %v1613_v55 = vpop.permute.xlu0 %1612  ;;  %vm2784_vm3 = vcmask 189568  }
 0x3d4   : > { %1712 = vst.msk [vmem:[#allocation4 + $0xff] sm:$0x1] %vm1666_vm4, %v1613_v55  ;;  %1787 = vrot.lane.b32.xlu2 %v5350_v48, %s4829_s17  ;;  %v223_v55 = vld [vmem:[%s8201_s4] sm:$0x7]  ;;  %vm2929_vm4 = vcmask 261312  }
 0x3d5   : > { %2248 = vst.msk [vmem:[#allocation3 + $0xf0] sm:$0x1] %vm2237_vm11, %v8249_v56 }
 0x3d6   : > { %v1722_v1 = vpop.permute.xlu2 %1721  ;;  %2249 = vst.msk [vmem:[#allocation3 + $0x108] sm:$0x1] %vm2237_vm11, %v8249_v56 }
 0x3d7   : > { %1864 = vst.msk [vmem:[#allocation4 + $0x16] sm:$0xff] %vm1859_vm6, %v1722_v1 }
 0x3d8   : > { %1797 = vrot.lane.b32.xlu1 %v6211_v49, %s4829_s17  ;;  %2250 = vst.msk [vmem:[#allocation3 + $0x120] sm:$0x1] %vm2237_vm11, %v8249_v56 }
 0x3d9   : > { %1801 = vrot.lane.b32.xlu0 %v4735_v0, %s4829_s17  ;;  %2251 = vst.msk [vmem:[#allocation3 + $0x138] sm:$0x1] %vm2237_vm11, %v8249_v56  ;;  %v6504_v0 = vperm.slane %v223_v55, 0 }
 0x3da   : > { %v1714_v47 = vpop.permute.xlu1 %1713  ;;  %2252 = vst.msk [vmem:[#allocation3 + $0x150] sm:$0x1] %vm2237_vm11, %v8249_v56 }
 0x3db   : > { %1858 = vst.msk [vmem:[#allocation4 - $0x2] sm:$0xfc] %vm1857_vm7, %v1714_v47  ;;  %v1718_v38 = vpop.permute.xlu0 %1717 }
 0x3dc   : > { %1862 = vst.msk [vmem:[#allocation4 + $0xe] sm:$0x3] %vm1861_vm8, %v1718_v38  ;;  %1793 = vrot.lane.b32.xlu2 %v5371_v43, %s4829_s17 }
 0x3dd   : > { %2253 = vst.msk [vmem:[#allocation3 + $0x168] sm:$0x1] %vm2237_vm11, %v8249_v56 }
 0x3de   : > { %v1728_v48 = vpop.permute.xlu2 %1727  ;;  %2254 = vst.msk [vmem:[#allocation3 + $0x180] sm:$0x1] %vm2237_vm11, %v8249_v56 }
 0x3df   : > { %1867 = vst.msk [vmem:[#allocation4 + $0x26] sm:$0xff] %vm1859_vm6, %v1728_v48 }
 0x3e0   : > { %1803 = vrot.lane.b32.xlu1 %v6087_v37, %s4829_s17  ;;  %2255 = vst.msk [vmem:[#allocation3 + $0x198] sm:$0x1] %vm2237_vm11, %v8249_v56 }
 0x3e1   : > { %1807 = vrot.lane.b32.xlu0 %v6221_v39, %s4829_s17  ;;  %2257 = vst.msk [vmem:[#allocation3 + $0x29] sm:$0x1] %vm2237_vm11, %v8249_v56 }
 0x3e2   : > { %v1908_v49 = vld [vmem:[#allocation4] sm:$0xff]  ;;  %v1720_v27 = vpop.permute.xlu1 %1719  ;;  %2258 = vst.msk [vmem:[#allocation3 + $0x41] sm:$0x1] %vm2237_vm11, %v8249_v56 }
 0x3e3   : > { %4546 = vmatmul.msk.f32.vlgmr.msra.gmra.mxu0 %vm1941_vm9, %v1908_v49  ;;  %v1724_v15 = vpop.permute.xlu0 %1723  ;;  %1863 = vst.msk [vmem:[#allocation4 + $0xe] sm:$0xfc] %vm1857_vm7, %v1720_v27  ;;  %v1909_v2 = vld [vmem:[#allocation4 + $0x8] sm:$0xff] }
 0x3e4   : > { %1865 = vst.msk [vmem:[#allocation4 + $0x1e] sm:$0x3] %vm1861_vm8, %v1724_v15  ;;  %1799 = vrot.lane.b32.xlu2 %v6230_v26, %s4829_s17 }
 0x3e5   : > { %2259 = vst.msk [vmem:[#allocation3 + $0x59] sm:$0x1] %vm2237_vm11, %v8249_v56 }
 0x3e6   : > { %v1734_v43 = vpop.permute.xlu2 %1733  ;;  %2260 = vst.msk [vmem:[#allocation3 + $0x71] sm:$0x1] %vm2237_vm11, %v8249_v56 }
 0x3e7   : > { %1870 = vst.msk [vmem:[#allocation4 + $0x36] sm:$0xff] %vm1859_vm6, %v1734_v43 }
 0x3e8   : > { %2441 = vrot.lane.b32.xlu1 %v6450_v13, %s4823_s11  ;;  %2261 = vst.msk [vmem:[#allocation3 + $0x89] sm:$0x1] %vm2237_vm11, %v8249_v56 }
 0x3e9   : > { %2262 = vst.msk [vmem:[#allocation3 + $0xa1] sm:$0x1] %vm2237_vm11, %v8249_v56 }
 0x3ea   : > { %v1726_v37 = vpop.permute.xlu1 %1725  ;;  %v1910_v51 = vld [vmem:[#allocation4 + $0x10] sm:$0xff]  ;;  %2263 = vst.msk [vmem:[#allocation3 + $0xb9] sm:$0x1] %vm2237_vm11, %v8249_v56 }
 0x3eb   : > { %4547 = vmatmul.msk.f32.gmra.mxu0 %vm1941_vm9, %v1909_v2  ;;  %v1730_v39 = vpop.permute.xlu0 %1729  ;;  %1866 = vst.msk [vmem:[#allocation4 + $0x1e] sm:$0xfc] %vm1857_vm7, %v1726_v37  ;;  %v1911_v53 = vld [vmem:[#allocation4 + $0x18] sm:$0xff] }
 0x3ec   : > { %1868 = vst.msk [vmem:[#allocation4 + $0x2e] sm:$0x3] %vm1861_vm8, %v1730_v39  ;;  %1805 = vrot.lane.b32.xlu2 %v6071_v12, %s4829_s17 }
 0x3ed   : > { %2264 = vst.msk [vmem:[#allocation3 + $0xd1] sm:$0x1] %vm2237_vm11, %v8249_v56 }
 0x3ee   : > { %v1740_v18 = vpop.permute.xlu2 %1739  ;;  %2265 = vst.msk [vmem:[#allocation3 + $0xe9] sm:$0x1] %vm2237_vm11, %v8249_v56 }
 0x3ef   : > { %1873 = vst.msk [vmem:[#allocation4 + $0x46] sm:$0xff] %vm1859_vm6, %v1740_v18 }
 0x3f0   : > { %2266 = vst.msk [vmem:[#allocation3 + $0x101] sm:$0x1] %vm2237_vm11, %v8249_v56 }
 0x3f1   : > { %2267 = vst.msk [vmem:[#allocation3 + $0x119] sm:$0x1] %vm2237_vm11, %v8249_v56 }
 0x3f2   : > { %v1732_v14 = vpop.permute.xlu1 %1731  ;;  %v1912_v12 = vld [vmem:[#allocation4 + $0x20] sm:$0xff]  ;;  %2268 = vst.msk [vmem:[#allocation3 + $0x131] sm:$0x1] %vm2237_vm11, %v8249_v56 }
 0x3f3   : > { %4548 = vmatmul.msk.f32.gmra.mxu0 %vm1941_vm9, %v1910_v51  ;;  %v1736_v26 = vpop.permute.xlu0 %1735  ;;  %1869 = vst.msk [vmem:[#allocation4 + $0x2e] sm:$0xfc] %vm1857_vm7, %v1732_v14  ;;  %v1913_v25 = vld [vmem:[#allocation4 + $0x28] sm:$0xff] }
 0x3f4   : > { %1871 = vst.msk [vmem:[#allocation4 + $0x3e] sm:$0x3] %vm1861_vm8, %v1736_v26  ;;  %2443 = vrot.lane.b32.xlu2 %v6467_v3, %s4823_s11 }
 0x3f5   : > { %2269 = vst.msk [vmem:[#allocation3 + $0x149] sm:$0x1] %vm2237_vm11, %v8249_v56 }
 0x3f6   : > { %v1746_v58 = vpop.permute.xlu2 %1745  ;;  %2270 = vst.msk [vmem:[#allocation3 + $0x161] sm:$0x1] %vm2237_vm11, %v8249_v56 }
 0x3f7   : > { %1876 = vst.msk [vmem:[#allocation4 + $0x56] sm:$0xff] %vm1859_vm6, %v1746_v58 }
 0x3f8   : > { %2271 = vst.msk [vmem:[#allocation3 + $0x179] sm:$0x1] %vm2237_vm11, %v8249_v56 }
 0x3f9   : > { %2272 = vst.msk [vmem:[#allocation3 + $0x191] sm:$0x1] %vm2237_vm11, %v8249_v56 }
 0x3fa   : > { %v1738_v17 = vpop.permute.xlu1 %1737  ;;  %v1914_v29 = vld [vmem:[#allocation4 + $0x30] sm:$0xff]  ;;  %2362 = vst.msk [vmem:[#allocation5 + $0x8] sm:$0xff] %vm2228_vm10, %v6467_v3 }
 0x3fb   : > { %4549 = vmatmul.msk.f32.gmra.mxu0 %vm1941_vm9, %v1911_v53  ;;  %v1742_v28 = vpop.permute.xlu0 %1741  ;;  %1872 = vst.msk [vmem:[#allocation4 + $0x3e] sm:$0xfc] %vm1857_vm7, %v1738_v17  ;;  %v1915_v36 = vld [vmem:[#allocation4 + $0x38] sm:$0xff] }
 0x3fc   : > { %1874 = vst.msk [vmem:[#allocation4 + $0x4e] sm:$0x3] %vm1861_vm8, %v1742_v28 }
 0x3fd   : > { %2232 = vst.msk [vmem:[#allocation3 + $0x10] sm:$0x3] %vm2231_vm12, %v8249_v56 }
 0x3fe   : > { %v1752_v33 = vpop.permute.xlu2 %1751  ;;  %2256 = vst.msk [vmem:[#allocation3 + $0x11] sm:$0x1] %vm2237_vm11, %v8249_v56 }
 0x3ff   : > { %1879 = vst.msk [vmem:[#allocation4 + $0x66] sm:$0xff] %vm1859_vm6, %v1752_v33 }
 0x400   : > { %2236 = vst.msk [vmem:[#allocation3 + $0x1a8] sm:$0x3] %vm2231_vm12, %v8249_v56  ;;  %vm3451_vm12 = vcmask 458112  }
 0x401   : > { %2273 = vst.msk [vmem:[#allocation3 + $0x1a9] sm:$0x1] %vm2237_vm11, %v8249_v56  ;;  %vm3304_vm11 = vcmask 392512  }
 0x402   : > { %v1744_v31 = vpop.permute.xlu1 %1743  ;;  %v1916_v41 = vld [vmem:[#allocation4 + $0x40] sm:$0xff] }
 0x403   : > { %4550 = vmatmul.msk.f32.gmra.mxu0 %vm1941_vm9, %v1912_v12  ;;  %v1748_v20 = vpop.permute.xlu0 %1747  ;;  %1875 = vst.msk [vmem:[#allocation4 + $0x4e] sm:$0xfc] %vm1857_vm7, %v1744_v31  ;;  %v1917_v40 = vld [vmem:[#allocation4 + $0x48] sm:$0xff] }
 0x404   : > { %1877 = vst.msk [vmem:[#allocation4 + $0x5e] sm:$0x3] %vm1861_vm8, %v1748_v20 }
 0x405   : > { %v6555_v33 = vld [vmem:[#allocation3 + $0x10] sm:$0x3] }
 0x406   : > { %v1758_v35 = vpop.permute.xlu2 %1757  ;;  %2445 = vrot.lane.b32.xlu0 %v6555_v33, %s4823_s11 }
 0x407   : > { %1882 = vst.msk [vmem:[#allocation4 + $0x76] sm:$0xff] %vm1859_vm6, %v1758_v35 }
 0x40a   : > { %v1750_v32 = vpop.permute.xlu1 %1749  ;;  %v1918_v46 = vld [vmem:[#allocation4 + $0x50] sm:$0xff] }
 0x40b   : > { %4551 = vmatmul.msk.f32.gmra.mxu0 %vm1941_vm9, %v1913_v25  ;;  %v1754_v30 = vpop.permute.xlu0 %1753  ;;  %1878 = vst.msk [vmem:[#allocation4 + $0x5e] sm:$0xfc] %vm1857_vm7, %v1750_v32  ;;  %v1919_v57 = vld [vmem:[#allocation4 + $0x58] sm:$0xff] }
 0x40c   : > { %1880 = vst.msk [vmem:[#allocation4 + $0x6e] sm:$0x3] %vm1861_vm8, %v1754_v30 }
 0x40e   : > { %v1764_v63 = vpop.permute.xlu2 %1763 }
 0x40f   : > { %1885 = vst.msk [vmem:[#allocation4 + $0x86] sm:$0xff] %vm1859_vm6, %v1764_v63 }
 0x412   : > { %v1756_v24 = vpop.permute.xlu1 %1755  ;;  %v1920_v59 = vld [vmem:[#allocation4 + $0x60] sm:$0xff] }
 0x413   : > { %4552 = vmatmul.msk.f32.gmra.mxu0 %vm1941_vm9, %v1914_v29  ;;  %v1760_v42 = vpop.permute.xlu0 %1759  ;;  %1881 = vst.msk [vmem:[#allocation4 + $0x6e] sm:$0xfc] %vm1857_vm7, %v1756_v24  ;;  %v1921_v62 = vld [vmem:[#allocation4 + $0x68] sm:$0xff] }
 0x414   : > { %1883 = vst.msk [vmem:[#allocation4 + $0x7e] sm:$0x3] %vm1861_vm8, %v1760_v42 }
 0x416   : > { %v1770_v50 = vpop.permute.xlu2 %1769 }
 0x417   : > { %1888 = vst.msk [vmem:[#allocation4 + $0x96] sm:$0xff] %vm1859_vm6, %v1770_v50 }
 0x41a   : > { %v1762_v44 = vpop.permute.xlu1 %1761  ;;  %v1922_v60 = vld [vmem:[#allocation4 + $0x70] sm:$0xff] }
 0x41b   : > { %4553 = vmatmul.msk.f32.gmra.mxu0 %vm1941_vm9, %v1915_v36  ;;  %v1766_v52 = vpop.permute.xlu0 %1765  ;;  %1884 = vst.msk [vmem:[#allocation4 + $0x7e] sm:$0xfc] %vm1857_vm7, %v1762_v44  ;;  %v1923_v61 = vld [vmem:[#allocation4 + $0x78] sm:$0xff] }
 0x41c   : > { %1886 = vst.msk [vmem:[#allocation4 + $0x8e] sm:$0x3] %vm1861_vm8, %v1766_v52 }
 0x41e   : > { %v1776_v34 = vpop.permute.xlu2 %1775 }
 0x41f   : > { %1891 = vst.msk [vmem:[#allocation4 + $0xa6] sm:$0xff] %vm1859_vm6, %v1776_v34 }
 0x422   : > { %v1768_v16 = vpop.permute.xlu1 %1767  ;;  %v1924_v48 = vld [vmem:[#allocation4 + $0x80] sm:$0xff] }
 0x423   : > { %4554 = vmatmul.msk.f32.gmra.mxu0 %vm1941_vm9, %v1916_v41  ;;  %1887 = vst.msk [vmem:[#allocation4 + $0x8e] sm:$0xfc] %vm1857_vm7, %v1768_v16  ;;  %v1772_v54 = vpop.permute.xlu0 %1771  ;;  %v1925_v14 = vld [vmem:[#allocation4 + $0x88] sm:$0xff] }
 0x424   : > { %1889 = vst.msk [vmem:[#allocation4 + $0x9e] sm:$0x3] %vm1861_vm8, %v1772_v54 }
 0x426   : > { %v1782_v47 = vpop.permute.xlu2 %1781 }
 0x427   : > { %1894 = vst.msk [vmem:[#allocation4 + $0xb6] sm:$0xff] %vm1859_vm6, %v1782_v47 }
 0x42a   : > { %v1774_v45 = vpop.permute.xlu1 %1773  ;;  %v1926_v31 = vld [vmem:[#allocation4 + $0x90] sm:$0xff] }
 0x42b   : > { %4555 = vmatmul.msk.f32.gmra.mxu0 %vm1941_vm9, %v1917_v40  ;;  %1890 = vst.msk [vmem:[#allocation4 + $0x9e] sm:$0xfc] %vm1857_vm7, %v1774_v45  ;;  %v1778_v1 = vpop.permute.xlu0 %1777  ;;  %v1927_v24 = vld [vmem:[#allocation4 + $0x98] sm:$0xff] }
 0x42c   : > { %1892 = vst.msk [vmem:[#allocation4 + $0xae] sm:$0x3] %vm1861_vm8, %v1778_v1 }
 0x42e   : > { %v1788_v51 = vpop.permute.xlu2 %1787 }
 0x42f   : > { %1897 = vst.msk [vmem:[#allocation4 + $0xc6] sm:$0xff] %vm1859_vm6, %v1788_v51 }
 0x432   : > { %v1780_v49 = vpop.permute.xlu1 %1779 }
 0x433   : > { %4556 = vmatmul.msk.f32.gmra.mxu0 %vm1941_vm9, %v1918_v46  ;;  %v1784_v2 = vpop.permute.xlu0 %1783  ;;  %1893 = vst.msk [vmem:[#allocation4 + $0xae] sm:$0xfc] %vm1857_vm7, %v1780_v49  ;;  %v1929_v1 = vld [vmem:[#allocation4 + $0xa8] sm:$0xff] }
 0x434   : > { %1895 = vst.msk [vmem:[#allocation4 + $0xbe] sm:$0x3] %vm1861_vm8, %v1784_v2 }
 0x436   : > { %v1794_v20 = vpop.permute.xlu2 %1793 }
 0x437   : > { %1900 = vst.msk [vmem:[#allocation4 + $0xd6] sm:$0xff] %vm1859_vm6, %v1794_v20 }
 0x43a   : > { %v1786_v26 = vpop.permute.xlu1 %1785 }
 0x43b   : > { %4557 = vmatmul.msk.f32.gmra.mxu0 %vm1941_vm9, %v1919_v57  ;;  %v1790_v28 = vpop.permute.xlu0 %1789  ;;  %1896 = vst.msk [vmem:[#allocation4 + $0xbe] sm:$0xfc] %vm1857_vm7, %v1786_v26 }
 0x43c   : > { %1898 = vst.msk [vmem:[#allocation4 + $0xce] sm:$0x3] %vm1861_vm8, %v1790_v28 }
 0x43e   : > { %v1800_v42 = vpop.permute.xlu2 %1799 }
 0x43f   : > { %1903 = vst.msk [vmem:[#allocation4 + $0xe6] sm:$0xff] %vm1859_vm6, %v1800_v42 }
 0x442   : > { %v1792_v25 = vpop.permute.xlu1 %1791  ;;  %v1932_v44 = vld [vmem:[#allocation4 + $0xc0] sm:$0xff] }
 0x443   : > { %4558 = vmatmul.msk.f32.gmra.mxu0 %vm1941_vm9, %v1920_v59  ;;  %v1796_v36 = vpop.permute.xlu0 %1795  ;;  %1899 = vst.msk [vmem:[#allocation4 + $0xce] sm:$0xfc] %vm1857_vm7, %v1792_v25  ;;  %4570 = vmatmul.msk.f32.vlgmr.msra.gmra.mxu3 %vm1941_vm9, %v1932_v44  ;;  %v1928_v59 = vld [vmem:[#allocation4 + $0xa0] sm:$0xff]  ;;  %v1933_v34 = vld [vmem:[#allocation4 + $0xc8] sm:$0xff] }
 0x444   : > { %1901 = vst.msk [vmem:[#allocation4 + $0xde] sm:$0x3] %vm1861_vm8, %v1796_v36 }
 0x446   : > { %v1806_v42 = vpop.permute.xlu2 %1805 }
 0x447   : > { %1906 = vst.msk [vmem:[#allocation4 + $0xf6] sm:$0xff] %vm1859_vm6, %v1806_v42  ;;  %vm3111_vm6 = vcmask 319744  }
 0x44a   : > { %v1798_v40 = vpop.permute.xlu1 %1797  ;;  %v1934_v47 = vld [vmem:[#allocation4 + $0xd0] sm:$0xff] }
 0x44b   : > { %4559 = vmatmul.msk.f32.gmra.mxu0 %vm1941_vm9, %v1921_v62  ;;  %1902 = vst.msk [vmem:[#allocation4 + $0xde] sm:$0xfc] %vm1857_vm7, %v1798_v40  ;;  %v1802_v50 = vpop.permute.xlu0 %1801  ;;  %4571 = vmatmul.msk.f32.gmra.mxu3 %vm1941_vm9, %v1933_v34  ;;  %v1935_v2 = vld [vmem:[#allocation4 + $0xd8] sm:$0xff] }
 0x44c   : > { %1904 = vst.msk [vmem:[#allocation4 + $0xee] sm:$0x3] %vm1861_vm8, %v1802_v50 }
 0x452   : > { %v1936_v28 = vld [vmem:[#allocation4 + $0xe0] sm:$0xff] }
 0x453   : > { %4560 = vmatmul.msk.f32.gmra.mxu0 %vm1941_vm9, %v1922_v60  ;;  %4572 = vmatmul.msk.f32.gmra.mxu3 %vm1941_vm9, %v1934_v47 }
 0x45b   : > { %4561 = vmatmul.msk.f32.gmra.mxu0 %vm1941_vm9, %v1923_v61  ;;  %4573 = vmatmul.msk.f32.gmra.mxu3 %vm1941_vm9, %v1935_v2 }
 0x460   : > { %v2059_v38 = vpop.f32.mrf.mxu0 }
 0x461   : > { %v2060_v27 = vadd.f32 %v2059_v38, %v6504_v0 }
 0x463   : > { %v2155_v15 = vmax.f32 %v2060_v27, 0.0  ;;  %4562 = vmatmul.msk.f32.gmra.mxu0 %vm1941_vm9, %v1924_v48  ;;  %4574 = vmatmul.msk.f32.gmra.mxu3 %vm1941_vm9, %v1936_v28 }
 0x465   : > { %v2187_v43 = vmin.f32 %v2155_v15, 6.0 }
 0x467   : > { %2275 = vst.msk [vmem:[#allocation3 + $0x19] sm:$0xff] %vm2228_vm10, %v2187_v43  ;;  %v1930_v43 = vld [vmem:[#allocation4 + $0xb0] sm:$0xff] }
 0x468   : > { %v2062_v37 = vpop.f32.mrf.mxu0 }
 0x469   : > { %v2063_v39 = vadd.f32 %v2062_v37, %v6504_v0 }
 0x46b   : > { %v2156_v18 = vmax.f32 %v2063_v39, 0.0  ;;  %4563 = vmatmul.msk.f32.gmra.mxu0 %vm1941_vm9, %v1925_v14 }
 0x46d   : > { %v2188_v53 = vmin.f32 %v2156_v18, 6.0 }
 0x46e   : > { %v6541_v17 = vld [vmem:[#allocation3 + $0x18] sm:$0xff] }
 0x46f   : > { %2276 = vst.msk [vmem:[#allocation3 + $0x21] sm:$0xff] %vm2228_vm10, %v2188_v53  ;;  %2447 = vrot.lane.b32.xlu1 %v6541_v17, %s4823_s11  ;;  %v1931_v53 = vld [vmem:[#allocation4 + $0xb8] sm:$0xff] }
 0x470   : > { %v2065_v12 = vpop.f32.mrf.mxu0  ;;  %2363 = vst.msk [vmem:[#allocation5 + $0x10] sm:$0xff] %vm2228_vm10, %v6541_v17 }
 0x471   : > { %v2066_v58 = vadd.f32 %v2065_v12, %v6504_v0 }
 0x473   : > { %v2157_v29 = vmax.f32 %v2066_v58, 0.0  ;;  %4564 = vmatmul.msk.f32.gmra.mxu0 %vm1941_vm9, %v1926_v31 }
 0x475   : > { %v2189_v30 = vmin.f32 %v2157_v29, 6.0  ;;  %v1937_v29 = vld [vmem:[#allocation4 + $0xe8] sm:$0xff] }
 0x476   : > { %v6560_v32 = vld [vmem:[#allocation3 + $0x20] sm:$0xff]  ;;  %v6571_v46 = vld [vmem:[#allocation3 + $0x28] sm:$0x3]  ;;  %4575 = vmatmul.msk.f32.gmra.mxu3 %vm1941_vm9, %v1937_v29 }
 0x477   : > { %2277 = vst.msk [vmem:[#allocation3 + $0x31] sm:$0xff] %vm2228_vm10, %v2189_v30  ;;  %2449 = vrot.lane.b32.xlu2 %v6560_v32, %s4823_s11  ;;  %2451 = vrot.lane.b32.xlu0 %v6571_v46, %s4823_s11 }
 0x478   : > { %2364 = vst.msk [vmem:[#allocation5 + $0x18] sm:$0xff] %vm2228_vm10, %v6560_v32  ;;  %v2068_v41 = vpop.f32.mrf.mxu0 }
 0x479   : > { %v2069_v35 = vadd.f32 %v2068_v41, %v6504_v0 }
 0x47b   : > { %v2158_v63 = vmax.f32 %v2069_v35, 0.0  ;;  %4565 = vmatmul.msk.f32.gmra.mxu0 %vm1941_vm9, %v1927_v24 }
 0x47d   : > { %v2190_v52 = vmin.f32 %v2158_v63, 6.0 }
 0x47e   : > { %v6580_v57 = vld [vmem:[#allocation3 + $0x30] sm:$0xff] }
 0x47f   : > { %2278 = vst.msk [vmem:[#allocation3 + $0x39] sm:$0xff] %vm2228_vm10, %v2190_v52  ;;  %2453 = vrot.lane.b32.xlu1 %v6580_v57, %s4823_s11 }
 0x480   : > { %2365 = vst.msk [vmem:[#allocation5 + $0x20] sm:$0xff] %vm2228_vm10, %v6580_v57  ;;  %v2071_v16 = vpop.f32.mrf.mxu0 }
 0x481   : > { %v2072_v56 = vadd.f32 %v2071_v16, %v6504_v0  ;;  %v2444_v16 = vpop.permute.xlu2 %2443 }
 0x482   : > { %2588 = vst.msk [vmem:[#allocation5 + $0x7] sm:$0xff] %vm2587_vm13, %v2444_v16 }
 0x483   : > { %v2159_v54 = vmax.f32 %v2072_v56, 0.0  ;;  %4566 = vmatmul.msk.f32.gmra.mxu0 %vm1941_vm9, %v1928_v59 }
 0x485   : > { %v2191_v45 = vmin.f32 %v2159_v54, 6.0 }
 0x486   : > { %v6591_v62 = vld [vmem:[#allocation3 + $0x40] sm:$0x3]  ;;  %v6593_v60 = vld [vmem:[#allocation3 + $0x38] sm:$0xff] }
 0x487   : > { %2279 = vst.msk [vmem:[#allocation3 + $0x49] sm:$0xff] %vm2228_vm10, %v2191_v45  ;;  %2457 = vrot.lane.b32.xlu0 %v6591_v62, %s4823_s11  ;;  %2455 = vrot.lane.b32.xlu2 %v6593_v60, %s4823_s11 }
 0x488   : > { %2366 = vst.msk [vmem:[#allocation5 + $0x28] sm:$0xff] %vm2228_vm10, %v6593_v60  ;;  %v2074_v61 = vpop.f32.mrf.mxu0 }
 0x489   : > { %v2075_v55 = vadd.f32 %v2074_v61, %v6504_v0  ;;  %v1804_v61 = vpop.permute.xlu1 %1803 }
 0x48a   : > { %1905 = vst.msk [vmem:[#allocation4 + $0xee] sm:$0xfc] %vm1857_vm7, %v1804_v61  ;;  %vm3107_vm7 = vcmask 326913  }
 0x48b   : > { %v2160_v38 = vmax.f32 %v2075_v55, 0.0  ;;  %4567 = vmatmul.msk.f32.gmra.mxu0 %vm1941_vm9, %v1929_v1 }
 0x48d   : > { %v2192_v48 = vmin.f32 %v2160_v38, 6.0 }
 0x48e   : > { %v6605_v49 = vld [vmem:[#allocation3 + $0x48] sm:$0xff] }
 0x48f   : > { %2280 = vst.msk [vmem:[#allocation3 + $0x51] sm:$0xff] %vm2228_vm10, %v2192_v48  ;;  %2459 = vrot.lane.b32.xlu1 %v6605_v49, %s4823_s11 }
 0x490   : > { %2367 = vst.msk [vmem:[#allocation5 + $0x30] sm:$0xff] %vm2228_vm10, %v6605_v49  ;;  %v2077_v27 = vpop.f32.mrf.mxu0 }
 0x491   : > { %v2078_v15 = vadd.f32 %v2077_v27, %v6504_v0  ;;  %v2442_v2 = vpop.permute.xlu1 %2441 }
 0x492   : > { %2586 = vst.msk [vmem:[#allocation5 - $0x1] sm:$0xfe] %vm2585_vm14, %v2442_v2 }
 0x493   : > { %v2161_v37 = vmax.f32 %v2078_v15, 0.0  ;;  %4568 = vmatmul.msk.f32.gmra.mxu0 %vm1941_vm9, %v1930_v43  ;;  %v1808_v15 = vpop.permute.xlu0 %1807 }
 0x494   : > { %1907 = vst.msk [vmem:[#allocation4 + $0xfe] sm:$0x3] %vm1861_vm8, %v1808_v15  ;;  %vm3109_vm8 = vcmask 326912  }
 0x495   : > { %v2193_v39 = vmin.f32 %v2161_v37, 6.0 }
 0x496   : > { %v6615_v51 = vld [vmem:[#allocation3 + $0x58] sm:$0x3]  ;;  %v6617_v14 = vld [vmem:[#allocation3 + $0x50] sm:$0xff] }
 0x497   : > { %2281 = vst.msk [vmem:[#allocation3 + $0x61] sm:$0xff] %vm2228_vm10, %v2193_v39  ;;  %2463 = vrot.lane.b32.xlu0 %v6615_v51, %s4823_s11  ;;  %2461 = vrot.lane.b32.xlu2 %v6617_v14, %s4823_s11 }
 0x498   : > { %2368 = vst.msk [vmem:[#allocation5 + $0x38] sm:$0xff] %vm2228_vm10, %v6617_v14  ;;  %v2080_v26 = vpop.f32.mrf.mxu0 }
 0x499   : > { %v2081_v18 = vadd.f32 %v2080_v26, %v6504_v0 }
 0x49b   : > { %v2162_v12 = vmax.f32 %v2081_v18, 0.0  ;;  %4569 = vmatmul.msk.f32.gmra.mxu0 %vm1941_vm9, %v1931_v53  ;;  %v2446_v15 = vpop.permute.xlu0 %2445 }
 0x49c   : > { %2590 = vst.msk [vmem:[#allocation5 + $0xf] sm:$0x1] %vm2589_vm15, %v2446_v15 }
 0x49d   : > { %v2194_v58 = vmin.f32 %v2162_v12, 6.0 }
 0x49e   : > { %v6629_v20 = vld [vmem:[#allocation3 + $0x60] sm:$0xff] }
 0x49f   : > { %2282 = vst.msk [vmem:[#allocation3 + $0x69] sm:$0xff] %vm2228_vm10, %v2194_v58  ;;  %2465 = vrot.lane.b32.xlu1 %v6629_v20, %s4823_s11 }
 0x4a0   : > { %2369 = vst.msk [vmem:[#allocation5 + $0x40] sm:$0xff] %vm2228_vm10, %v6629_v20  ;;  %v2083_v31 = vpop.f32.mrf.mxu0 }
 0x4a1   : > { %v2084_v25 = vadd.f32 %v2083_v31, %v6504_v0 }
 0x4a3   : > { %v2163_v30 = vmax.f32 %v2084_v25, 0.0 }
 0x4a5   : > { %v2195_v36 = vmin.f32 %v2163_v30, 6.0 }
 0x4a6   : > { %v6638_v41 = vld [vmem:[#allocation3 + $0x70] sm:$0x3]  ;;  %v6640_v35 = vld [vmem:[#allocation3 + $0x68] sm:$0xff] }
 0x4a7   : > { %2283 = vst.msk [vmem:[#allocation3 + $0x79] sm:$0xff] %vm2228_vm10, %v2195_v36  ;;  %2469 = vrot.lane.b32.xlu0 %v6638_v41, %s4823_s11  ;;  %2467 = vrot.lane.b32.xlu2 %v6640_v35, %s4823_s11 }
 0x4a8   : > { %2370 = vst.msk [vmem:[#allocation5 + $0x48] sm:$0xff] %vm2228_vm10, %v6640_v35  ;;  %v2086_v24 = vpop.f32.mrf.mxu0 }
 0x4a9   : > { %v2087_v40 = vadd.f32 %v2086_v24, %v6504_v0 }
 0x4ab   : > { %v2164_v63 = vmax.f32 %v2087_v40, 0.0 }
 0x4ad   : > { %v2196_v44 = vmin.f32 %v2164_v63, 6.0 }
 0x4ae   : > { %v6651_v52 = vld [vmem:[#allocation3 + $0x78] sm:$0xff] }
 0x4af   : > { %2284 = vst.msk [vmem:[#allocation3 + $0x81] sm:$0xff] %vm2228_vm10, %v2196_v44  ;;  %2471 = vrot.lane.b32.xlu1 %v6651_v52, %s4823_s11 }
 0x4b0   : > { %2371 = vst.msk [vmem:[#allocation5 + $0x50] sm:$0xff] %vm2228_vm10, %v6651_v52  ;;  %v2089_v50 = vpop.f32.mrf.mxu0 }
 0x4b1   : > { %v2090_v56 = vadd.f32 %v2089_v50, %v6504_v0 }
 0x4b3   : > { %v2165_v59 = vmax.f32 %v2090_v56, 0.0 }
 0x4b5   : > { %v2197_v34 = vmin.f32 %v2165_v59, 6.0 }
 0x4b6   : > { %v6660_v54 = vld [vmem:[#allocation3 + $0x88] sm:$0x3]  ;;  %v6662_v45 = vld [vmem:[#allocation3 + $0x80] sm:$0xff] }
 0x4b7   : > { %2285 = vst.msk [vmem:[#allocation3 + $0x91] sm:$0xff] %vm2228_vm10, %v2197_v34  ;;  %2475 = vrot.lane.b32.xlu0 %v6660_v54, %s4823_s11  ;;  %2473 = vrot.lane.b32.xlu2 %v6662_v45, %s4823_s11 }
 0x4b8   : > { %2372 = vst.msk [vmem:[#allocation5 + $0x58] sm:$0xff] %vm2228_vm10, %v6662_v45  ;;  %v2092_v55 = vpop.f32.mrf.mxu0 }
 0x4b9   : > { %v2093_v1 = vadd.f32 %v2092_v55, %v6504_v0 }
 0x4bb   : > { %v2166_v47 = vmax.f32 %v2093_v1, 0.0 }
 0x4bd   : > { %v2198_v38 = vmin.f32 %v2166_v47, 6.0 }
 0x4be   : > { %v6673_v48 = vld [vmem:[#allocation3 + $0x90] sm:$0xff] }
 0x4bf   : > { %2286 = vst.msk [vmem:[#allocation3 + $0x99] sm:$0xff] %vm2228_vm10, %v2198_v38  ;;  %2477 = vrot.lane.b32.xlu1 %v6673_v48, %s4823_s11 }
 0x4c0   : > { %2373 = vst.msk [vmem:[#allocation5 + $0x60] sm:$0xff] %vm2228_vm10, %v6673_v48  ;;  %v2095_v27 = vpop.f32.mrf.mxu0 }
 0x4c1   : > { %v2096_v43 = vadd.f32 %v2095_v27, %v6504_v0 }
 0x4c3   : > { %v2167_v37 = vmax.f32 %v2096_v43, 0.0 }
 0x4c5   : > { %v2199_v39 = vmin.f32 %v2167_v37, 6.0 }
 0x4c6   : > { %v6683_v26 = vld [vmem:[#allocation3 + $0xa0] sm:$0x3]  ;;  %v6685_v18 = vld [vmem:[#allocation3 + $0x98] sm:$0xff] }
 0x4c7   : > { %2287 = vst.msk [vmem:[#allocation3 + $0xa9] sm:$0xff] %vm2228_vm10, %v2199_v39  ;;  %2481 = vrot.lane.b32.xlu0 %v6683_v26, %s4823_s11  ;;  %2479 = vrot.lane.b32.xlu2 %v6685_v18, %s4823_s11 }
 0x4c8   : > { %2374 = vst.msk [vmem:[#allocation5 + $0x68] sm:$0xff] %vm2228_vm10, %v6685_v18  ;;  %v2098_v53 = vpop.f32.mrf.mxu0 }
 0x4c9   : > { %v2099_v28 = vadd.f32 %v2098_v53, %v6504_v0 }
 0x4cb   : > { %v2168_v12 = vmax.f32 %v2099_v28, 0.0 }
 0x4cd   : > { %v2200_v58 = vmin.f32 %v2168_v12, 6.0 }
 0x4ce   : > { %v6695_v31 = vld [vmem:[#allocation3 + $0xa8] sm:$0xff] }
 0x4cf   : > { %2288 = vst.msk [vmem:[#allocation3 + $0xb1] sm:$0xff] %vm2228_vm10, %v2200_v58  ;;  %2483 = vrot.lane.b32.xlu1 %v6695_v31, %s4823_s11 }
 0x4d0   : > { %2375 = vst.msk [vmem:[#allocation5 + $0x70] sm:$0xff] %vm2228_vm10, %v6695_v31  ;;  %v2101_v25 = vpop.f32.mrf.mxu0 }
 0x4d1   : > { %v2102_v29 = vadd.f32 %v2101_v25, %v6504_v0  ;;  %v2450_v30 = vpop.permute.xlu2 %2449 }
 0x4d2   : > { %2592 = vst.msk [vmem:[#allocation5 + $0x17] sm:$0xff] %vm2587_vm13, %v2450_v30 }
 0x4d3   : > { %v2169_v36 = vmax.f32 %v2102_v29, 0.0 }
 0x4d5   : > { %v2201_v42 = vmin.f32 %v2169_v36, 6.0 }
 0x4d6   : > { %v6704_v24 = vld [vmem:[#allocation3 + $0xb8] sm:$0x3]  ;;  %v6706_v40 = vld [vmem:[#allocation3 + $0xb0] sm:$0xff] }
 0x4d7   : > { %2289 = vst.msk [vmem:[#allocation3 + $0xc1] sm:$0xff] %vm2228_vm10, %v2201_v42  ;;  %2487 = vrot.lane.b32.xlu0 %v6704_v24, %s4823_s11  ;;  %2485 = vrot.lane.b32.xlu2 %v6706_v40, %s4823_s11 }
 0x4d8   : > { %2376 = vst.msk [vmem:[#allocation5 + $0x78] sm:$0xff] %vm2228_vm10, %v6706_v40  ;;  %v2104_v63 = vpop.f32.mrf.mxu0 }
 0x4d9   : > { %v2105_v44 = vadd.f32 %v2104_v63, %v6504_v0 }
 0x4db   : > { %v2170_v50 = vmax.f32 %v2105_v44, 0.0 }
 0x4dd   : > { %v2202_v16 = vmin.f32 %v2170_v50, 6.0 }
 0x4de   : > { %v6716_v56 = vld [vmem:[#allocation3 + $0xc0] sm:$0xff] }
 0x4df   : > { %2290 = vst.msk [vmem:[#allocation3 + $0xc9] sm:$0xff] %vm2228_vm10, %v2202_v16  ;;  %2489 = vrot.lane.b32.xlu1 %v6716_v56, %s4823_s11 }
 0x4e0   : > { %2377 = vst.msk [vmem:[#allocation5 + $0x80] sm:$0xff] %vm2228_vm10, %v6716_v56  ;;  %v2107_v59 = vpop.f32.mrf.mxu0 }
 0x4e1   : > { %v2108_v34 = vadd.f32 %v2107_v59, %v6504_v0  ;;  %v2448_v61 = vpop.permute.xlu1 %2447  ;;  %v2456_v55 = vpop.permute.xlu2 %2455 }
 0x4e2   : > { %2591 = vst.msk [vmem:[#allocation5 + $0xf] sm:$0xfe] %vm2585_vm14, %v2448_v61 }
 0x4e3   : > { %v2171_v1 = vmax.f32 %v2108_v34, 0.0  ;;  %2595 = vst.msk [vmem:[#allocation5 + $0x27] sm:$0xff] %vm2587_vm13, %v2456_v55 }
 0x4e5   : > { %v2203_v47 = vmin.f32 %v2171_v1, 6.0  ;;  %v2131_v1 = vpop.f32.mrf.mxu3 }
 0x4e6   : > { %v6726_v38 = vld [vmem:[#allocation3 + $0xd0] sm:$0x3]  ;;  %v6728_v27 = vld [vmem:[#allocation3 + $0xc8] sm:$0xff]  ;;  %v2132_v15 = vadd.f32 %v2131_v1, %v6504_v0 }
 0x4e7   : > { %2291 = vst.msk [vmem:[#allocation3 + $0xd9] sm:$0xff] %vm2228_vm10, %v2203_v47  ;;  %2493 = vrot.lane.b32.xlu0 %v6726_v38, %s4823_s11  ;;  %2491 = vrot.lane.b32.xlu2 %v6728_v27, %s4823_s11 }
 0x4e8   : > { %2378 = vst.msk [vmem:[#allocation5 + $0x88] sm:$0xff] %vm2228_vm10, %v6728_v27  ;;  %v2110_v43 = vpop.f32.mrf.mxu0 }
 0x4e9   : > { %v2111_v2 = vadd.f32 %v2110_v43, %v6504_v0  ;;  %v2452_v28 = vpop.permute.xlu0 %2451 }
 0x4ea   : > { %2593 = vst.msk [vmem:[#allocation5 + $0x1f] sm:$0x1] %vm2589_vm15, %v2452_v28 }
 0x4eb   : > { %v2172_v37 = vmax.f32 %v2111_v2, 0.0 }
 0x4ed   : > { %v2204_v39 = vmin.f32 %v2172_v37, 6.0 }
 0x4ee   : > { %v6739_v53 = vld [vmem:[#allocation3 + $0xd8] sm:$0xff] }
 0x4ef   : > { %2292 = vst.msk [vmem:[#allocation3 + $0xe1] sm:$0xff] %vm2228_vm10, %v2204_v39  ;;  %2495 = vrot.lane.b32.xlu1 %v6739_v53, %s4823_s11  ;;  %v2179_v39 = vmax.f32 %v2132_v15, 0.0 }
 0x4f0   : > { %2379 = vst.msk [vmem:[#allocation5 + $0x90] sm:$0xff] %vm2228_vm10, %v6739_v53  ;;  %v2113_v12 = vpop.f32.mrf.mxu0 }
 0x4f1   : > { %v2114_v58 = vadd.f32 %v2113_v12, %v6504_v0  ;;  %v2462_v25 = vpop.permute.xlu2 %2461  ;;  %v2454_v29 = vpop.permute.xlu1 %2453  ;;  %v2211_v12 = vmin.f32 %v2179_v39, 6.0 }
 0x4f2   : > { %2598 = vst.msk [vmem:[#allocation5 + $0x37] sm:$0xff] %vm2587_vm13, %v2462_v25 }
 0x4f3   : > { %v2173_v30 = vmax.f32 %v2114_v58, 0.0  ;;  %2594 = vst.msk [vmem:[#allocation5 + $0x1f] sm:$0xfe] %vm2585_vm14, %v2454_v29 }
 0x4f4   : > { %2299 = vst.msk [vmem:[#allocation3 + $0x139] sm:$0xff] %vm2228_vm10, %v2211_v12 }
 0x4f5   : > { %v2205_v36 = vmin.f32 %v2173_v30, 6.0  ;;  %v2134_v30 = vpop.f32.mrf.mxu3 }
 0x4f6   : > { %v6750_v42 = vld [vmem:[#allocation3 + $0xe8] sm:$0x3]  ;;  %v6752_v63 = vld [vmem:[#allocation3 + $0xe0] sm:$0xff] }
 0x4f7   : > { %2293 = vst.msk [vmem:[#allocation3 + $0xf1] sm:$0xff] %vm2228_vm10, %v2205_v36  ;;  %2499 = vrot.lane.b32.xlu0 %v6750_v42, %s4823_s11  ;;  %2497 = vrot.lane.b32.xlu2 %v6752_v63, %s4823_s11 }
 0x4f8   : > { %2380 = vst.msk [vmem:[#allocation5 + $0x98] sm:$0xff] %vm2228_vm10, %v6752_v63  ;;  %v2116_v44 = vpop.f32.mrf.mxu0 }
 0x4f9   : > { %v2117_v50 = vadd.f32 %v2116_v44, %v6504_v0  ;;  %v2458_v16 = vpop.permute.xlu0 %2457  ;;  %v2135_v44 = vadd.f32 %v2134_v30, %v6504_v0 }
 0x4fa   : > { %2596 = vst.msk [vmem:[#allocation5 + $0x2f] sm:$0x1] %vm2589_vm15, %v2458_v16 }
 0x4fb   : > { %v2174_v59 = vmax.f32 %v2117_v50, 0.0  ;;  %v6800_v12 = vld [vmem:[#allocation3 + $0x138] sm:$0xff] }
 0x4fc   : > { %2387 = vst.msk [vmem:[#allocation5 + $0xd0] sm:$0xff] %vm2228_vm10, %v6800_v12 }
 0x4fd   : > { %v2206_v34 = vmin.f32 %v2174_v59, 6.0  ;;  %v2180_v59 = vmax.f32 %v2135_v44, 0.0 }
 0x4fe   : > { %v6763_v61 = vld [vmem:[#allocation3 + $0xf0] sm:$0xff] }
 0x4ff   : > { %2294 = vst.msk [vmem:[#allocation3 + $0xf9] sm:$0xff] %vm2228_vm10, %v2206_v34  ;;  %2501 = vrot.lane.b32.xlu1 %v6763_v61, %s4823_s11 }
 0x500   : > { %2381 = vst.msk [vmem:[#allocation5 + $0xa0] sm:$0xff] %vm2228_vm10, %v6763_v61  ;;  %v2119_v55 = vpop.f32.mrf.mxu0 }
 0x501   : > { %v2120_v47 = vadd.f32 %v2119_v55, %v6504_v0  ;;  %v2468_v43 = vpop.permute.xlu2 %2467  ;;  %v2460_v2 = vpop.permute.xlu1 %2459  ;;  %v2212_v55 = vmin.f32 %v2180_v59, 6.0 }
 0x502   : > { %2601 = vst.msk [vmem:[#allocation5 + $0x47] sm:$0xff] %vm2587_vm13, %v2468_v43  ;;  %v2137_v43 = vpop.f32.mrf.mxu3 }
 0x503   : > { %v2175_v37 = vmax.f32 %v2120_v47, 0.0  ;;  %2597 = vst.msk [vmem:[#allocation5 + $0x2f] sm:$0xfe] %vm2585_vm14, %v2460_v2  ;;  %v1938_v47 = vld [vmem:[#allocation4 + $0xf0] sm:$0xff] }
 0x504   : > { %2300 = vst.msk [vmem:[#allocation3 + $0x141] sm:$0xff] %vm2228_vm10, %v2212_v55  ;;  %4576 = vmatmul.msk.f32.gmra.mxu3 %vm1941_vm9, %v1938_v47 }
 0x505   : > { %v2207_v28 = vmin.f32 %v2175_v37, 6.0  ;;  %v2138_v37 = vadd.f32 %v2137_v43, %v6504_v0 }
 0x506   : > { %v6774_v58 = vld [vmem:[#allocation3 + $0x100] sm:$0x3]  ;;  %v6776_v25 = vld [vmem:[#allocation3 + $0xf8] sm:$0xff] }
 0x507   : > { %2295 = vst.msk [vmem:[#allocation3 + $0x109] sm:$0xff] %vm2228_vm10, %v2207_v28  ;;  %2505 = vrot.lane.b32.xlu0 %v6774_v58, %s4823_s11  ;;  %2503 = vrot.lane.b32.xlu2 %v6776_v25, %s4823_s11  ;;  %v2181_v30 = vmax.f32 %v2138_v37, 0.0 }
 0x508   : > { %v2122_v29 = vpop.f32.mrf.mxu0  ;;  %2382 = vst.msk [vmem:[#allocation5 + $0xa8] sm:$0xff] %vm2228_vm10, %v6776_v25 }
 0x509   : > { %v2123_v36 = vadd.f32 %v2122_v29, %v6504_v0  ;;  %v2464_v50 = vpop.permute.xlu0 %2463  ;;  %v2213_v44 = vmin.f32 %v2181_v30, 6.0 }
 0x50a   : > { %2599 = vst.msk [vmem:[#allocation5 + $0x3f] sm:$0x1] %vm2589_vm15, %v2464_v50  ;;  %v1939_v50 = vld [vmem:[#allocation4 + $0xf8] sm:$0xff]  ;;  %v2140_v55 = vpop.f32.mrf.mxu3 }
 0x50b   : > { %v2176_v16 = vmax.f32 %v2123_v36, 0.0  ;;  %2301 = vst.msk [vmem:[#allocation3 + $0x151] sm:$0xff] %vm2228_vm10, %v2213_v44  ;;  %v6816_v47 = vld [vmem:[#allocation3 + $0x140] sm:$0xff]  ;;  %v2141_v43 = vadd.f32 %v2140_v55, %v6504_v0 }
 0x50c   : > { %4577 = vmatmul.msk.f32.gmra.mxu3 %vm1941_vm9, %v1939_v50  ;;  %2388 = vst.msk [vmem:[#allocation5 + $0xd8] sm:$0xff] %vm2228_vm10, %v6816_v47  ;;  %vm3306_vm9 = vcmask 386368  }
 0x50d   : > { %v2208_v34 = vmin.f32 %v2176_v16, 6.0 }
 0x50e   : > { %v6789_v1 = vld [vmem:[#allocation3 + $0x108] sm:$0xff] }
 0x50f   : > { %2296 = vst.msk [vmem:[#allocation3 + $0x111] sm:$0xff] %vm2228_vm10, %v2208_v34  ;;  %2507 = vrot.lane.b32.xlu1 %v6789_v1, %s4823_s11 }
 0x510   : > { %v2125_v15 = vpop.f32.mrf.mxu0  ;;  %2383 = vst.msk [vmem:[#allocation5 + $0xb0] sm:$0xff] %vm2228_vm10, %v6789_v1 }
 0x511   : > { %v2126_v2 = vadd.f32 %v2125_v15, %v6504_v0  ;;  %v2474_v39 = vpop.permute.xlu2 %2473  ;;  %v2466_v28 = vpop.permute.xlu1 %2465 }
 0x512   : > { %2604 = vst.msk [vmem:[#allocation5 + $0x57] sm:$0xff] %vm2587_vm13, %v2474_v39  ;;  %v2182_v39 = vmax.f32 %v2141_v43, 0.0  ;;  %v6835_v55 = vld [vmem:[#allocation3 + $0x150] sm:$0xff] }
 0x513   : > { %v2177_v29 = vmax.f32 %v2126_v2, 0.0  ;;  %2600 = vst.msk [vmem:[#allocation5 + $0x3f] sm:$0xfe] %vm2585_vm14, %v2466_v28 }
 0x514   : > { %2389 = vst.msk [vmem:[#allocation5 + $0xe0] sm:$0xff] %vm2228_vm10, %v6835_v55 }
 0x515   : > { %v2209_v36 = vmin.f32 %v2177_v29, 6.0  ;;  %v2214_v29 = vmin.f32 %v2182_v39, 6.0 }
 0x516   : > { %v6806_v16 = vld [vmem:[#allocation3 + $0x118] sm:$0x3]  ;;  %v6808_v59 = vld [vmem:[#allocation3 + $0x110] sm:$0xff] }
 0x517   : > { %2297 = vst.msk [vmem:[#allocation3 + $0x121] sm:$0xff] %vm2228_vm10, %v2209_v36  ;;  %2511 = vrot.lane.b32.xlu0 %v6806_v16, %s4823_s11  ;;  %2509 = vrot.lane.b32.xlu2 %v6808_v59, %s4823_s11  ;;  %v2143_v36 = vpop.f32.mrf.mxu3 }
 0x518   : > { %v2128_v34 = vpop.f32.mrf.mxu0  ;;  %2384 = vst.msk [vmem:[#allocation5 + $0xb8] sm:$0xff] %vm2228_vm10, %v6808_v59  ;;  %v2144_v44 = vadd.f32 %v2143_v36, %v6504_v0 }
 0x519   : > { %v2129_v15 = vadd.f32 %v2128_v34, %v6504_v0  ;;  %v2470_v2 = vpop.permute.xlu0 %2469  ;;  %2302 = vst.msk [vmem:[#allocation3 + $0x159] sm:$0xff] %vm2228_vm10, %v2214_v29 }
 0x51a   : > { %2602 = vst.msk [vmem:[#allocation5 + $0x4f] sm:$0x1] %vm2589_vm15, %v2470_v2 }
 0x51b   : > { %v2178_v37 = vmax.f32 %v2129_v15, 0.0  ;;  %v2183_v15 = vmax.f32 %v2144_v44, 0.0 }
 0x51d   : > { %v2210_v28 = vmin.f32 %v2178_v37, 6.0  ;;  %v2215_v43 = vmin.f32 %v2183_v15, 6.0 }
 0x51e   : > { %v6826_v30 = vld [vmem:[#allocation3 + $0x120] sm:$0xff] }
 0x51f   : > { %2298 = vst.msk [vmem:[#allocation3 + $0x129] sm:$0xff] %vm2228_vm10, %v2210_v28  ;;  %2513 = vrot.lane.b32.xlu1 %v6826_v30, %s4823_s11  ;;  %v2146_v28 = vpop.f32.mrf.mxu3 }
 0x520   : > { %2385 = vst.msk [vmem:[#allocation5 + $0xc0] sm:$0xff] %vm2228_vm10, %v6826_v30  ;;  %v6850_v39 = vld [vmem:[#allocation3 + $0x158] sm:$0xff]  ;;  %v2147_v29 = vadd.f32 %v2146_v28, %v6504_v0 }
 0x521   : > { %v2480_v50 = vpop.permute.xlu2 %2479  ;;  %v2472_v34 = vpop.permute.xlu1 %2471  ;;  %2303 = vst.msk [vmem:[#allocation3 + $0x169] sm:$0xff] %vm2228_vm10, %v2215_v43 }
 0x522   : > { %2607 = vst.msk [vmem:[#allocation5 + $0x67] sm:$0xff] %vm2587_vm13, %v2480_v50  ;;  %v2184_v44 = vmax.f32 %v2147_v29, 0.0  ;;  %v6875_v29 = vld [vmem:[#allocation3 + $0x160] sm:$0x3] }
 0x523   : > { %2603 = vst.msk [vmem:[#allocation5 + $0x4f] sm:$0xfe] %vm2585_vm14, %v2472_v34  ;;  %v6860_v34 = vld [vmem:[#allocation3 + $0x148] sm:$0x3] }
 0x524   : > { %2390 = vst.msk [vmem:[#allocation5 + $0xe8] sm:$0xff] %vm2228_vm10, %v6850_v39  ;;  %v2216_v50 = vmin.f32 %v2184_v44, 6.0 }
 0x526   : > { %v6841_v2 = vld [vmem:[#allocation3 + $0x130] sm:$0x3]  ;;  %v6843_v37 = vld [vmem:[#allocation3 + $0x128] sm:$0xff]  ;;  %2304 = vst.msk [vmem:[#allocation3 + $0x171] sm:$0xff] %vm2228_vm10, %v2216_v50 }
 0x527   : > { %2517 = vrot.lane.b32.xlu0 %v6841_v2, %s4823_s11  ;;  %2515 = vrot.lane.b32.xlu2 %v6843_v37, %s4823_s11  ;;  %2386 = vst.msk [vmem:[#allocation5 + $0xc8] sm:$0xff] %vm2228_vm10, %v6843_v37 }
 0x528   : > { %2519 = vrot.lane.b32.xlu1 %v6800_v12, %s4823_s11  ;;  %v6862_v15 = vld [vmem:[#allocation3 + $0x168] sm:$0xff] }
 0x529   : > { %v2476_v36 = vpop.permute.xlu0 %2475  ;;  %2391 = vst.msk [vmem:[#allocation5 + $0xf0] sm:$0xff] %vm2228_vm10, %v6862_v15 }
 0x52a   : > { %2605 = vst.msk [vmem:[#allocation5 + $0x5f] sm:$0x1] %vm2589_vm15, %v2476_v36 }
 0x52d   : > { %v6877_v36 = vld [vmem:[#allocation3 + $0x170] sm:$0xff]  ;;  %v6888_v50 = vld [vmem:[#allocation3 + $0x178] sm:$0x3] }
 0x52e   : > { %2392 = vst.msk [vmem:[#allocation5 + $0xf8] sm:$0xff] %vm2228_vm10, %v6877_v36 }
 0x52f   : > { %2523 = vrot.lane.b32.xlu0 %v6860_v34, %s4823_s11  ;;  %2521 = vrot.lane.b32.xlu2 %v6816_v47, %s4823_s11 }
 0x530   : > { %2525 = vrot.lane.b32.xlu1 %v6835_v55, %s4823_s11 }
 0x531   : > { %v2486_v43 = vpop.permute.xlu2 %2485  ;;  %v2478_v28 = vpop.permute.xlu1 %2477 }
 0x532   : > { %2610 = vst.msk [vmem:[#allocation5 + $0x77] sm:$0xff] %vm2587_vm13, %v2486_v43 }
 0x533   : > { %2606 = vst.msk [vmem:[#allocation5 + $0x5f] sm:$0xfe] %vm2585_vm14, %v2478_v28 }
 0x537   : > { %2529 = vrot.lane.b32.xlu0 %v6875_v29, %s4823_s11  ;;  %2527 = vrot.lane.b32.xlu2 %v6850_v39, %s4823_s11 }
 0x538   : > { %2531 = vrot.lane.b32.xlu1 %v6862_v15, %s4823_s11 }
 0x539   : > { %v2482_v44 = vpop.permute.xlu0 %2481 }
 0x53a   : > { %2608 = vst.msk [vmem:[#allocation5 + $0x6f] sm:$0x1] %vm2589_vm15, %v2482_v44 }
 0x53f   : > { %2535 = vrot.lane.b32.xlu0 %v6888_v50, %s4823_s11  ;;  %2533 = vrot.lane.b32.xlu2 %v6877_v36, %s4823_s11 }
 0x540   : > { %2636 = vrot.lane.b32.xlu1 %v6450_v13, %s4825_s13 }
 0x541   : > { %v2492_v43 = vpop.permute.xlu2 %2491  ;;  %v2484_v28 = vpop.permute.xlu1 %2483 }
 0x542   : > { %2613 = vst.msk [vmem:[#allocation5 + $0x87] sm:$0xff] %vm2587_vm13, %v2492_v43 }
 0x543   : > { %2609 = vst.msk [vmem:[#allocation5 + $0x6f] sm:$0xfe] %vm2585_vm14, %v2484_v28 }
 0x547   : > { %2640 = vrot.lane.b32.xlu0 %v6555_v33, %s4825_s13  ;;  %2638 = vrot.lane.b32.xlu2 %v6467_v3, %s4825_s13 }
 0x548   : > { %2642 = vrot.lane.b32.xlu1 %v6541_v17, %s4825_s13 }
 0x549   : > { %v2488_v44 = vpop.permute.xlu0 %2487 }
 0x54a   : > { %2611 = vst.msk [vmem:[#allocation5 + $0x7f] sm:$0x1] %vm2589_vm15, %v2488_v44 }
 0x54f   : > { %2646 = vrot.lane.b32.xlu0 %v6571_v46, %s4825_s13  ;;  %2644 = vrot.lane.b32.xlu2 %v6560_v32, %s4825_s13 }
 0x550   : > { %2648 = vrot.lane.b32.xlu1 %v6580_v57, %s4825_s13 }
 0x551   : > { %v2498_v13 = vpop.permute.xlu2 %2497  ;;  %v2490_v33 = vpop.permute.xlu1 %2489 }
 0x552   : > { %2616 = vst.msk [vmem:[#allocation5 + $0x97] sm:$0xff] %vm2587_vm13, %v2498_v13 }
 0x553   : > { %2612 = vst.msk [vmem:[#allocation5 + $0x7f] sm:$0xfe] %vm2585_vm14, %v2490_v33 }
 0x557   : > { %2652 = vrot.lane.b32.xlu0 %v6591_v62, %s4825_s13  ;;  %2650 = vrot.lane.b32.xlu2 %v6593_v60, %s4825_s13 }
 0x558   : > { %2654 = vrot.lane.b32.xlu1 %v6605_v49, %s4825_s13 }
 0x559   : > { %v2494_v3 = vpop.permute.xlu0 %2493 }
 0x55a   : > { %2614 = vst.msk [vmem:[#allocation5 + $0x8f] sm:$0x1] %vm2589_vm15, %v2494_v3 }
 0x55f   : > { %2658 = vrot.lane.b32.xlu0 %v6615_v51, %s4825_s13  ;;  %2656 = vrot.lane.b32.xlu2 %v6617_v14, %s4825_s13 }
 0x560   : > { %2660 = vrot.lane.b32.xlu1 %v6629_v20, %s4825_s13 }
 0x561   : > { %v2504_v46 = vpop.permute.xlu2 %2503  ;;  %v2496_v62 = vpop.permute.xlu1 %2495 }
 0x562   : > { %2619 = vst.msk [vmem:[#allocation5 + $0xa7] sm:$0xff] %vm2587_vm13, %v2504_v46 }
 0x563   : > { %2615 = vst.msk [vmem:[#allocation5 + $0x8f] sm:$0xfe] %vm2585_vm14, %v2496_v62 }
 0x567   : > { %2664 = vrot.lane.b32.xlu0 %v6638_v41, %s4825_s13  ;;  %2662 = vrot.lane.b32.xlu2 %v6640_v35, %s4825_s13 }
 0x568   : > { %2666 = vrot.lane.b32.xlu1 %v6651_v52, %s4825_s13 }
 0x569   : > { %v2500_v51 = vpop.permute.xlu0 %2499 }
 0x56a   : > { %2617 = vst.msk [vmem:[#allocation5 + $0x9f] sm:$0x1] %vm2589_vm15, %v2500_v51 }
 0x56f   : > { %2670 = vrot.lane.b32.xlu0 %v6660_v54, %s4825_s13  ;;  %2668 = vrot.lane.b32.xlu2 %v6662_v45, %s4825_s13 }
 0x570   : > { %2672 = vrot.lane.b32.xlu1 %v6673_v48, %s4825_s13 }
 0x571   : > { %v2510_v43 = vpop.permute.xlu2 %2509  ;;  %v2502_v41 = vpop.permute.xlu1 %2501 }
 0x572   : > { %2622 = vst.msk [vmem:[#allocation5 + $0xb7] sm:$0xff] %vm2587_vm13, %v2510_v43 }
 0x573   : > { %2618 = vst.msk [vmem:[#allocation5 + $0x9f] sm:$0xfe] %vm2585_vm14, %v2502_v41 }
 0x577   : > { %2676 = vrot.lane.b32.xlu0 %v6683_v26, %s4825_s13  ;;  %2674 = vrot.lane.b32.xlu2 %v6685_v18, %s4825_s13 }
 0x578   : > { %2678 = vrot.lane.b32.xlu1 %v6695_v31, %s4825_s13 }
 0x579   : > { %v2506_v28 = vpop.permute.xlu0 %2505 }
 0x57a   : > { %2620 = vst.msk [vmem:[#allocation5 + $0xaf] sm:$0x1] %vm2589_vm15, %v2506_v28 }
 0x57f   : > { %2682 = vrot.lane.b32.xlu0 %v6704_v24, %s4825_s13  ;;  %2680 = vrot.lane.b32.xlu2 %v6706_v40, %s4825_s13 }
 0x580   : > { %2684 = vrot.lane.b32.xlu1 %v6716_v56, %s4825_s13 }
 0x581   : > { %v2516_v44 = vpop.permute.xlu2 %2515  ;;  %v2508_v13 = vpop.permute.xlu1 %2507 }
 0x582   : > { %2625 = vst.msk [vmem:[#allocation5 + $0xc7] sm:$0xff] %vm2587_vm13, %v2516_v44 }
 0x583   : > { %2621 = vst.msk [vmem:[#allocation5 + $0xaf] sm:$0xfe] %vm2585_vm14, %v2508_v13 }
 0x587   : > { %2688 = vrot.lane.b32.xlu0 %v6726_v38, %s4825_s13  ;;  %2686 = vrot.lane.b32.xlu2 %v6728_v27, %s4825_s13  ;;  %v2149_v51 = vpop.f32.mrf.mxu3 }
 0x588   : > { %2690 = vrot.lane.b32.xlu1 %v6739_v53, %s4825_s13  ;;  %v2150_v43 = vadd.f32 %v2149_v51, %v6504_v0 }
 0x589   : > { %v2512_v33 = vpop.permute.xlu0 %2511  ;;  %v2522_v3 = vpop.permute.xlu2 %2521 }
 0x58a   : > { %2623 = vst.msk [vmem:[#allocation5 + $0xbf] sm:$0x1] %vm2589_vm15, %v2512_v33  ;;  %v2185_v41 = vmax.f32 %v2150_v43, 0.0 }
 0x58b   : > { %2628 = vst.msk [vmem:[#allocation5 + $0xd7] sm:$0xff] %vm2587_vm13, %v2522_v3 }
 0x58c   : > { %v2217_v13 = vmin.f32 %v2185_v41, 6.0 }
 0x58e   : > { %2305 = vst.msk [vmem:[#allocation3 + $0x181] sm:$0xff] %vm2228_vm10, %v2217_v13 }
 0x58f   : > { %2694 = vrot.lane.b32.xlu0 %v6750_v42, %s4825_s13  ;;  %2692 = vrot.lane.b32.xlu2 %v6752_v63, %s4825_s13  ;;  %v2152_v3 = vpop.f32.mrf.mxu3 }
 0x590   : > { %2696 = vrot.lane.b32.xlu1 %v6763_v61, %s4825_s13 }
 0x591   : > { %v2528_v46 = vpop.permute.xlu2 %2527  ;;  %v2514_v62 = vpop.permute.xlu1 %2513 }
 0x592   : > { %2631 = vst.msk [vmem:[#allocation5 + $0xe7] sm:$0xff] %vm2587_vm13, %v2528_v46  ;;  %v2153_v46 = vadd.f32 %v2152_v3, %v6504_v0 }
 0x593   : > { %2624 = vst.msk [vmem:[#allocation5 + $0xbf] sm:$0xfe] %vm2585_vm14, %v2514_v62 }
 0x594   : > { %v2186_v62 = vmax.f32 %v2153_v46, 0.0 }
 0x596   : > { %v2218_v41 = vmin.f32 %v2186_v62, 6.0 }
 0x597   : > { %2700 = vrot.lane.b32.xlu0 %v6774_v58, %s4825_s13  ;;  %2698 = vrot.lane.b32.xlu2 %v6776_v25, %s4825_s13 }
 0x598   : > { %2702 = vrot.lane.b32.xlu1 %v6789_v1, %s4825_s13  ;;  %2306 = vst.msk [vmem:[#allocation3 + $0x189] sm:$0xff] %vm2228_vm10, %v2218_v41  ;;  %vm3302_vm10 = vcmask 392514  }
 0x599   : > { %v2518_v28 = vpop.permute.xlu0 %2517  ;;  %v2534_v44 = vpop.permute.xlu2 %2533 }
 0x59a   : > { %2626 = vst.msk [vmem:[#allocation5 + $0xcf] sm:$0x1] %vm2589_vm15, %v2518_v28  ;;  %v2520_v33 = vpop.permute.xlu1 %2519 }
 0x59b   : > { %2634 = vst.msk [vmem:[#allocation5 + $0xf7] sm:$0xff] %vm2587_vm13, %v2534_v44  ;;  %vm3629_vm13 = vcmask 523713  }
 0x59c   : > { %2627 = vst.msk [vmem:[#allocation5 + $0xcf] sm:$0xfe] %vm2585_vm14, %v2520_v33 }
 0x59f   : > { %2706 = vrot.lane.b32.xlu0 %v6806_v16, %s4825_s13  ;;  %2704 = vrot.lane.b32.xlu2 %v6808_v59, %s4825_s13 }
 0x5a0   : > { %2708 = vrot.lane.b32.xlu1 %v6826_v30, %s4825_s13 }
 0x5a1   : > { %v2524_v51 = vpop.permute.xlu0 %2523  ;;  %v2639_v43 = vpop.permute.xlu2 %2638 }
 0x5a2   : > { %2629 = vst.msk [vmem:[#allocation5 + $0xdf] sm:$0x1] %vm2589_vm15, %v2524_v51  ;;  %v2526_v28 = vpop.permute.xlu1 %2525 }
 0x5a3   : > { %2783 = vst.msk [vmem:[#allocation5 + $0x6] sm:$0xff] %vm2782_vm1, %v2639_v43 }
 0x5a4   : > { %2630 = vst.msk [vmem:[#allocation5 + $0xdf] sm:$0xfe] %vm2585_vm14, %v2526_v28 }
 0x5a7   : > { %2712 = vrot.lane.b32.xlu0 %v6841_v2, %s4825_s13  ;;  %2710 = vrot.lane.b32.xlu2 %v6843_v37, %s4825_s13 }
 0x5a8   : > { %2714 = vrot.lane.b32.xlu1 %v6800_v12, %s4825_s13 }
 0x5a9   : > { %v2530_v0 = vpop.permute.xlu0 %2529  ;;  %v2645_v44 = vpop.permute.xlu2 %2644 }
 0x5aa   : > { %2632 = vst.msk [vmem:[#allocation5 + $0xef] sm:$0x1] %vm2589_vm15, %v2530_v0  ;;  %v2532_v13 = vpop.permute.xlu1 %2531 }
 0x5ab   : > { %2787 = vst.msk [vmem:[#allocation5 + $0x16] sm:$0xff] %vm2782_vm1, %v2645_v44 }
 0x5ac   : > { %2633 = vst.msk [vmem:[#allocation5 + $0xef] sm:$0xfe] %vm2585_vm14, %v2532_v13  ;;  %vm3824_vm14 = vcmask 589314  }
 0x5af   : > { %2718 = vrot.lane.b32.xlu0 %v6860_v34, %s4825_s13  ;;  %2716 = vrot.lane.b32.xlu2 %v6816_v47, %s4825_s13 }
 0x5b0   : > { %2720 = vrot.lane.b32.xlu1 %v6835_v55, %s4825_s13 }
 0x5b1   : > { %v2536_v33 = vpop.permute.xlu0 %2535  ;;  %v2651_v3 = vpop.permute.xlu2 %2650 }
 0x5b2   : > { %2635 = vst.msk [vmem:[#allocation5 + $0xff] sm:$0x1] %vm2589_vm15, %v2536_v33  ;;  %v2637_v46 = vpop.permute.xlu1 %2636  ;;  %vm3826_vm15 = vcmask 589312  }
 0x5b3   : > { %2790 = vst.msk [vmem:[#allocation5 + $0x26] sm:$0xff] %vm2782_vm1, %v2651_v3 }
 0x5b4   : > { %2781 = vst.msk [vmem:[#allocation5 - $0x2] sm:$0xfc] %vm2780_vm2, %v2637_v46 }
 0x5b7   : > { %2724 = vrot.lane.b32.xlu0 %v6875_v29, %s4825_s13  ;;  %2722 = vrot.lane.b32.xlu2 %v6850_v39, %s4825_s13 }
 0x5b8   : > { %2726 = vrot.lane.b32.xlu1 %v6862_v15, %s4825_s13 }
 0x5b9   : > { %v2641_v62 = vpop.permute.xlu0 %2640  ;;  %v2657_v51 = vpop.permute.xlu2 %2656 }
 0x5ba   : > { %2785 = vst.msk [vmem:[#allocation5 + $0xe] sm:$0x3] %vm2784_vm3, %v2641_v62  ;;  %v2643_v43 = vpop.permute.xlu1 %2642 }
 0x5bb   : > { %2793 = vst.msk [vmem:[#allocation5 + $0x36] sm:$0xff] %vm2782_vm1, %v2657_v51 }
 0x5bc   : > { %2786 = vst.msk [vmem:[#allocation5 + $0xe] sm:$0xfc] %vm2780_vm2, %v2643_v43 }
 0x5bf   : > { %2730 = vrot.lane.b32.xlu0 %v6888_v50, %s4825_s13  ;;  %2728 = vrot.lane.b32.xlu2 %v6877_v36, %s4825_s13  ;;  %s4830_s13 = smov 40  }
 0x5c0   : > { %2833 = vrot.lane.b32.xlu1 %v6541_v17, %s4827_s15 }
 0x5c1   : > { %v2647_v41 = vpop.permute.xlu0 %2646  ;;  %v2663_v28 = vpop.permute.xlu2 %2662 }
 0x5c2   : > { %2788 = vst.msk [vmem:[#allocation5 + $0x1e] sm:$0x3] %vm2784_vm3, %v2647_v41  ;;  %v2649_v0 = vpop.permute.xlu1 %2648 }
 0x5c3   : > { %2796 = vst.msk [vmem:[#allocation5 + $0x46] sm:$0xff] %vm2782_vm1, %v2663_v28 }
 0x5c4   : > { %2789 = vst.msk [vmem:[#allocation5 + $0x1e] sm:$0xfc] %vm2780_vm2, %v2649_v0 }
 0x5c7   : > { %2835 = vrot.lane.b32.xlu2 %v6560_v32, %s4827_s15  ;;  %2837 = vrot.lane.b32.xlu0 %v6580_v57, %s4827_s15 }
 0x5c8   : > { %2839 = vrot.lane.b32.xlu1 %v6593_v60, %s4827_s15 }
 0x5c9   : > { %v2653_v44 = vpop.permute.xlu0 %2652  ;;  %v2669_v13 = vpop.permute.xlu2 %2668 }
 0x5ca   : > { %2791 = vst.msk [vmem:[#allocation5 + $0x2e] sm:$0x3] %vm2784_vm3, %v2653_v44  ;;  %v2655_v33 = vpop.permute.xlu1 %2654 }
 0x5cb   : > { %2799 = vst.msk [vmem:[#allocation5 + $0x56] sm:$0xff] %vm2782_vm1, %v2669_v13 }
 0x5cc   : > { %2792 = vst.msk [vmem:[#allocation5 + $0x2e] sm:$0xfc] %vm2780_vm2, %v2655_v33 }
 0x5cf   : > { %2841 = vrot.lane.b32.xlu2 %v6605_v49, %s4827_s15  ;;  %2843 = vrot.lane.b32.xlu0 %v6617_v14, %s4827_s15 }
 0x5d0   : > { %2845 = vrot.lane.b32.xlu1 %v6629_v20, %s4827_s15 }
 0x5d1   : > { %v2659_v3 = vpop.permute.xlu0 %2658  ;;  %v2675_v46 = vpop.permute.xlu2 %2674 }
 0x5d2   : > { %2794 = vst.msk [vmem:[#allocation5 + $0x3e] sm:$0x3] %vm2784_vm3, %v2659_v3  ;;  %v2661_v62 = vpop.permute.xlu1 %2660 }
 0x5d3   : > { %2802 = vst.msk [vmem:[#allocation5 + $0x66] sm:$0xff] %vm2782_vm1, %v2675_v46 }
 0x5d4   : > { %2795 = vst.msk [vmem:[#allocation5 + $0x3e] sm:$0xfc] %vm2780_vm2, %v2661_v62 }
 0x5d7   : > { %2847 = vrot.lane.b32.xlu2 %v6640_v35, %s4827_s15  ;;  %2849 = vrot.lane.b32.xlu0 %v6651_v52, %s4827_s15 }
 0x5d8   : > { %2851 = vrot.lane.b32.xlu1 %v6662_v45, %s4827_s15 }
 0x5d9   : > { %v2665_v51 = vpop.permute.xlu0 %2664  ;;  %v2681_v43 = vpop.permute.xlu2 %2680 }
 0x5da   : > { %2797 = vst.msk [vmem:[#allocation5 + $0x4e] sm:$0x3] %vm2784_vm3, %v2665_v51  ;;  %v2667_v41 = vpop.permute.xlu1 %2666 }
 0x5db   : > { %2805 = vst.msk [vmem:[#allocation5 + $0x76] sm:$0xff] %vm2782_vm1, %v2681_v43 }
 0x5dc   : > { %2798 = vst.msk [vmem:[#allocation5 + $0x4e] sm:$0xfc] %vm2780_vm2, %v2667_v41 }
 0x5df   : > { %2853 = vrot.lane.b32.xlu2 %v6673_v48, %s4827_s15  ;;  %2855 = vrot.lane.b32.xlu0 %v6685_v18, %s4827_s15 }
 0x5e0   : > { %2857 = vrot.lane.b32.xlu1 %v6695_v31, %s4827_s15 }
 0x5e1   : > { %v2671_v28 = vpop.permute.xlu0 %2670  ;;  %v2687_v0 = vpop.permute.xlu2 %2686 }
 0x5e2   : > { %2800 = vst.msk [vmem:[#allocation5 + $0x5e] sm:$0x3] %vm2784_vm3, %v2671_v28  ;;  %v2673_v44 = vpop.permute.xlu1 %2672 }
 0x5e3   : > { %2808 = vst.msk [vmem:[#allocation5 + $0x86] sm:$0xff] %vm2782_vm1, %v2687_v0 }
 0x5e4   : > { %2801 = vst.msk [vmem:[#allocation5 + $0x5e] sm:$0xfc] %vm2780_vm2, %v2673_v44 }
 0x5e7   : > { %2859 = vrot.lane.b32.xlu2 %v6706_v40, %s4827_s15  ;;  %2861 = vrot.lane.b32.xlu0 %v6716_v56, %s4827_s15 }
 0x5e8   : > { %2863 = vrot.lane.b32.xlu1 %v6728_v27, %s4827_s15 }
 0x5e9   : > { %v2677_v13 = vpop.permute.xlu0 %2676  ;;  %v2693_v33 = vpop.permute.xlu2 %2692 }
 0x5ea   : > { %2803 = vst.msk [vmem:[#allocation5 + $0x6e] sm:$0x3] %vm2784_vm3, %v2677_v13  ;;  %v2679_v3 = vpop.permute.xlu1 %2678 }
 0x5eb   : > { %2811 = vst.msk [vmem:[#allocation5 + $0x96] sm:$0xff] %vm2782_vm1, %v2693_v33 }
 0x5ec   : > { %2804 = vst.msk [vmem:[#allocation5 + $0x6e] sm:$0xfc] %vm2780_vm2, %v2679_v3 }
 0x5ef   : > { %2865 = vrot.lane.b32.xlu2 %v6739_v53, %s4827_s15  ;;  %2867 = vrot.lane.b32.xlu0 %v6752_v63, %s4827_s15 }
 0x5f0   : > { %2869 = vrot.lane.b32.xlu1 %v6763_v61, %s4827_s15 }
 0x5f1   : > { %v2683_v46 = vpop.permute.xlu0 %2682  ;;  %v2699_v62 = vpop.permute.xlu2 %2698 }
 0x5f2   : > { %2806 = vst.msk [vmem:[#allocation5 + $0x7e] sm:$0x3] %vm2784_vm3, %v2683_v46  ;;  %v2685_v51 = vpop.permute.xlu1 %2684 }
 0x5f3   : > { %2814 = vst.msk [vmem:[#allocation5 + $0xa6] sm:$0xff] %vm2782_vm1, %v2699_v62  ;;  %v7117_v62 = vld [vmem:[#allocation3 + $0x180] sm:$0xff] }
 0x5f4   : > { %2807 = vst.msk [vmem:[#allocation5 + $0x7e] sm:$0xfc] %vm2780_vm2, %v2685_v51 }
 0x5f7   : > { %2871 = vrot.lane.b32.xlu2 %v6776_v25, %s4827_s15  ;;  %2873 = vrot.lane.b32.xlu0 %v6789_v1, %s4827_s15 }
 0x5f8   : > { %2875 = vrot.lane.b32.xlu1 %v6808_v59, %s4827_s15 }
 0x5f9   : > { %v2689_v43 = vpop.permute.xlu0 %2688  ;;  %v2705_v41 = vpop.permute.xlu2 %2704 }
 0x5fa   : > { %2809 = vst.msk [vmem:[#allocation5 + $0x8e] sm:$0x3] %vm2784_vm3, %v2689_v43  ;;  %v2691_v28 = vpop.permute.xlu1 %2690 }
 0x5fb   : > { %2817 = vst.msk [vmem:[#allocation5 + $0xb6] sm:$0xff] %vm2782_vm1, %v2705_v41 }
 0x5fc   : > { %2810 = vst.msk [vmem:[#allocation5 + $0x8e] sm:$0xfc] %vm2780_vm2, %v2691_v28  ;;  %v7124_v28 = vld [vmem:[#allocation3 + $0x188] sm:$0xff] }
 0x5ff   : > { %2877 = vrot.lane.b32.xlu2 %v6826_v30, %s4827_s15  ;;  %2879 = vrot.lane.b32.xlu0 %v6843_v37, %s4827_s15 }
 0x600   : > { %2881 = vrot.lane.b32.xlu1 %v6800_v12, %s4827_s15 }
 0x601   : > { %v2695_v0 = vpop.permute.xlu0 %2694  ;;  %v2711_v44 = vpop.permute.xlu2 %2710 }
 0x602   : > { %2812 = vst.msk [vmem:[#allocation5 + $0x9e] sm:$0x3] %vm2784_vm3, %v2695_v0  ;;  %v2697_v13 = vpop.permute.xlu1 %2696 }
 0x603   : > { %2820 = vst.msk [vmem:[#allocation5 + $0xc6] sm:$0xff] %vm2782_vm1, %v2711_v44 }
 0x604   : > { %2813 = vst.msk [vmem:[#allocation5 + $0x9e] sm:$0xfc] %vm2780_vm2, %v2697_v13 }
 0x607   : > { %2883 = vrot.lane.b32.xlu2 %v6816_v47, %s4827_s15  ;;  %2885 = vrot.lane.b32.xlu0 %v6835_v55, %s4827_s15 }
 0x608   : > { %2887 = vrot.lane.b32.xlu1 %v6850_v39, %s4827_s15 }
 0x609   : > { %v2701_v33 = vpop.permute.xlu0 %2700  ;;  %v2717_v3 = vpop.permute.xlu2 %2716 }
 0x60a   : > { %2815 = vst.msk [vmem:[#allocation5 + $0xae] sm:$0x3] %vm2784_vm3, %v2701_v33  ;;  %v2703_v46 = vpop.permute.xlu1 %2702  ;;  %v7135_v33 = vld [vmem:[#allocation3 + $0x28] sm:$0x3] }
 0x60b   : > { %2823 = vst.msk [vmem:[#allocation5 + $0xd6] sm:$0xff] %vm2782_vm1, %v2717_v3 }
 0x60c   : > { %2816 = vst.msk [vmem:[#allocation5 + $0xae] sm:$0xfc] %vm2780_vm2, %v2703_v46 }
 0x60f   : > { %2889 = vrot.lane.b32.xlu2 %v6862_v15, %s4827_s15  ;;  %2891 = vrot.lane.b32.xlu0 %v6877_v36, %s4827_s15 }
 0x610   : > { %2893 = vrot.lane.b32.xlu1 %v7117_v62, %s4827_s15 }
 0x611   : > { %v2707_v51 = vpop.permute.xlu0 %2706  ;;  %v2723_v43 = vpop.permute.xlu2 %2722 }
 0x612   : > { %2818 = vst.msk [vmem:[#allocation5 + $0xbe] sm:$0x3] %vm2784_vm3, %v2707_v51  ;;  %v2709_v41 = vpop.permute.xlu1 %2708 }
 0x613   : > { %2826 = vst.msk [vmem:[#allocation5 + $0xe6] sm:$0xff] %vm2782_vm1, %v2723_v43  ;;  %v7146_v43 = vld [vmem:[#allocation3 + $0x40] sm:$0x3] }
 0x614   : > { %2819 = vst.msk [vmem:[#allocation5 + $0xbe] sm:$0xfc] %vm2780_vm2, %v2709_v41 }
 0x617   : > { %2895 = vrot.lane.b32.xlu2 %v7124_v28, %s4827_s15  ;;  %2963 = vrot.lane.b32.xlu0 %v6541_v17, %s4829_s17  ;;  %s4831_s15 = smov 48  }
 0x618   : > { %2965 = vrot.lane.b32.xlu1 %v6560_v32, %s4829_s17 }
 0x619   : > { %v2713_v0 = vpop.permute.xlu0 %2712  ;;  %v2729_v44 = vpop.permute.xlu2 %2728 }
 0x61a   : > { %2821 = vst.msk [vmem:[#allocation5 + $0xce] sm:$0x3] %vm2784_vm3, %v2713_v0  ;;  %v2715_v13 = vpop.permute.xlu1 %2714 }
 0x61b   : > { %2829 = vst.msk [vmem:[#allocation5 + $0xf6] sm:$0xff] %vm2782_vm1, %v2729_v44  ;;  %vm3633_vm1 = vcmask 516544  }
 0x61c   : > { %2822 = vst.msk [vmem:[#allocation5 + $0xce] sm:$0xfc] %vm2780_vm2, %v2715_v13  ;;  %v7157_v13 = vld [vmem:[#allocation3 + $0x58] sm:$0x3] }
 0x61f   : > { %2967 = vrot.lane.b32.xlu2 %v7135_v33, %s4829_s17  ;;  %2969 = vrot.lane.b32.xlu0 %v6580_v57, %s4829_s17 }
 0x620   : > { %2971 = vrot.lane.b32.xlu1 %v6593_v60, %s4829_s17 }
 0x621   : > { %v2719_v3 = vpop.permute.xlu0 %2718  ;;  %v2836_v46 = vpop.permute.xlu2 %2835 }
 0x622   : > { %2824 = vst.msk [vmem:[#allocation5 + $0xde] sm:$0x3] %vm2784_vm3, %v2719_v3  ;;  %v2721_v51 = vpop.permute.xlu1 %2720 }
 0x623   : > { %2931 = vst.msk [vmem:[#allocation5 + $0x8] sm:$0xff] %vm2929_vm4, %v2836_v46 }
 0x624   : > { %2825 = vst.msk [vmem:[#allocation5 + $0xde] sm:$0xfc] %vm2780_vm2, %v2721_v51 }
 0x627   : > { %2973 = vrot.lane.b32.xlu2 %v7146_v43, %s4829_s17  ;;  %2975 = vrot.lane.b32.xlu0 %v6605_v49, %s4829_s17 }
 0x628   : > { %2977 = vrot.lane.b32.xlu1 %v6617_v14, %s4829_s17 }
 0x629   : > { %v2725_v41 = vpop.permute.xlu0 %2724  ;;  %v2842_v0 = vpop.permute.xlu2 %2841 }
 0x62a   : > { %2827 = vst.msk [vmem:[#allocation5 + $0xee] sm:$0x3] %vm2784_vm3, %v2725_v41  ;;  %v2727_v44 = vpop.permute.xlu1 %2726  ;;  %v7168_v41 = vld [vmem:[#allocation3 + $0x70] sm:$0x3] }
 0x62b   : > { %2934 = vst.msk [vmem:[#allocation5 + $0x20] sm:$0xff] %vm2929_vm4, %v2842_v0 }
 0x62c   : > { %2828 = vst.msk [vmem:[#allocation5 + $0xee] sm:$0xfc] %vm2780_vm2, %v2727_v44  ;;  %vm3828_vm2 = vcmask 583168  }
 0x62f   : > { %2979 = vrot.lane.b32.xlu2 %v7157_v13, %s4829_s17  ;;  %2981 = vrot.lane.b32.xlu0 %v6629_v20, %s4829_s17 }
 0x630   : > { %2983 = vrot.lane.b32.xlu1 %v6640_v35, %s4829_s17 }
 0x631   : > { %v2731_v3 = vpop.permute.xlu0 %2730  ;;  %v2848_v46 = vpop.permute.xlu2 %2847 }
 0x632   : > { %2830 = vst.msk [vmem:[#allocation5 + $0xfe] sm:$0x3] %vm2784_vm3, %v2731_v3  ;;  %v2834_v51 = vpop.permute.xlu1 %2833  ;;  %vm3908_vm3 = vcmask 588800  }
 0x633   : > { %2937 = vst.msk [vmem:[#allocation5 + $0x38] sm:$0xff] %vm2929_vm4, %v2848_v46 }
 0x634   : > { %2930 = vst.msk [vmem:[#allocation5] sm:$0xff] %vm2929_vm4, %v2834_v51 }
 0x637   : > { %2985 = vrot.lane.b32.xlu2 %v7168_v41, %s4829_s17  ;;  %2987 = vrot.lane.b32.xlu0 %v6651_v52, %s4829_s17 }
 0x638   : > { %2989 = vrot.lane.b32.xlu1 %v6662_v45, %s4829_s17 }
 0x639   : > { %v2854_v0 = vpop.permute.xlu2 %2853  ;;  %v2838_v44 = vpop.permute.xlu0 %2837 }
 0x63a   : > { %2940 = vst.msk [vmem:[#allocation5 + $0x50] sm:$0xff] %vm2929_vm4, %v2854_v0  ;;  %v2840_v3 = vpop.permute.xlu1 %2839 }
 0x63b   : > { %2932 = vst.msk [vmem:[#allocation5 + $0x10] sm:$0xff] %vm2929_vm4, %v2838_v44 }
 0x63c   : > { %2933 = vst.msk [vmem:[#allocation5 + $0x18] sm:$0xff] %vm2929_vm4, %v2840_v3 }
 0x63f   : > { %2991 = vrot.lane.b32.xlu2 %v6660_v54, %s4829_s17  ;;  %2993 = vrot.lane.b32.xlu0 %v6673_v48, %s4829_s17 }
 0x640   : > { %2995 = vrot.lane.b32.xlu1 %v6685_v18, %s4829_s17 }
 0x641   : > { %v2860_v46 = vpop.permute.xlu2 %2859  ;;  %v2844_v51 = vpop.permute.xlu0 %2843 }
 0x642   : > { %2943 = vst.msk [vmem:[#allocation5 + $0x68] sm:$0xff] %vm2929_vm4, %v2860_v46  ;;  %v2846_v23 = vpop.permute.xlu1 %2845 }
 0x643   : > { %2935 = vst.msk [vmem:[#allocation5 + $0x28] sm:$0xff] %vm2929_vm4, %v2844_v51 }
 0x644   : > { %2936 = vst.msk [vmem:[#allocation5 + $0x30] sm:$0xff] %vm2929_vm4, %v2846_v23 }
 0x647   : > { %2997 = vrot.lane.b32.xlu2 %v6683_v26, %s4829_s17  ;;  %2999 = vrot.lane.b32.xlu0 %v6695_v31, %s4829_s17 }
 0x648   : > { %3001 = vrot.lane.b32.xlu1 %v6706_v40, %s4829_s17 }
 0x649   : > { %v2866_v54 = vpop.permute.xlu2 %2865  ;;  %v2850_v0 = vpop.permute.xlu0 %2849 }
 0x64a   : > { %2946 = vst.msk [vmem:[#allocation5 + $0x80] sm:$0xff] %vm2929_vm4, %v2866_v54  ;;  %v2852_v44 = vpop.permute.xlu1 %2851 }
 0x64b   : > { %2938 = vst.msk [vmem:[#allocation5 + $0x40] sm:$0xff] %vm2929_vm4, %v2850_v0 }
 0x64c   : > { %2939 = vst.msk [vmem:[#allocation5 + $0x48] sm:$0xff] %vm2929_vm4, %v2852_v44 }
 0x64f   : > { %3003 = vrot.lane.b32.xlu2 %v6704_v24, %s4829_s17  ;;  %3005 = vrot.lane.b32.xlu0 %v6716_v56, %s4829_s17 }
 0x650   : > { %3007 = vrot.lane.b32.xlu1 %v6728_v27, %s4829_s17 }
 0x651   : > { %v2872_v23 = vpop.permute.xlu2 %2871  ;;  %v2856_v26 = vpop.permute.xlu0 %2855 }
 0x652   : > { %2949 = vst.msk [vmem:[#allocation5 + $0x98] sm:$0xff] %vm2929_vm4, %v2872_v23  ;;  %v2858_v3 = vpop.permute.xlu1 %2857 }
 0x653   : > { %2941 = vst.msk [vmem:[#allocation5 + $0x58] sm:$0xff] %vm2929_vm4, %v2856_v26 }
 0x654   : > { %2942 = vst.msk [vmem:[#allocation5 + $0x60] sm:$0xff] %vm2929_vm4, %v2858_v3 }
 0x657   : > { %3009 = vrot.lane.b32.xlu2 %v6726_v38, %s4829_s17  ;;  %3011 = vrot.lane.b32.xlu0 %v6739_v53, %s4829_s17 }
 0x658   : > { %3013 = vrot.lane.b32.xlu1 %v6752_v63, %s4829_s17 }
 0x659   : > { %v2878_v24 = vpop.permute.xlu2 %2877  ;;  %v2862_v46 = vpop.permute.xlu0 %2861 }
 0x65a   : > { %2952 = vst.msk [vmem:[#allocation5 + $0xb0] sm:$0xff] %vm2929_vm4, %v2878_v24  ;;  %v2864_v51 = vpop.permute.xlu1 %2863 }
 0x65b   : > { %2944 = vst.msk [vmem:[#allocation5 + $0x70] sm:$0xff] %vm2929_vm4, %v2862_v46 }
 0x65c   : > { %2945 = vst.msk [vmem:[#allocation5 + $0x78] sm:$0xff] %vm2929_vm4, %v2864_v51 }
 0x65f   : > { %3015 = vrot.lane.b32.xlu2 %v6750_v42, %s4829_s17  ;;  %3017 = vrot.lane.b32.xlu0 %v6763_v61, %s4829_s17 }
 0x660   : > { %3019 = vrot.lane.b32.xlu1 %v6776_v25, %s4829_s17 }
 0x661   : > { %v2884_v38 = vpop.permute.xlu2 %2883  ;;  %v2868_v54 = vpop.permute.xlu0 %2867 }
 0x662   : > { %2955 = vst.msk [vmem:[#allocation5 + $0xc8] sm:$0xff] %vm2929_vm4, %v2884_v38  ;;  %v2870_v0 = vpop.permute.xlu1 %2869 }
 0x663   : > { %2947 = vst.msk [vmem:[#allocation5 + $0x88] sm:$0xff] %vm2929_vm4, %v2868_v54 }
 0x664   : > { %2948 = vst.msk [vmem:[#allocation5 + $0x90] sm:$0xff] %vm2929_vm4, %v2870_v0 }
 0x667   : > { %3021 = vrot.lane.b32.xlu2 %v6774_v58, %s4829_s17  ;;  %3023 = vrot.lane.b32.xlu0 %v6789_v1, %s4829_s17 }
 0x668   : > { %3025 = vrot.lane.b32.xlu1 %v6808_v59, %s4829_s17 }
 0x669   : > { %v2890_v42 = vpop.permute.xlu2 %2889  ;;  %v2874_v44 = vpop.permute.xlu0 %2873 }
 0x66a   : > { %2958 = vst.msk [vmem:[#allocation5 + $0xe0] sm:$0xff] %vm2929_vm4, %v2890_v42  ;;  %v2876_v23 = vpop.permute.xlu1 %2875 }
 0x66b   : > { %2950 = vst.msk [vmem:[#allocation5 + $0xa0] sm:$0xff] %vm2929_vm4, %v2874_v44 }
 0x66c   : > { %2951 = vst.msk [vmem:[#allocation5 + $0xa8] sm:$0xff] %vm2929_vm4, %v2876_v23  ;;  %v7278_v23 = vld [vmem:[#allocation3 + $0x190] sm:$0x3] }
 0x66f   : > { %3027 = vrot.lane.b32.xlu2 %v6806_v16, %s4829_s17  ;;  %3029 = vrot.lane.b32.xlu0 %v6826_v30, %s4829_s17 }
 0x670   : > { %3031 = vrot.lane.b32.xlu1 %v6843_v37, %s4829_s17 }
 0x671   : > { %v2896_v58 = vpop.permute.xlu2 %2895  ;;  %v2880_v26 = vpop.permute.xlu0 %2879 }
 0x672   : > { %2961 = vst.msk [vmem:[#allocation5 + $0xf8] sm:$0xff] %vm2929_vm4, %v2896_v58  ;;  %v2882_v3 = vpop.permute.xlu1 %2881 }
 0x673   : > { %2953 = vst.msk [vmem:[#allocation5 + $0xb8] sm:$0xff] %vm2929_vm4, %v2880_v26 }
 0x674   : > { %2954 = vst.msk [vmem:[#allocation5 + $0xc0] sm:$0xff] %vm2929_vm4, %v2882_v3 }
 0x677   : > { %3033 = vrot.lane.b32.xlu2 %v6841_v2, %s4829_s17  ;;  %3035 = vrot.lane.b32.xlu0 %v6800_v12, %s4829_s17 }
 0x678   : > { %3037 = vrot.lane.b32.xlu1 %v6816_v47, %s4829_s17 }
 0x679   : > { %v2968_v16 = vpop.permute.xlu2 %2967  ;;  %v2886_v24 = vpop.permute.xlu0 %2885 }
 0x67a   : > { %3112 = vst.msk [vmem:[#allocation5 + $0xf] sm:$0x1] %vm3111_vm6, %v2968_v16  ;;  %v2888_v46 = vpop.permute.xlu1 %2887 }
 0x67b   : > { %2956 = vst.msk [vmem:[#allocation5 + $0xd0] sm:$0xff] %vm2929_vm4, %v2886_v24 }
 0x67c   : > { %2957 = vst.msk [vmem:[#allocation5 + $0xd8] sm:$0xff] %vm2929_vm4, %v2888_v46 }
 0x67f   : > { %3039 = vrot.lane.b32.xlu2 %v6860_v34, %s4829_s17  ;;  %3041 = vrot.lane.b32.xlu0 %v6835_v55, %s4829_s17 }
 0x680   : > { %3043 = vrot.lane.b32.xlu1 %v6850_v39, %s4829_s17 }
 0x681   : > { %v2974_v2 = vpop.permute.xlu2 %2973  ;;  %v2892_v51 = vpop.permute.xlu0 %2891 }
 0x682   : > { %3115 = vst.msk [vmem:[#allocation5 + $0x1f] sm:$0x1] %vm3111_vm6, %v2974_v2  ;;  %v2894_v38 = vpop.permute.xlu1 %2893 }
 0x683   : > { %2959 = vst.msk [vmem:[#allocation5 + $0xe8] sm:$0xff] %vm2929_vm4, %v2892_v51 }
 0x684   : > { %2960 = vst.msk [vmem:[#allocation5 + $0xf0] sm:$0xff] %vm2929_vm4, %v2894_v38 }
 0x687   : > { %3045 = vrot.lane.b32.xlu2 %v6875_v29, %s4829_s17  ;;  %3047 = vrot.lane.b32.xlu0 %v6862_v15, %s4829_s17 }
 0x688   : > { %3049 = vrot.lane.b32.xlu1 %v6877_v36, %s4829_s17 }
 0x689   : > { %v2980_v34 = vpop.permute.xlu2 %2979  ;;  %v2964_v54 = vpop.permute.xlu0 %2963 }
 0x68a   : > { %3118 = vst.msk [vmem:[#allocation5 + $0x2f] sm:$0x1] %vm3111_vm6, %v2980_v34  ;;  %v2966_v0 = vpop.permute.xlu1 %2965 }
 0x68b   : > { %3108 = vst.msk [vmem:[#allocation5 - $0x1] sm:$0xfe] %vm3107_vm7, %v2964_v54 }
 0x68c   : > { %3110 = vst.msk [vmem:[#allocation5 + $0x7] sm:$0xff] %vm3109_vm8, %v2966_v0  ;;  %v7325_v0 = vld [vmem:[#allocation3 + $0x88] sm:$0x3] }
 0x68f   : > { %3051 = vrot.lane.b32.xlu2 %v6888_v50, %s4829_s17  ;;  %3053 = vrot.lane.b32.xlu0 %v7117_v62, %s4829_s17 }
 0x690   : > { %3055 = vrot.lane.b32.xlu1 %v7124_v28, %s4829_s17 }
 0x691   : > { %v2986_v29 = vpop.permute.xlu2 %2985  ;;  %v2970_v42 = vpop.permute.xlu0 %2969 }
 0x692   : > { %3121 = vst.msk [vmem:[#allocation5 + $0x3f] sm:$0x1] %vm3111_vm6, %v2986_v29  ;;  %v2972_v44 = vpop.permute.xlu1 %2971 }
 0x693   : > { %3113 = vst.msk [vmem:[#allocation5 + $0xf] sm:$0xfe] %vm3107_vm7, %v2970_v42 }
 0x694   : > { %3114 = vst.msk [vmem:[#allocation5 + $0x17] sm:$0xff] %vm3109_vm8, %v2972_v44 }
 0x697   : > { %3057 = vrot.lane.b32.xlu2 %v7278_v23, %s4829_s17  ;;  %3158 = vrot.lane.b32.xlu0 %v6541_v17, %s4830_s13 }
 0x698   : > { %3160 = vrot.lane.b32.xlu1 %v6560_v32, %s4830_s13 }
 0x699   : > { %v2992_v50 = vpop.permute.xlu2 %2991  ;;  %v2976_v58 = vpop.permute.xlu0 %2975 }
 0x69a   : > { %3124 = vst.msk [vmem:[#allocation5 + $0x4f] sm:$0x1] %vm3111_vm6, %v2992_v50  ;;  %v2978_v26 = vpop.permute.xlu1 %2977  ;;  %v7336_v50 = vld [vmem:[#allocation3 + $0xa0] sm:$0x3] }
 0x69b   : > { %3116 = vst.msk [vmem:[#allocation5 + $0x1f] sm:$0xfe] %vm3107_vm7, %v2976_v58 }
 0x69c   : > { %3117 = vst.msk [vmem:[#allocation5 + $0x27] sm:$0xff] %vm3109_vm8, %v2978_v26 }
 0x69f   : > { %3162 = vrot.lane.b32.xlu2 %v7135_v33, %s4830_s13  ;;  %3164 = vrot.lane.b32.xlu0 %v6580_v57, %s4830_s13 }
 0x6a0   : > { %3166 = vrot.lane.b32.xlu1 %v6593_v60, %s4830_s13 }
 0x6a1   : > { %v2998_v17 = vpop.permute.xlu2 %2997  ;;  %v2982_v32 = vpop.permute.xlu0 %2981 }
 0x6a2   : > { %3127 = vst.msk [vmem:[#allocation5 + $0x5f] sm:$0x1] %vm3111_vm6, %v2998_v17  ;;  %v2984_v3 = vpop.permute.xlu1 %2983 }
 0x6a3   : > { %3119 = vst.msk [vmem:[#allocation5 + $0x2f] sm:$0xfe] %vm3107_vm7, %v2982_v32  ;;  %v7347_v32 = vld [vmem:[#allocation3 + $0xb8] sm:$0x3] }
 0x6a4   : > { %3120 = vst.msk [vmem:[#allocation5 + $0x37] sm:$0xff] %vm3109_vm8, %v2984_v3 }
 0x6a7   : > { %3168 = vrot.lane.b32.xlu2 %v7146_v43, %s4830_s13  ;;  %3170 = vrot.lane.b32.xlu0 %v6605_v49, %s4830_s13 }
 0x6a8   : > { %3172 = vrot.lane.b32.xlu1 %v6617_v14, %s4830_s13 }
 0x6a9   : > { %v3004_v33 = vpop.permute.xlu2 %3003  ;;  %v2988_v16 = vpop.permute.xlu0 %2987 }
 0x6aa   : > { %3130 = vst.msk [vmem:[#allocation5 + $0x6f] sm:$0x1] %vm3111_vm6, %v3004_v33  ;;  %v2990_v24 = vpop.permute.xlu1 %2989 }
 0x6ab   : > { %3122 = vst.msk [vmem:[#allocation5 + $0x3f] sm:$0xfe] %vm3107_vm7, %v2988_v16 }
 0x6ac   : > { %3123 = vst.msk [vmem:[#allocation5 + $0x47] sm:$0xff] %vm3109_vm8, %v2990_v24  ;;  %v7358_v24 = vld [vmem:[#allocation3 + $0xd0] sm:$0x3] }
 0x6af   : > { %3174 = vrot.lane.b32.xlu2 %v7157_v13, %s4830_s13  ;;  %3176 = vrot.lane.b32.xlu0 %v6629_v20, %s4830_s13 }
 0x6b0   : > { %3178 = vrot.lane.b32.xlu1 %v6640_v35, %s4830_s13 }
 0x6b1   : > { %v3010_v46 = vpop.permute.xlu2 %3009  ;;  %v2994_v2 = vpop.permute.xlu0 %2993 }
 0x6b2   : > { %3133 = vst.msk [vmem:[#allocation5 + $0x7f] sm:$0x1] %vm3111_vm6, %v3010_v46  ;;  %v2996_v51 = vpop.permute.xlu1 %2995 }
 0x6b3   : > { %3125 = vst.msk [vmem:[#allocation5 + $0x4f] sm:$0xfe] %vm3107_vm7, %v2994_v2 }
 0x6b4   : > { %3126 = vst.msk [vmem:[#allocation5 + $0x57] sm:$0xff] %vm3109_vm8, %v2996_v51 }
 0x6b7   : > { %3180 = vrot.lane.b32.xlu2 %v7168_v41, %s4830_s13  ;;  %3182 = vrot.lane.b32.xlu0 %v6651_v52, %s4830_s13 }
 0x6b8   : > { %3184 = vrot.lane.b32.xlu1 %v6662_v45, %s4830_s13 }
 0x6b9   : > { %v3016_v38 = vpop.permute.xlu2 %3015  ;;  %v3000_v34 = vpop.permute.xlu0 %2999 }
 0x6ba   : > { %3136 = vst.msk [vmem:[#allocation5 + $0x8f] sm:$0x1] %vm3111_vm6, %v3016_v38  ;;  %v3002_v54 = vpop.permute.xlu1 %3001  ;;  %v7369_v38 = vld [vmem:[#allocation3 + $0xe8] sm:$0x3] }
 0x6bb   : > { %3128 = vst.msk [vmem:[#allocation5 + $0x5f] sm:$0xfe] %vm3107_vm7, %v3000_v34 }
 0x6bc   : > { %3129 = vst.msk [vmem:[#allocation5 + $0x67] sm:$0xff] %vm3109_vm8, %v3002_v54 }
 0x6bf   : > { %3186 = vrot.lane.b32.xlu2 %v7325_v0, %s4830_s13  ;;  %3188 = vrot.lane.b32.xlu0 %v6673_v48, %s4830_s13 }
 0x6c0   : > { %3190 = vrot.lane.b32.xlu1 %v6685_v18, %s4830_s13 }
 0x6c1   : > { %v3022_v29 = vpop.permute.xlu2 %3021  ;;  %v3006_v42 = vpop.permute.xlu0 %3005 }
 0x6c2   : > { %3139 = vst.msk [vmem:[#allocation5 + $0x9f] sm:$0x1] %vm3111_vm6, %v3022_v29  ;;  %v3008_v44 = vpop.permute.xlu1 %3007 }
 0x6c3   : > { %3131 = vst.msk [vmem:[#allocation5 + $0x6f] sm:$0xfe] %vm3107_vm7, %v3006_v42  ;;  %v7380_v42 = vld [vmem:[#allocation3 + $0x100] sm:$0x3] }
 0x6c4   : > { %3132 = vst.msk [vmem:[#allocation5 + $0x77] sm:$0xff] %vm3109_vm8, %v3008_v44 }
 0x6c7   : > { %3192 = vrot.lane.b32.xlu2 %v7336_v50, %s4830_s13  ;;  %3194 = vrot.lane.b32.xlu0 %v6695_v31, %s4830_s13 }
 0x6c8   : > { %3196 = vrot.lane.b32.xlu1 %v6706_v40, %s4830_s13 }
 0x6c9   : > { %v3028_v58 = vpop.permute.xlu2 %3027  ;;  %v3012_v26 = vpop.permute.xlu0 %3011 }
 0x6ca   : > { %3142 = vst.msk [vmem:[#allocation5 + $0xaf] sm:$0x1] %vm3111_vm6, %v3028_v58  ;;  %v3014_v17 = vpop.permute.xlu1 %3013 }
 0x6cb   : > { %3134 = vst.msk [vmem:[#allocation5 + $0x7f] sm:$0xfe] %vm3107_vm7, %v3012_v26 }
 0x6cc   : > { %3135 = vst.msk [vmem:[#allocation5 + $0x87] sm:$0xff] %vm3109_vm8, %v3014_v17  ;;  %v4746_v17 = vld [vmem:[#allocation3 + $0x118] sm:$0x3] }
 0x6cf   : > { %3198 = vrot.lane.b32.xlu2 %v7347_v32, %s4830_s13  ;;  %3200 = vrot.lane.b32.xlu0 %v6716_v56, %s4830_s13 }
 0x6d0   : > { %3202 = vrot.lane.b32.xlu1 %v6728_v27, %s4830_s13 }
 0x6d1   : > { %v3034_v3 = vpop.permute.xlu2 %3033  ;;  %v3018_v33 = vpop.permute.xlu0 %3017 }
 0x6d2   : > { %3145 = vst.msk [vmem:[#allocation5 + $0xbf] sm:$0x1] %vm3111_vm6, %v3034_v3  ;;  %v3020_v16 = vpop.permute.xlu1 %3019 }
 0x6d3   : > { %3137 = vst.msk [vmem:[#allocation5 + $0x8f] sm:$0xfe] %vm3107_vm7, %v3018_v33 }
 0x6d4   : > { %3138 = vst.msk [vmem:[#allocation5 + $0x97] sm:$0xff] %vm3109_vm8, %v3020_v16 }
 0x6d7   : > { %3204 = vrot.lane.b32.xlu2 %v7358_v24, %s4830_s13  ;;  %3206 = vrot.lane.b32.xlu0 %v6739_v53, %s4830_s13 }
 0x6d8   : > { %3208 = vrot.lane.b32.xlu1 %v6752_v63, %s4830_s13 }
 0x6d9   : > { %v3040_v46 = vpop.permute.xlu2 %3039  ;;  %v3024_v2 = vpop.permute.xlu0 %3023 }
 0x6da   : > { %3148 = vst.msk [vmem:[#allocation5 + $0xcf] sm:$0x1] %vm3111_vm6, %v3040_v46  ;;  %v3026_v51 = vpop.permute.xlu1 %3025  ;;  %v4747_v46 = vld [vmem:[#allocation3 + $0x130] sm:$0x3] }
 0x6db   : > { %3140 = vst.msk [vmem:[#allocation5 + $0x9f] sm:$0xfe] %vm3107_vm7, %v3024_v2 }
 0x6dc   : > { %3141 = vst.msk [vmem:[#allocation5 + $0xa7] sm:$0xff] %vm3109_vm8, %v3026_v51 }
 0x6df   : > { %3210 = vrot.lane.b32.xlu2 %v7369_v38, %s4830_s13  ;;  %3212 = vrot.lane.b32.xlu0 %v6763_v61, %s4830_s13 }
 0x6e0   : > { %3214 = vrot.lane.b32.xlu1 %v6776_v25, %s4830_s13 }
 0x6e1   : > { %v3046_v34 = vpop.permute.xlu2 %3045  ;;  %v3030_v54 = vpop.permute.xlu0 %3029 }
 0x6e2   : > { %3151 = vst.msk [vmem:[#allocation5 + $0xdf] sm:$0x1] %vm3111_vm6, %v3046_v34  ;;  %v3032_v29 = vpop.permute.xlu1 %3031 }
 0x6e3   : > { %3143 = vst.msk [vmem:[#allocation5 + $0xaf] sm:$0xfe] %vm3107_vm7, %v3030_v54  ;;  %v7407_v54 = vld [vmem:[#allocation3 + $0x148] sm:$0x3] }
 0x6e4   : > { %3144 = vst.msk [vmem:[#allocation5 + $0xb7] sm:$0xff] %vm3109_vm8, %v3032_v29 }
 0x6e7   : > { %3216 = vrot.lane.b32.xlu2 %v7380_v42, %s4830_s13  ;;  %3218 = vrot.lane.b32.xlu0 %v6789_v1, %s4830_s13 }
 0x6e8   : > { %3220 = vrot.lane.b32.xlu1 %v6808_v59, %s4830_s13 }
 0x6e9   : > { %v3052_v44 = vpop.permute.xlu2 %3051  ;;  %v3036_v58 = vpop.permute.xlu0 %3035 }
 0x6ea   : > { %3154 = vst.msk [vmem:[#allocation5 + $0xef] sm:$0x1] %vm3111_vm6, %v3052_v44  ;;  %v3038_v26 = vpop.permute.xlu1 %3037 }
 0x6eb   : > { %3146 = vst.msk [vmem:[#allocation5 + $0xbf] sm:$0xfe] %vm3107_vm7, %v3036_v58 }
 0x6ec   : > { %3147 = vst.msk [vmem:[#allocation5 + $0xc7] sm:$0xff] %vm3109_vm8, %v3038_v26  ;;  %v7418_v26 = vld [vmem:[#allocation3 + $0x160] sm:$0x3] }
 0x6ef   : > { %3222 = vrot.lane.b32.xlu2 %v4746_v17, %s4830_s13  ;;  %3224 = vrot.lane.b32.xlu0 %v6826_v30, %s4830_s13 }
 0x6f0   : > { %3226 = vrot.lane.b32.xlu1 %v6843_v37, %s4830_s13 }
 0x6f1   : > { %v3058_v3 = vpop.permute.xlu2 %3057  ;;  %v3042_v33 = vpop.permute.xlu0 %3041 }
 0x6f2   : > { %3157 = vst.msk [vmem:[#allocation5 + $0xff] sm:$0x1] %vm3111_vm6, %v3058_v3  ;;  %v3044_v16 = vpop.permute.xlu1 %3043 }
 0x6f3   : > { %3149 = vst.msk [vmem:[#allocation5 + $0xcf] sm:$0xfe] %vm3107_vm7, %v3042_v33 }
 0x6f4   : > { %3150 = vst.msk [vmem:[#allocation5 + $0xd7] sm:$0xff] %vm3109_vm8, %v3044_v16  ;;  %v7429_v16 = vld [vmem:[#allocation3 + $0x178] sm:$0x3] }
 0x6f7   : > { %3228 = vrot.lane.b32.xlu2 %v4747_v46, %s4830_s13  ;;  %3230 = vrot.lane.b32.xlu0 %v6800_v12, %s4830_s13 }
 0x6f8   : > { %3232 = vrot.lane.b32.xlu1 %v6816_v47, %s4830_s13 }
 0x6f9   : > { %v3163_v2 = vpop.permute.xlu2 %3162  ;;  %v3048_v51 = vpop.permute.xlu0 %3047 }
 0x6fa   : > { %3307 = vst.msk [vmem:[#allocation5 + $0xe] sm:$0x3] %vm3306_vm9, %v3163_v2  ;;  %v3050_v34 = vpop.permute.xlu1 %3049 }
 0x6fb   : > { %3152 = vst.msk [vmem:[#allocation5 + $0xdf] sm:$0xfe] %vm3107_vm7, %v3048_v51 }
 0x6fc   : > { %3153 = vst.msk [vmem:[#allocation5 + $0xe7] sm:$0xff] %vm3109_vm8, %v3050_v34 }
 0x6ff   : > { %3234 = vrot.lane.b32.xlu2 %v7407_v54, %s4830_s13  ;;  %3236 = vrot.lane.b32.xlu0 %v6835_v55, %s4830_s13 }
 0x700   : > { %3238 = vrot.lane.b32.xlu1 %v6850_v39, %s4830_s13 }
 0x701   : > { %v3169_v29 = vpop.permute.xlu2 %3168  ;;  %v3054_v44 = vpop.permute.xlu0 %3053 }
 0x702   : > { %3310 = vst.msk [vmem:[#allocation5 + $0x1e] sm:$0x3] %vm3306_vm9, %v3169_v29  ;;  %v3056_v58 = vpop.permute.xlu1 %3055  ;;  %v7452_v29 = vld [vmem:[%s8200_s3] sm:$0xf] }
 0x703   : > { %3155 = vst.msk [vmem:[#allocation5 + $0xef] sm:$0xfe] %vm3107_vm7, %v3054_v44  ;;  %4610 = vmatpush.msk.msra.mxu2 %vm2038_vm5, %v7452_v29 }
 0x704   : > { %3156 = vst.msk [vmem:[#allocation5 + $0xf7] sm:$0xff] %vm3109_vm8, %v3056_v58  ;;  %4611 = vmatmul.msk.f32.vlgmr.msra.gmra.mxu2 %vm261_vm0, %v5015_v4 }
 0x707   : > { %3240 = vrot.lane.b32.xlu2 %v7418_v26, %s4830_s13  ;;  %3242 = vrot.lane.b32.xlu0 %v6862_v15, %s4830_s13 }
 0x708   : > { %3244 = vrot.lane.b32.xlu1 %v6877_v36, %s4830_s13 }
 0x709   : > { %v3175_v17 = vpop.permute.xlu2 %3174  ;;  %v3159_v3 = vpop.permute.xlu0 %3158 }
 0x70a   : > { %3313 = vst.msk [vmem:[#allocation5 + $0x2e] sm:$0x3] %vm3306_vm9, %v3175_v17  ;;  %v3161_v33 = vpop.permute.xlu1 %3160 }
 0x70b   : > { %3303 = vst.msk [vmem:[#allocation5 - $0x2] sm:$0xfc] %vm3302_vm10, %v3159_v3 }
 0x70c   : > { %3305 = vst.msk [vmem:[#allocation5 + $0x6] sm:$0xff] %vm3304_vm11, %v3161_v33  ;;  %4612 = vmatmul.msk.f32.gmra.mxu2 %vm261_vm0, %v5035_v8 }
 0x70f   : > { %3246 = vrot.lane.b32.xlu2 %v7429_v16, %s4830_s13  ;;  %3248 = vrot.lane.b32.xlu0 %v7117_v62, %s4830_s13 }
 0x710   : > { %3250 = vrot.lane.b32.xlu1 %v7124_v28, %s4830_s13 }
 0x711   : > { %v3181_v46 = vpop.permute.xlu2 %3180  ;;  %v3165_v2 = vpop.permute.xlu0 %3164 }
 0x712   : > { %3316 = vst.msk [vmem:[#allocation5 + $0x3e] sm:$0x3] %vm3306_vm9, %v3181_v46  ;;  %v3167_v51 = vpop.permute.xlu1 %3166 }
 0x713   : > { %3308 = vst.msk [vmem:[#allocation5 + $0xe] sm:$0xfc] %vm3302_vm10, %v3165_v2 }
 0x714   : > { %3309 = vst.msk [vmem:[#allocation5 + $0x16] sm:$0xff] %vm3304_vm11, %v3167_v51  ;;  %4613 = vmatmul.msk.f32.gmra.mxu2 %vm261_vm0, %v5020_v5 }
 0x717   : > { %3252 = vrot.lane.b32.xlu2 %v7278_v23, %s4830_s13  ;;  %3355 = vrot.lane.b32.xlu0 %v6580_v57, %s4831_s15  ;;  %s4542_s13 = sshll.u32 %s215_s16, 8 }
 0x718   : > { %3357 = vrot.lane.b32.xlu1 %v6593_v60, %s4831_s15  ;;  %s7900_s17 = scalar_lea.vmem [#allocation6], %s4542_s13 }
 0x719   : > { %v3187_v62 = vpop.permute.xlu2 %3186  ;;  %v3171_v28 = vpop.permute.xlu0 %3170  ;;  %s4473_s30 = sshll.u32 %s7900_s17, 4  ;;  %s4474_s30 = int_to_ptr.vmem [resolvable:$true] %s4473_s30 }
 0x71a   : > { %3319 = vst.msk [vmem:[#allocation5 + $0x4e] sm:$0x3] %vm3306_vm9, %v3187_v62  ;;  %v3173_v34 = vpop.permute.xlu1 %3172 }
 0x71b   : > { %3311 = vst.msk [vmem:[#allocation5 + $0x1e] sm:$0xfc] %vm3302_vm10, %v3171_v28 }
 0x71c   : > { %3312 = vst.msk [vmem:[#allocation5 + $0x26] sm:$0xff] %vm3304_vm11, %v3173_v34  ;;  %4614 = vmatmul.msk.f32.gmra.mxu2 %vm261_vm0, %v5025_v6 }
 0x71f   : > { %3359 = vrot.lane.b32.xlu2 %v6605_v49, %s4831_s15  ;;  %3361 = vrot.lane.b32.xlu0 %v6617_v14, %s4831_s15 }
 0x720   : > { %3363 = vrot.lane.b32.xlu1 %v6629_v20, %s4831_s15 }
 0x721   : > { %v3193_v44 = vpop.permute.xlu2 %3192  ;;  %v3177_v58 = vpop.permute.xlu0 %3176 }
 0x722   : > { %3322 = vst.msk [vmem:[#allocation5 + $0x5e] sm:$0x3] %vm3306_vm9, %v3193_v44  ;;  %v3179_v17 = vpop.permute.xlu1 %3178 }
 0x723   : > { %3314 = vst.msk [vmem:[#allocation5 + $0x2e] sm:$0xfc] %vm3302_vm10, %v3177_v58  ;;  %v8250_v58 = vld [vmem:[#allocation9_spill] sm:$0xff] }
 0x724   : > { %3315 = vst.msk [vmem:[#allocation5 + $0x36] sm:$0xff] %vm3304_vm11, %v3179_v17  ;;  %4615 = vmatmul.msk.f32.gmra.mxu2 %vm261_vm0, %v5030_v7 }
 0x727   : > { %3365 = vrot.lane.b32.xlu2 %v6640_v35, %s4831_s15  ;;  %3367 = vrot.lane.b32.xlu0 %v6651_v52, %s4831_s15 }
 0x728   : > { %3369 = vrot.lane.b32.xlu1 %v6662_v45, %s4831_s15 }
 0x729   : > { %v3199_v4 = vpop.permute.xlu2 %3198  ;;  %v3183_v3 = vpop.permute.xlu0 %3182 }
 0x72a   : > { %3325 = vst.msk [vmem:[#allocation5 + $0x6e] sm:$0x3] %vm3306_vm9, %v3199_v4  ;;  %v3185_v33 = vpop.permute.xlu1 %3184 }
 0x72b   : > { %3317 = vst.msk [vmem:[#allocation5 + $0x3e] sm:$0xfc] %vm3302_vm10, %v3183_v3  ;;  %v8251_v3 = vld [vmem:[#allocation10_spill] sm:$0xff] }
 0x72c   : > { %3318 = vst.msk [vmem:[#allocation5 + $0x46] sm:$0xff] %vm3304_vm11, %v3185_v33  ;;  %4616 = vmatmul.msk.f32.gmra.mxu2 %vm261_vm0, %v5040_v9 }
 0x72f   : > { %3371 = vrot.lane.b32.xlu2 %v6673_v48, %s4831_s15  ;;  %3485 = vrot.lane.b32.xlu0 %v6580_v57, %s4832_s25 }
 0x730   : > { %3487 = vrot.lane.b32.xlu1 %v6593_v60, %s4832_s25 }
 0x731   : > { %v3205_v8 = vpop.permute.xlu2 %3204  ;;  %v3189_v46 = vpop.permute.xlu0 %3188 }
 0x732   : > { %3328 = vst.msk [vmem:[#allocation5 + $0x7e] sm:$0x3] %vm3306_vm9, %v3205_v8  ;;  %v3191_v2 = vpop.permute.xlu1 %3190 }
 0x733   : > { %3320 = vst.msk [vmem:[#allocation5 + $0x4e] sm:$0xfc] %vm3302_vm10, %v3189_v46  ;;  %v2225_v46 = vld [vmem:[%s8199_s2 + $0x30] sm:$0xff] }
 0x734   : > { %3321 = vst.msk [vmem:[#allocation5 + $0x56] sm:$0xff] %vm3304_vm11, %v3191_v2  ;;  %4617 = vmatmul.msk.f32.gmra.mxu2 %vm261_vm0, %v5045_v10  ;;  %v8252_v2 = vld [vmem:[#allocation11_spill] sm:$0xff] }
 0x737   : > { %3680 = vrot.lane.b32.xlu2 %v6580_v57, %s4833_s26  ;;  %3682 = vrot.lane.b32.xlu0 %v6593_v60, %s4833_s26 }
 0x738   : > { %3489 = vrot.lane.b32.xlu1 %v7146_v43, %s4832_s25 }
 0x739   : > { %v3211_v5 = vpop.permute.xlu2 %3210  ;;  %v3195_v51 = vpop.permute.xlu0 %3194 }
 0x73a   : > { %3331 = vst.msk [vmem:[#allocation5 + $0x8e] sm:$0x3] %vm3306_vm9, %v3211_v5  ;;  %v3197_v62 = vpop.permute.xlu1 %3196  ;;  %v2224_v5 = vld [vmem:[%s8199_s2 + $0x28] sm:$0xff] }
 0x73b   : > { %3323 = vst.msk [vmem:[#allocation5 + $0x5e] sm:$0xfc] %vm3302_vm10, %v3195_v51 }
 0x73c   : > { %3324 = vst.msk [vmem:[#allocation5 + $0x66] sm:$0xff] %vm3304_vm11, %v3197_v62  ;;  %4618 = vmatmul.msk.f32.gmra.mxu2 %vm261_vm0, %v5050_v11 }
 0x73f   : > { %3684 = vrot.lane.b32.xlu2 %v7146_v43, %s4833_s26  ;;  %3491 = vrot.lane.b32.xlu0 %v6605_v49, %s4832_s25 }
 0x740   : > { %3493 = vrot.lane.b32.xlu1 %v6617_v14, %s4832_s25 }
 0x741   : > { %v3217_v6 = vpop.permute.xlu2 %3216  ;;  %v3201_v57 = vpop.permute.xlu0 %3200 }
 0x742   : > { %3334 = vst.msk [vmem:[#allocation5 + $0x9e] sm:$0x3] %vm3306_vm9, %v3217_v6  ;;  %v3203_v60 = vpop.permute.xlu1 %3202  ;;  %v2223_v6 = vld [vmem:[%s8199_s2 + $0x20] sm:$0xff] }
 0x743   : > { %3326 = vst.msk [vmem:[#allocation5 + $0x6e] sm:$0xfc] %vm3302_vm10, %v3201_v57 }
 0x744   : > { %3327 = vst.msk [vmem:[#allocation5 + $0x76] sm:$0xff] %vm3304_vm11, %v3203_v60  ;;  %4619 = vmatmul.msk.f32.gmra.mxu2 %vm261_vm0, %v5091_v19  ;;  %v2222_v60 = vld [vmem:[%s8199_s2 + $0x18] sm:$0xff] }
 0x747   : > { %3686 = vrot.lane.b32.xlu2 %v6605_v49, %s4833_s26  ;;  %3688 = vrot.lane.b32.xlu0 %v6617_v14, %s4833_s26 }
 0x748   : > { %3495 = vrot.lane.b32.xlu1 %v7157_v13, %s4832_s25 }
 0x749   : > { %v3223_v7 = vpop.permute.xlu2 %3222  ;;  %v3207_v43 = vpop.permute.xlu0 %3206 }
 0x74a   : > { %3337 = vst.msk [vmem:[#allocation5 + $0xae] sm:$0x3] %vm3306_vm9, %v3223_v7  ;;  %v3209_v28 = vpop.permute.xlu1 %3208  ;;  %v2221_v7 = vld [vmem:[%s8199_s2 + $0x10] sm:$0xff] }
 0x74b   : > { %3329 = vst.msk [vmem:[#allocation5 + $0x7e] sm:$0xfc] %vm3302_vm10, %v3207_v43  ;;  %v8253_v43 = vld [vmem:[#allocation12_spill] sm:$0xff] }
 0x74c   : > { %3330 = vst.msk [vmem:[#allocation5 + $0x86] sm:$0xff] %vm3304_vm11, %v3209_v28  ;;  %4620 = vmatmul.msk.f32.gmra.mxu2 %vm261_vm0, %v5098_v21  ;;  %v2220_v28 = vld [vmem:[%s8199_s2 + $0x8] sm:$0xff] }
 0x74f   : > { %3690 = vrot.lane.b32.xlu2 %v7157_v13, %s4833_s26  ;;  %3497 = vrot.lane.b32.xlu0 %v6629_v20, %s4832_s25 }
 0x750   : > { %3499 = vrot.lane.b32.xlu1 %v6640_v35, %s4832_s25 }
 0x751   : > { %v3229_v9 = vpop.permute.xlu2 %3228  ;;  %v3213_v49 = vpop.permute.xlu0 %3212 }
 0x752   : > { %3340 = vst.msk [vmem:[#allocation5 + $0xbe] sm:$0x3] %vm3306_vm9, %v3229_v9  ;;  %v3215_v14 = vpop.permute.xlu1 %3214 }
 0x753   : > { %3332 = vst.msk [vmem:[#allocation5 + $0x8e] sm:$0xfc] %vm3302_vm10, %v3213_v49 }
 0x754   : > { %3333 = vst.msk [vmem:[#allocation5 + $0x96] sm:$0xff] %vm3304_vm11, %v3215_v14  ;;  %4621 = vmatmul.msk.f32.gmra.mxu2 %vm261_vm0, %v5103_v22  ;;  %v2219_v14 = vld [vmem:[%s8199_s2] sm:$0xff] }
 0x757   : > { %3692 = vrot.lane.b32.xlu2 %v6629_v20, %s4833_s26  ;;  %3694 = vrot.lane.b32.xlu0 %v6640_v35, %s4833_s26 }
 0x758   : > { %3501 = vrot.lane.b32.xlu1 %v7168_v41, %s4832_s25 }
 0x759   : > { %v3235_v10 = vpop.permute.xlu2 %3234  ;;  %v3219_v13 = vpop.permute.xlu0 %3218 }
 0x75a   : > { %3343 = vst.msk [vmem:[#allocation5 + $0xce] sm:$0x3] %vm3306_vm9, %v3235_v10  ;;  %v3221_v34 = vpop.permute.xlu1 %3220 }
 0x75b   : > { %3335 = vst.msk [vmem:[#allocation5 + $0x9e] sm:$0xfc] %vm3302_vm10, %v3219_v13 }
 0x75c   : > { %3336 = vst.msk [vmem:[#allocation5 + $0xa6] sm:$0xff] %vm3304_vm11, %v3221_v34  ;;  %4622 = vmatmul.msk.f32.gmra.mxu2 %vm261_vm0, %v8250_v58 }
 0x75f   : > { %3696 = vrot.lane.b32.xlu2 %v7168_v41, %s4833_s26  ;;  %3503 = vrot.lane.b32.xlu0 %v6651_v52, %s4832_s25 }
 0x760   : > { %3505 = vrot.lane.b32.xlu1 %v6662_v45, %s4832_s25 }
 0x761   : > { %v3241_v11 = vpop.permute.xlu2 %3240  ;;  %v3225_v20 = vpop.permute.xlu0 %3224 }
 0x762   : > { %3346 = vst.msk [vmem:[#allocation5 + $0xde] sm:$0x3] %vm3306_vm9, %v3241_v11  ;;  %v3227_v35 = vpop.permute.xlu1 %3226  ;;  %v8255_v11 = vld [vmem:[#allocation14_spill] sm:$0xff] }
 0x763   : > { %3338 = vst.msk [vmem:[#allocation5 + $0xae] sm:$0xfc] %vm3302_vm10, %v3225_v20 }
 0x764   : > { %3339 = vst.msk [vmem:[#allocation5 + $0xb6] sm:$0xff] %vm3304_vm11, %v3227_v35  ;;  %4623 = vmatmul.msk.f32.gmra.mxu2 %vm261_vm0, %v8251_v3 }
 0x767   : > { %3698 = vrot.lane.b32.xlu2 %v6651_v52, %s4833_s26  ;;  %3700 = vrot.lane.b32.xlu0 %v6662_v45, %s4833_s26 }
 0x768   : > { %3399 = vrot.lane.b32.xlu1 %v6800_v12, %s4831_s15 }
 0x769   : > { %v3247_v19 = vpop.permute.xlu2 %3246  ;;  %v3231_v41 = vpop.permute.xlu0 %3230 }
 0x76a   : > { %3349 = vst.msk [vmem:[#allocation5 + $0xee] sm:$0x3] %vm3306_vm9, %v3247_v19  ;;  %v3233_v44 = vpop.permute.xlu1 %3232 }
 0x76b   : > { %3341 = vst.msk [vmem:[#allocation5 + $0xbe] sm:$0xfc] %vm3302_vm10, %v3231_v41 }
 0x76c   : > { %3342 = vst.msk [vmem:[#allocation5 + $0xc6] sm:$0xff] %vm3304_vm11, %v3233_v44  ;;  %4624 = vmatmul.msk.f32.gmra.mxu2 %vm261_vm0, %v8252_v2 }
 0x76f   : > { %3401 = vrot.lane.b32.xlu2 %v6816_v47, %s4831_s15  ;;  %3551 = vrot.lane.b32.xlu0 %v6800_v12, %s4832_s25 }
 0x770   : > { %3553 = vrot.lane.b32.xlu1 %v6816_v47, %s4832_s25 }
 0x771   : > { %v3253_v21 = vpop.permute.xlu2 %3252  ;;  %v3237_v52 = vpop.permute.xlu0 %3236 }
 0x772   : > { %3352 = vst.msk [vmem:[#allocation5 + $0xfe] sm:$0x3] %vm3306_vm9, %v3253_v21  ;;  %v3239_v45 = vpop.permute.xlu1 %3238  ;;  %v8257_v21 = vld [vmem:[#allocation16_spill] sm:$0xff] }
 0x773   : > { %3344 = vst.msk [vmem:[#allocation5 + $0xce] sm:$0xfc] %vm3302_vm10, %v3237_v52 }
 0x774   : > { %3345 = vst.msk [vmem:[#allocation5 + $0xd6] sm:$0xff] %vm3304_vm11, %v3239_v45  ;;  %4625 = vmatmul.msk.f32.gmra.mxu2 %vm261_vm0, %v8253_v43 }
 0x777   : > { %3555 = vrot.lane.b32.xlu2 %v7407_v54, %s4832_s25  ;;  %3748 = vrot.lane.b32.xlu0 %v6816_v47, %s4833_s26  ;;  %v2227_v47 = vld [vmem:[%s8199_s2 + $0x40] sm:$0xff] }
 0x778   : > { %3750 = vrot.lane.b32.xlu1 %v7407_v54, %s4833_s26  ;;  %4012 = vmatpush.msra.mxu1 %v2227_v47 }
 0x779   : > { %v3360_v22 = vpop.permute.xlu2 %3359  ;;  %v3243_v17 = vpop.permute.xlu0 %3242  ;;  %4655 = vmatpush.msrb.mxu3 %v2227_v47 }
 0x77a   : > { %3454 = vst.msk [vmem:[#allocation5 + $0x10] sm:$0xff] %vm3451_vm12, %v3360_v22  ;;  %v3245_v4 = vpop.permute.xlu1 %3244 }
 0x77b   : > { %3347 = vst.msk [vmem:[#allocation5 + $0xde] sm:$0xfc] %vm3302_vm10, %v3243_v17  ;;  %v8258_v17 = vld [vmem:[#allocation17_spill] sm:$0xff] }
 0x77c   : > { %3348 = vst.msk [vmem:[#allocation5 + $0xe6] sm:$0xff] %vm3304_vm11, %v3245_v4 }
 0x77f   : > { %3507 = vrot.lane.b32.xlu2 %v7325_v0, %s4832_s25  ;;  %3702 = vrot.lane.b32.xlu0 %v7325_v0, %s4833_s26  ;;  %v2226_v0 = vld [vmem:[%s8199_s2 + $0x38] sm:$0xff] }
 0x780   : > { %3403 = vrot.lane.b32.xlu1 %v6835_v55, %s4831_s15  ;;  %4013 = vmatpush.msra.mxu1 %v2226_v0 }
 0x781   : > { %v3366_v54 = vpop.permute.xlu2 %3365  ;;  %v3249_v33 = vpop.permute.xlu0 %3248  ;;  %4656 = vmatpush.msrb.mxu3 %v2226_v0 }
 0x782   : > { %3457 = vst.msk [vmem:[#allocation5 + $0x28] sm:$0xff] %vm3451_vm12, %v3366_v54  ;;  %v3251_v8 = vpop.permute.xlu1 %3250  ;;  %4014 = vmatpush.msra.mxu1 %v2225_v46 }
 0x783   : > { %3350 = vst.msk [vmem:[#allocation5 + $0xee] sm:$0xfc] %vm3302_vm10, %v3249_v33  ;;  %4657 = vmatpush.msrb.mxu3 %v2225_v46 }
 0x784   : > { %3351 = vst.msk [vmem:[#allocation5 + $0xf6] sm:$0xff] %vm3304_vm11, %v3251_v8  ;;  %4015 = vmatpush.msra.mxu1 %v2224_v5  ;;  %v8259_v8 = vld [vmem:[#allocation18_spill] sm:$0xff] }
 0x785   : > { %4658 = vmatpush.msrb.mxu3 %v2224_v5 }
 0x786   : > { %4016 = vmatpush.msra.mxu1 %v2223_v6 }
 0x787   : > { %3405 = vrot.lane.b32.xlu2 %v6850_v39, %s4831_s15  ;;  %3557 = vrot.lane.b32.xlu0 %v6835_v55, %s4832_s25  ;;  %v7668_v35 = vpop.f32.mrf.mxu2 }
 0x788   : > { %3559 = vrot.lane.b32.xlu1 %v6850_v39, %s4832_s25  ;;  %4659 = vmatpush.msrb.mxu3 %v2223_v6 }
 0x789   : > { %v3372_v51 = vpop.permute.xlu2 %3371  ;;  %v3356_v62 = vpop.permute.xlu0 %3355  ;;  %4017 = vmatpush.msra.mxu1 %v2222_v60 }
 0x78a   : > { %3460 = vst.msk [vmem:[#allocation5 + $0x40] sm:$0xff] %vm3451_vm12, %v3372_v51  ;;  %v3358_v57 = vpop.permute.xlu1 %3357  ;;  %4660 = vmatpush.msrb.mxu3 %v2222_v60 }
 0x78b   : > { %3452 = vst.msk [vmem:[#allocation5] sm:$0xff] %vm3451_vm12, %v3356_v62  ;;  %4018 = vmatpush.msra.mxu1 %v2221_v7 }
 0x78c   : > { %3453 = vst.msk [vmem:[#allocation5 + $0x8] sm:$0xff] %vm3451_vm12, %v3358_v57  ;;  %4661 = vmatpush.msrb.mxu3 %v2221_v7 }
 0x78d   : > { %4019 = vmatpush.msra.mxu1 %v2220_v28 }
 0x78e   : > { %4662 = vmatpush.msrb.mxu3 %v2220_v28 }
 0x78f   : > { %3373 = vrot.lane.b32.xlu2 %v6685_v18, %s4831_s15  ;;  %3752 = vrot.lane.b32.xlu0 %v6835_v55, %s4833_s26  ;;  %v8254_v55 = vld [vmem:[#allocation13_spill] sm:$0xff]  ;;  %v7681_v44 = vpop.f32.mrf.mxu2 }
 0x790   : > { %3754 = vrot.lane.b32.xlu1 %v6850_v39, %s4833_s26  ;;  %4020 = vmatpush.msra.mxu1 %v2219_v14 }
 0x791   : > { %v3681_v9 = vpop.permute.xlu2 %3680  ;;  %v3362_v49 = vpop.permute.xlu0 %3361  ;;  %4626 = vmatmul.msk.f32.gmra.mxu2 %vm261_vm0, %v8254_v55  ;;  %4663 = vmatpush.msrb.mxu3 %v2219_v14 }
 0x792   : > { %3455 = vst.msk [vmem:[#allocation5 + $0x18] sm:$0xff] %vm3451_vm12, %v3362_v49  ;;  %v3364_v10 = vpop.permute.xlu1 %3363  ;;  %v4752_v49 = vld [vmem:[#allocation3 + $0x188] sm:$0xff] }
 0x793   : > { %3456 = vst.msk [vmem:[#allocation5 + $0x20] sm:$0xff] %vm3451_vm12, %v3364_v10  ;;  %4664 = vmatpush.msk.msra.mxu3 %vm2038_vm5, %v7452_v29  ;;  %vm3631_vm5 = vcmask 523712  }
 0x797   : > { %3509 = vrot.lane.b32.xlu2 %v6673_v48, %s4832_s25  ;;  %3511 = vrot.lane.b32.xlu0 %v6685_v18, %s4832_s25  ;;  %v7695_v22 = vpop.f32.mrf.mxu2 }
 0x798   : > { %3704 = vrot.lane.b32.xlu1 %v6673_v48, %s4833_s26 }
 0x799   : > { %v3685_v39 = vpop.permute.xlu2 %3684  ;;  %v3368_v13 = vpop.permute.xlu0 %3367  ;;  %4627 = vmatmul.msk.f32.gmra.mxu2 %vm261_vm0, %v8255_v11 }
 0x79a   : > { %3458 = vst.msk [vmem:[#allocation5 + $0x30] sm:$0xff] %vm3451_vm12, %v3368_v13  ;;  %v3370_v34 = vpop.permute.xlu1 %3369 }
 0x79b   : > { %3459 = vst.msk [vmem:[#allocation5 + $0x38] sm:$0xff] %vm3451_vm12, %v3370_v34  ;;  %v8263_v34 = vld [vmem:[#allocation22_spill] sm:$0xff] }
 0x79f   : > { %3706 = vrot.lane.b32.xlu2 %v6685_v18, %s4833_s26  ;;  %3561 = vrot.lane.b32.xlu0 %v7418_v26, %s4832_s25  ;;  %v8256_v18 = vld [vmem:[#allocation15_spill] sm:$0xff]  ;;  %v7709_v33 = vpop.f32.mrf.mxu2 }
 0x7a0   : > { %3756 = vrot.lane.b32.xlu1 %v7418_v26, %s4833_s26 }
 0x7a1   : > { %v3687_v48 = vpop.permute.xlu2 %3686  ;;  %v3486_v29 = vpop.permute.xlu0 %3485  ;;  %4628 = vmatmul.msk.f32.gmra.mxu2 %vm261_vm0, %v8256_v18 }
 0x7a2   : > { %3630 = vst.msk [vmem:[#allocation5 - $0x1] sm:$0xfe] %vm3629_vm13, %v3486_v29  ;;  %v3488_v20 = vpop.permute.xlu1 %3487 }
 0x7a3   : > { %3825 = vst.msk [vmem:[#allocation5 - $0x2] sm:$0xfc] %vm3824_vm14, %v3681_v9 }
 0x7a4   : > { %3632 = vst.msk [vmem:[#allocation5 + $0x7] sm:$0xff] %vm3631_vm5, %v3488_v20 }
 0x7a7   : > { %3513 = vrot.lane.b32.xlu2 %v7336_v50, %s4832_s25  ;;  %3708 = vrot.lane.b32.xlu0 %v7336_v50, %s4833_s26  ;;  %v7723_v5 = vpop.f32.mrf.mxu2 }
 0x7a8   : > { %3407 = vrot.lane.b32.xlu1 %v6862_v15, %s4831_s15 }
 0x7a9   : > { %v3691_v26 = vpop.permute.xlu2 %3690  ;;  %v3683_v19 = vpop.permute.xlu0 %3682  ;;  %4629 = vmatmul.msk.f32.gmra.mxu2 %vm261_vm0, %v8257_v21 }
 0x7aa   : > { %3827 = vst.msk [vmem:[#allocation5 + $0x6] sm:$0xff] %vm3826_vm15, %v3683_v19  ;;  %v3490_v41 = vpop.permute.xlu1 %3489 }
 0x7ab   : > { %3634 = vst.msk [vmem:[#allocation5 + $0xf] sm:$0x1] %vm3633_vm1, %v3490_v41 }
 0x7ac   : > { %3829 = vst.msk [vmem:[#allocation5 + $0xe] sm:$0x3] %vm3828_vm2, %v3685_v39 }
 0x7af   : > { %3409 = vrot.lane.b32.xlu2 %v6877_v36, %s4831_s15  ;;  %3563 = vrot.lane.b32.xlu0 %v6862_v15, %s4832_s25  ;;  %v7737_v60 = vpop.f32.mrf.mxu2 }
 0x7b0   : > { %3565 = vrot.lane.b32.xlu1 %v6877_v36, %s4832_s25 }
 0x7b1   : > { %v3693_v50 = vpop.permute.xlu2 %3692  ;;  %v3492_v52 = vpop.permute.xlu0 %3491  ;;  %v3875_v45 = vld [vmem:[#allocation5] sm:$0xff]  ;;  %4630 = vmatmul.msk.f32.gmra.mxu2 %vm261_vm0, %v8258_v17 }
 0x7b2   : > { %3635 = vst.msk [vmem:[#allocation5 + $0xf] sm:$0xfe] %vm3629_vm13, %v3492_v52  ;;  %v3494_v58 = vpop.permute.xlu1 %3493  ;;  %4578 = vmatmul.msk.f32.vlgmr.msra.gmra.mxu1 %vm3908_vm3, %v3875_v45 }
 0x7b3   : > { %3830 = vst.msk [vmem:[#allocation5 + $0xe] sm:$0xfc] %vm3824_vm14, %v3687_v48  ;;  %v3876_v47 = vld [vmem:[#allocation5 + $0x8] sm:$0xff] }
 0x7b4   : > { %3636 = vst.msk [vmem:[#allocation5 + $0x17] sm:$0xff] %vm3631_vm5, %v3494_v58 }
 0x7b7   : > { %3375 = vrot.lane.b32.xlu2 %v6695_v31, %s4831_s15  ;;  %3377 = vrot.lane.b32.xlu0 %v6706_v40, %s4831_s15  ;;  %v7751_v9 = vpop.f32.mrf.mxu2 }
 0x7b8   : > { %3758 = vrot.lane.b32.xlu1 %v6862_v15, %s4833_s26 }
 0x7b9   : > { %v3697_v4 = vpop.permute.xlu2 %3696  ;;  %v3689_v3 = vpop.permute.xlu0 %3688  ;;  %4631 = vmatmul.msk.f32.gmra.mxu2 %vm261_vm0, %v8259_v8 }
 0x7ba   : > { %3831 = vst.msk [vmem:[#allocation5 + $0x16] sm:$0xff] %vm3826_vm15, %v3689_v3  ;;  %v3496_v54 = vpop.permute.xlu1 %3495  ;;  %4579 = vmatmul.msk.f32.gmra.mxu1 %vm3908_vm3, %v3876_v47  ;;  %v2358_v47 = vld [vmem:[#allocation3 + $0x198] sm:$0xff] }
 0x7bb   : > { %3637 = vst.msk [vmem:[#allocation5 + $0x1f] sm:$0x1] %vm3633_vm1, %v3496_v54  ;;  %v2359_v54 = vld [vmem:[#allocation3 + $0x1a0] sm:$0xff] }
 0x7bc   : > { %3832 = vst.msk [vmem:[#allocation5 + $0x1e] sm:$0x3] %vm3828_vm2, %v3691_v26 }
 0x7bf   : > { %3760 = vrot.lane.b32.xlu2 %v6877_v36, %s4833_s26  ;;  %3515 = vrot.lane.b32.xlu0 %v6695_v31, %s4832_s25  ;;  %v8260_v36 = vld [vmem:[#allocation19_spill] sm:$0xff]  ;;  %v7763_v13 = vpop.f32.mrf.mxu2 }
 0x7c0   : > { %3517 = vrot.lane.b32.xlu1 %v6706_v40, %s4832_s25 }
 0x7c1   : > { %v3699_v15 = vpop.permute.xlu2 %3698  ;;  %v3498_v0 = vpop.permute.xlu0 %3497  ;;  %v3877_v46 = vld [vmem:[#allocation5 + $0x10] sm:$0xff]  ;;  %4632 = vmatmul.msk.f32.gmra.mxu2 %vm261_vm0, %v8260_v36 }
 0x7c2   : > { %3638 = vst.msk [vmem:[#allocation5 + $0x1f] sm:$0xfe] %vm3629_vm13, %v3498_v0  ;;  %v3500_v2 = vpop.permute.xlu1 %3499  ;;  %4580 = vmatmul.msk.f32.gmra.mxu1 %vm3908_vm3, %v3877_v46 }
 0x7c3   : > { %3833 = vst.msk [vmem:[#allocation5 + $0x1e] sm:$0xfc] %vm3824_vm14, %v3693_v50  ;;  %v3878_v6 = vld [vmem:[#allocation5 + $0x18] sm:$0xff] }
 0x7c4   : > { %3639 = vst.msk [vmem:[#allocation5 + $0x27] sm:$0xff] %vm3631_vm5, %v3500_v2 }
 0x7c7   : > { %3710 = vrot.lane.b32.xlu2 %v6695_v31, %s4833_s26  ;;  %3712 = vrot.lane.b32.xlu0 %v6706_v40, %s4833_s26  ;;  %v8261_v31 = vld [vmem:[#allocation20_spill] sm:$0xff]  ;;  %v7776_v18 = vpop.f32.mrf.mxu2 }
 0x7c8   : > { %3567 = vrot.lane.b32.xlu1 %v7429_v16, %s4832_s25 }
 0x7c9   : > { %v3402_v51 = vpop.permute.xlu2 %3401  ;;  %v3695_v62 = vpop.permute.xlu0 %3694  ;;  %4633 = vmatmul.msk.f32.gmra.mxu2 %vm261_vm0, %v8261_v31 }
 0x7ca   : > { %3475 = vst.msk [vmem:[#allocation5 + $0xb8] sm:$0xff] %vm3451_vm12, %v3402_v51  ;;  %v3502_v57 = vpop.permute.xlu1 %3501  ;;  %4581 = vmatmul.msk.f32.gmra.mxu1 %vm3908_vm3, %v3878_v6 }
 0x7cb   : > { %3834 = vst.msk [vmem:[#allocation5 + $0x26] sm:$0xff] %vm3826_vm15, %v3695_v62 }
 0x7cc   : > { %3640 = vst.msk [vmem:[#allocation5 + $0x2f] sm:$0x1] %vm3633_vm1, %v3502_v57 }
 0x7cd   : > { %3835 = vst.msk [vmem:[#allocation5 + $0x2e] sm:$0x3] %vm3828_vm2, %v3697_v4 }
 0x7cf   : > { %3762 = vrot.lane.b32.xlu2 %v7429_v16, %s4833_s26  ;;  %3519 = vrot.lane.b32.xlu0 %v7347_v32, %s4832_s25  ;;  %v8262_v16 = vld [vmem:[#allocation21_spill] sm:$0xff]  ;;  %v7786_v21 = vpop.f32.mrf.mxu2 }
 0x7d0   : > { %3714 = vrot.lane.b32.xlu1 %v7347_v32, %s4833_s26  ;;  %v4751_v32 = vld [vmem:[#allocation3 + $0x180] sm:$0xff] }
 0x7d1   : > { %v3556_v40 = vpop.permute.xlu2 %3555  ;;  %v3504_v7 = vpop.permute.xlu0 %3503  ;;  %4634 = vmatmul.msk.f32.gmra.mxu2 %vm261_vm0, %v8262_v16 }
 0x7d2   : > { %3667 = vst.msk [vmem:[#allocation5 + $0xbf] sm:$0x1] %vm3633_vm1, %v3556_v40  ;;  %v3506_v43 = vpop.permute.xlu1 %3505  ;;  %v3879_v28 = vld [vmem:[#allocation5 + $0x20] sm:$0xff] }
 0x7d3   : > { %3641 = vst.msk [vmem:[#allocation5 + $0x2f] sm:$0xfe] %vm3629_vm13, %v3504_v7  ;;  %4582 = vmatmul.msk.f32.gmra.mxu1 %vm3908_vm3, %v3879_v28 }
 0x7d4   : > { %3836 = vst.msk [vmem:[#allocation5 + $0x2e] sm:$0xfc] %vm3824_vm14, %v3699_v15  ;;  %v3880_v39 = vld [vmem:[#allocation5 + $0x28] sm:$0xff] }
 0x7d5   : > { %3642 = vst.msk [vmem:[#allocation5 + $0x37] sm:$0xff] %vm3631_vm5, %v3506_v43 }
 0x7d7   : > { %3411 = vrot.lane.b32.xlu2 %v4751_v32, %s4831_s15  ;;  %3413 = vrot.lane.b32.xlu0 %v4752_v49, %s4831_s15  ;;  %v7800_v17 = vpop.f32.mrf.mxu2 }
 0x7d8   : > { %3569 = vrot.lane.b32.xlu1 %v4751_v32, %s4832_s25 }
 0x7d9   : > { %v3508_v14 = vpop.permute.xlu2 %3507  ;;  %v3701_v10 = vpop.permute.xlu0 %3700  ;;  %4635 = vmatmul.msk.f32.gmra.mxu2 %vm261_vm0, %v8263_v34 }
 0x7da   : > { %3643 = vst.msk [vmem:[#allocation5 + $0x3f] sm:$0x1] %vm3633_vm1, %v3508_v14  ;;  %v3400_v55 = vpop.permute.xlu1 %3399 }
 0x7db   : > { %3837 = vst.msk [vmem:[#allocation5 + $0x36] sm:$0xff] %vm3826_vm15, %v3701_v10  ;;  %4583 = vmatmul.msk.f32.gmra.mxu1 %vm3908_vm3, %v3880_v39 }
 0x7dc   : > { %3474 = vst.msk [vmem:[#allocation5 + $0xb0] sm:$0xff] %vm3451_vm12, %v3400_v55 }
 0x7df   : > { %3571 = vrot.lane.b32.xlu2 %v4752_v49, %s4832_s25  ;;  %3379 = vrot.lane.b32.xlu0 %v6716_v56, %s4831_s15  ;;  %v7811_v8 = vpop.f32.mrf.mxu2 }
 0x7e0   : > { %3381 = vrot.lane.b32.xlu1 %v6728_v27, %s4831_s15 }
 0x7e1   : > { %v3406_v11 = vpop.permute.xlu2 %3405  ;;  %v3552_v48 = vpop.permute.xlu0 %3551 }
 0x7e2   : > { %3477 = vst.msk [vmem:[#allocation5 + $0xc8] sm:$0xff] %vm3451_vm12, %v3406_v11  ;;  %v3554_v29 = vpop.permute.xlu1 %3553  ;;  %v3881_v20 = vld [vmem:[#allocation5 + $0x30] sm:$0xff] }
 0x7e3   : > { %3665 = vst.msk [vmem:[#allocation5 + $0xaf] sm:$0xfe] %vm3629_vm13, %v3552_v48  ;;  %4584 = vmatmul.msk.f32.gmra.mxu1 %vm3908_vm3, %v3881_v20  ;;  %v4753_v48 = vld [vmem:[%s8201_s4] sm:$0x7] }
 0x7e4   : > { %3666 = vst.msk [vmem:[#allocation5 + $0xb7] sm:$0xff] %vm3631_vm5, %v3554_v29  ;;  %v7873_v29 = vperm.slane %v4753_v48, 1  ;;  %v7875_v20 = vperm.slane %v4753_v48, 2 }
 0x7e7   : > { %3764 = vrot.lane.b32.xlu2 %v4751_v32, %s4833_s26  ;;  %3766 = vrot.lane.b32.xlu0 %v4752_v49, %s4833_s26  ;;  %v2360_v32 = vld [vmem:[#allocation3 + $0x1a8] sm:$0x3] }
 0x7e8   : > { %3521 = vrot.lane.b32.xlu1 %v6716_v56, %s4832_s25 }
 0x7e9   : > { %v3374_v26 = vpop.permute.xlu2 %3373  ;;  %v3749_v19 = vpop.permute.xlu0 %3748 }
 0x7ea   : > { %3461 = vst.msk [vmem:[#allocation5 + $0x48] sm:$0xff] %vm3451_vm12, %v3374_v26  ;;  %v3751_v41 = vpop.permute.xlu1 %3750 }
 0x7eb   : > { %3861 = vst.msk [vmem:[#allocation5 + $0xb6] sm:$0xff] %vm3826_vm15, %v3749_v19 }
 0x7ec   : > { %3862 = vst.msk [vmem:[#allocation5 + $0xbe] sm:$0x3] %vm3828_vm2, %v3751_v41 }
 0x7ef   : > { %3523 = vrot.lane.b32.xlu2 %v6728_v27, %s4832_s25  ;;  %3716 = vrot.lane.b32.xlu0 %v6716_v56, %s4833_s26 }
 0x7f0   : > { %3718 = vrot.lane.b32.xlu1 %v6728_v27, %s4833_s26 }
 0x7f1   : > { %v3510_v50 = vpop.permute.xlu2 %3509  ;;  %v3703_v52 = vpop.permute.xlu0 %3702 }
 0x7f2   : > { %3644 = vst.msk [vmem:[#allocation5 + $0x3f] sm:$0xfe] %vm3629_vm13, %v3510_v50  ;;  %v3404_v45 = vpop.permute.xlu1 %3403 }
 0x7f3   : > { %3838 = vst.msk [vmem:[#allocation5 + $0x3e] sm:$0x3] %vm3828_vm2, %v3703_v52  ;;  %v3898_v58 = vld [vmem:[#allocation5 + $0xb8] sm:$0xff]  ;;  %v4301_v52 = vadd.f32 %v7668_v35, %v7875_v20 }
 0x7f4   : > { %3476 = vst.msk [vmem:[#allocation5 + $0xc0] sm:$0xff] %vm3451_vm12, %v3404_v45  ;;  %4601 = vmatmul.msk.f32.vlgmr.msrb.gmra.mxu3 %vm3908_vm3, %v3898_v58 }
 0x7f7   : > { %3573 = vrot.lane.b32.xlu2 %v7278_v23, %s4832_s25  ;;  %3768 = vrot.lane.b32.xlu0 %v7278_v23, %s4833_s26 }
 0x7f8   : > { %3525 = vrot.lane.b32.xlu1 %v7358_v24, %s4832_s25 }
 0x7f9   : > { %v3707_v56 = vpop.permute.xlu2 %3706  ;;  %v3558_v27 = vpop.permute.xlu0 %3557 }
 0x7fa   : > { %3668 = vst.msk [vmem:[#allocation5 + $0xbf] sm:$0xfe] %vm3629_vm13, %v3558_v27  ;;  %v3560_v4 = vpop.permute.xlu1 %3559  ;;  %v3882_v3 = vld [vmem:[#allocation5 + $0x38] sm:$0xff] }
 0x7fb   : > { %3669 = vst.msk [vmem:[#allocation5 + $0xc7] sm:$0xff] %vm3631_vm5, %v3560_v4  ;;  %4585 = vmatmul.msk.f32.gmra.mxu1 %vm3908_vm3, %v3882_v3 }
 0x7ff   : > { %3720 = vrot.lane.b32.xlu2 %v7358_v24, %s4833_s26  ;;  %3415 = vrot.lane.b32.xlu0 %v2358_v47, %s4831_s15  ;;  %v7824_v24 = vpop.f32.mrf.mxu2 }
 0x800   : > { %3417 = vrot.lane.b32.xlu1 %v2359_v54, %s4831_s15 }
 0x801   : > { %v3514_v23 = vpop.permute.xlu2 %3513  ;;  %v3753_v15 = vpop.permute.xlu0 %3752 }
 0x802   : > { %3646 = vst.msk [vmem:[#allocation5 + $0x4f] sm:$0x1] %vm3633_vm1, %v3514_v23  ;;  %v3755_v0 = vpop.permute.xlu1 %3754  ;;  %v4304_v23 = vadd.f32 %v7681_v44, %v7875_v20 }
 0x803   : > { %3863 = vst.msk [vmem:[#allocation5 + $0xbe] sm:$0xfc] %vm3824_vm14, %v3753_v15 }
 0x804   : > { %3864 = vst.msk [vmem:[#allocation5 + $0xc6] sm:$0xff] %vm3826_vm15, %v3755_v0 }
 0x807   : > { %3575 = vrot.lane.b32.xlu2 %v2358_v47, %s4832_s25  ;;  %3577 = vrot.lane.b32.xlu0 %v2359_v54, %s4832_s25  ;;  %v7836_v31 = vpop.f32.mrf.mxu2 }
 0x808   : > { %3383 = vrot.lane.b32.xlu1 %v6739_v53, %s4831_s15 }
 0x809   : > { %v3410_v46 = vpop.permute.xlu2 %3409  ;;  %v3512_v2 = vpop.permute.xlu0 %3511 }
 0x80a   : > { %3479 = vst.msk [vmem:[#allocation5 + $0xd8] sm:$0xff] %vm3451_vm12, %v3410_v46  ;;  %v3705_v36 = vpop.permute.xlu1 %3704  ;;  %v4754_v46 = vld [vmem:[#allocation3 + $0x100] sm:$0x3] }
 0x80b   : > { %3645 = vst.msk [vmem:[#allocation5 + $0x47] sm:$0xff] %vm3631_vm5, %v3512_v2  ;;  %v3899_v51 = vld [vmem:[#allocation5 + $0xc0] sm:$0xff] }
 0x80c   : > { %3840 = vst.msk [vmem:[#allocation5 + $0x46] sm:$0xff] %vm3826_vm15, %v3707_v56  ;;  %4602 = vmatmul.msk.f32.gmra.mxu3 %vm3908_vm3, %v3899_v51 }
 0x80d   : > { %3839 = vst.msk [vmem:[#allocation5 + $0x3e] sm:$0xfc] %vm3824_vm14, %v3705_v36 }
 0x80f   : > { %3385 = vrot.lane.b32.xlu2 %v6752_v63, %s4831_s15  ;;  %3770 = vrot.lane.b32.xlu0 %v2358_v47, %s4833_s26  ;;  %v7850_v49 = vpop.f32.mrf.mxu2 }
 0x810   : > { %3772 = vrot.lane.b32.xlu1 %v2359_v54, %s4833_s26 }
 0x811   : > { %v3376_v62 = vpop.permute.xlu2 %3375  ;;  %v3562_v6 = vpop.permute.xlu0 %3561 }
 0x812   : > { %3462 = vst.msk [vmem:[#allocation5 + $0x50] sm:$0xff] %vm3451_vm12, %v3376_v62  ;;  %v3757_v57 = vpop.permute.xlu1 %3756 }
 0x813   : > { %3670 = vst.msk [vmem:[#allocation5 + $0xcf] sm:$0x1] %vm3633_vm1, %v3562_v6  ;;  %v4307_v6 = vadd.f32 %v7695_v22, %v7875_v20 }
 0x814   : > { %3865 = vst.msk [vmem:[#allocation5 + $0xce] sm:$0x3] %vm3828_vm2, %v3757_v57  ;;  %v3883_v40 = vld [vmem:[#allocation5 + $0x40] sm:$0xff] }
 0x815   : > { %4586 = vmatmul.msk.f32.gmra.mxu1 %vm3908_vm3, %v3883_v40 }
 0x817   : > { %3527 = vrot.lane.b32.xlu2 %v6739_v53, %s4832_s25  ;;  %3529 = vrot.lane.b32.xlu0 %v6752_v63, %s4832_s25  ;;  %v7860_v39 = vpop.f32.mrf.mxu2 }
 0x818   : > { %3722 = vrot.lane.b32.xlu1 %v6739_v53, %s4833_s26 }
 0x819   : > { %v3761_v7 = vpop.permute.xlu2 %3760  ;;  %v3709_v43 = vpop.permute.xlu0 %3708 }
 0x81a   : > { %3841 = vst.msk [vmem:[#allocation5 + $0x4e] sm:$0x3] %vm3828_vm2, %v3709_v43  ;;  %v3408_v28 = vpop.permute.xlu1 %3407 }
 0x81b   : > { %3478 = vst.msk [vmem:[#allocation5 + $0xd0] sm:$0xff] %vm3451_vm12, %v3408_v28  ;;  %v3900_v16 = vld [vmem:[#allocation5 + $0xc8] sm:$0xff] }
 0x81c   : > { %4603 = vmatmul.msk.f32.gmra.mxu3 %vm3908_vm3, %v3900_v16 }
 0x81f   : > { %3724 = vrot.lane.b32.xlu2 %v6752_v63, %s4833_s26  ;;  %3579 = vrot.lane.b32.xlu0 %v2360_v32, %s4832_s25  ;;  %v7885_v19 = vpop.f32.mrf.mxu2 }
 0x820   : > { %3774 = vrot.lane.b32.xlu1 %v2360_v32, %s4833_s26 }
 0x821   : > { %v3711_v53 = vpop.permute.xlu2 %3710  ;;  %v3564_v14 = vpop.permute.xlu0 %3563  ;;  %v3884_v10 = vld [vmem:[#allocation5 + $0x48] sm:$0xff] }
 0x822   : > { %3671 = vst.msk [vmem:[#allocation5 + $0xcf] sm:$0xfe] %vm3629_vm13, %v3564_v14  ;;  %v3566_v55 = vpop.permute.xlu1 %3565  ;;  %4587 = vmatmul.msk.f32.gmra.mxu1 %vm3908_vm3, %v3884_v10  ;;  %v4310_v10 = vadd.f32 %v7709_v33, %v7875_v20  ;;  %v4755_v33 = vld [vmem:[#allocation3 + $0x118] sm:$0x3] }
 0x823   : > { %3672 = vst.msk [vmem:[#allocation5 + $0xd7] sm:$0xff] %vm3631_vm5, %v3566_v55 }
 0x824   : > { %3867 = vst.msk [vmem:[#allocation5 + $0xd6] sm:$0xff] %vm3826_vm15, %v3761_v7 }
 0x827   : > { %3531 = vrot.lane.b32.xlu2 %v7369_v38, %s4832_s25  ;;  %3726 = vrot.lane.b32.xlu0 %v7369_v38, %s4833_s26  ;;  %v7909_v15 = vpop.f32.mrf.mxu2 }
 0x828   : > { %3387 = vrot.lane.b32.xlu1 %v6763_v61, %s4831_s15 }
 0x829   : > { %v3763_v63 = vpop.permute.xlu2 %3762  ;;  %v3378_v34 = vpop.permute.xlu0 %3377 }
 0x82a   : > { %3463 = vst.msk [vmem:[#allocation5 + $0x58] sm:$0xff] %vm3451_vm12, %v3378_v34  ;;  %v3759_v11 = vpop.permute.xlu1 %3758 }
 0x82b   : > { %3866 = vst.msk [vmem:[#allocation5 + $0xce] sm:$0xfc] %vm3824_vm14, %v3759_v11 }
 0x82f   : > { %3389 = vrot.lane.b32.xlu2 %v6776_v25, %s4831_s15  ;;  %3533 = vrot.lane.b32.xlu0 %v6763_v61, %s4832_s25  ;;  %v4022_v38 = vpop.f32.mrf.mxu1  ;;  %v7926_v28 = vpop.f32.mrf.mxu2 }
 0x830   : > { %3535 = vrot.lane.b32.xlu1 %v6776_v25, %s4832_s25  ;;  %v4023_v26 = vadd.f32 %v4022_v38, %v7873_v29 }
 0x831   : > { %v3412_v41 = vpop.permute.xlu2 %3411  ;;  %v3516_v50 = vpop.permute.xlu0 %3515 }
 0x832   : > { %v4118_v45 = vmax.f32 %v4023_v26, 0.0  ;;  %3480 = vst.msk [vmem:[#allocation5 + $0xe0] sm:$0xff] %vm3451_vm12, %v3412_v41  ;;  %v3518_v58 = vpop.permute.xlu1 %3517  ;;  %v3901_v56 = vld [vmem:[#allocation5 + $0xd0] sm:$0xff] }
 0x833   : > { %3647 = vst.msk [vmem:[#allocation5 + $0x4f] sm:$0xfe] %vm3629_vm13, %v3516_v50  ;;  %4604 = vmatmul.msk.f32.gmra.mxu3 %vm3908_vm3, %v3901_v56 }
 0x834   : > { %v4150_v27 = vmin.f32 %v4118_v45, 6.0  ;;  %3842 = vst.msk [vmem:[#allocation5 + $0x4e] sm:$0xfc] %vm3824_vm14, %v3711_v53  ;;  %v4313_v45 = vadd.f32 %v7723_v5, %v7875_v20 }
 0x835   : > { %3648 = vst.msk [vmem:[#allocation5 + $0x57] sm:$0xff] %vm3631_vm5, %v3518_v58 }
 0x836   : > { %v4396_v4 = vadd.f32 %v4301_v52, %v4150_v27 }
 0x837   : > { %3728 = vrot.lane.b32.xlu2 %v6763_v61, %s4833_s26  ;;  %3730 = vrot.lane.b32.xlu0 %v6776_v25, %s4833_s26  ;;  %v4025_v35 = vpop.f32.mrf.mxu1  ;;  %v7943_v48 = vpop.f32.mrf.mxu2 }
 0x838   : > { %4428 = vst [vmem:[%s7900_s17] sm:$0xff] %v4396_v4  ;;  %3537 = vrot.lane.b32.xlu1 %v7380_v42, %s4832_s25  ;;  %v4026_v3 = vadd.f32 %v4025_v35, %v7873_v29 }
 0x839   : > { %v3572_v47 = vpop.permute.xlu2 %3571  ;;  %v3713_v54 = vpop.permute.xlu0 %3712 }
 0x83a   : > { %v4119_v61 = vmax.f32 %v4026_v3, 0.0  ;;  %3843 = vst.msk [vmem:[#allocation5 + $0x56] sm:$0xff] %vm3826_vm15, %v3713_v54  ;;  %v3568_v25 = vpop.permute.xlu1 %3567  ;;  %v4316_v54 = vadd.f32 %v7737_v60, %v7875_v20 }
 0x83b   : > { %3673 = vst.msk [vmem:[#allocation5 + $0xdf] sm:$0x1] %vm3633_vm1, %v3568_v25 }
 0x83c   : > { %v4151_v0 = vmin.f32 %v4119_v61, 6.0  ;;  %3868 = vst.msk [vmem:[#allocation5 + $0xde] sm:$0x3] %vm3828_vm2, %v3763_v63 }
 0x83e   : > { %v4397_v42 = vadd.f32 %v4304_v23, %v4151_v0 }
 0x83f   : > { %3732 = vrot.lane.b32.xlu2 %v4754_v46, %s4833_s26  ;;  %3391 = vrot.lane.b32.xlu0 %v6789_v1, %s4831_s15  ;;  %v4028_v2 = vpop.f32.mrf.mxu1  ;;  %v7963_v5 = vpop.f32.mrf.mxu2 }
 0x840   : > { %4429 = vst [vmem:[%s7900_s17 + $0x8] sm:$0xff] %v4397_v42  ;;  %3393 = vrot.lane.b32.xlu1 %v6808_v59, %s4831_s15  ;;  %v4029_v44 = vadd.f32 %v4028_v2, %v7873_v29 }
 0x841   : > { %v3765_v36 = vpop.permute.xlu2 %3764  ;;  %v3520_v51 = vpop.permute.xlu0 %3519  ;;  %v3885_v62 = vld [vmem:[#allocation5 + $0x50] sm:$0xff] }
 0x842   : > { %v4120_v57 = vmax.f32 %v4029_v44, 0.0  ;;  %3649 = vst.msk [vmem:[#allocation5 + $0x5f] sm:$0x1] %vm3633_vm1, %v3520_v51  ;;  %v3715_v40 = vpop.permute.xlu1 %3714  ;;  %4588 = vmatmul.msk.f32.gmra.mxu1 %vm3908_vm3, %v3885_v62 }
 0x843   : > { %3844 = vst.msk [vmem:[#allocation5 + $0x5e] sm:$0x3] %vm3828_vm2, %v3715_v40  ;;  %v3902_v7 = vld [vmem:[#allocation5 + $0xd8] sm:$0xff] }
 0x844   : > { %v4152_v43 = vmin.f32 %v4120_v57, 6.0  ;;  %4605 = vmatmul.msk.f32.gmra.mxu3 %vm3908_vm3, %v3902_v7 }
 0x846   : > { %v4398_v16 = vadd.f32 %v4307_v6, %v4152_v43  ;;  %v4756_v6 = vld [vmem:[#allocation3 + $0x130] sm:$0x3] }
 0x847   : > { %3539 = vrot.lane.b32.xlu2 %v6789_v1, %s4832_s25  ;;  %3541 = vrot.lane.b32.xlu0 %v6808_v59, %s4832_s25  ;;  %v4031_v22 = vpop.f32.mrf.mxu1 }
 0x848   : > { %4430 = vst [vmem:[%s7900_s17 + $0x10] sm:$0xff] %v4398_v16  ;;  %3734 = vrot.lane.b32.xlu1 %v6789_v1, %s4833_s26  ;;  %v4032_v32 = vadd.f32 %v4031_v22, %v7873_v29 }
 0x849   : > { %v3524_v53 = vpop.permute.xlu2 %3523  ;;  %v3414_v14 = vpop.permute.xlu0 %3413 }
 0x84a   : > { %v4121_v55 = vmax.f32 %v4032_v32, 0.0  ;;  %3481 = vst.msk [vmem:[#allocation5 + $0xe8] sm:$0xff] %vm3451_vm12, %v3414_v14  ;;  %v3570_v63 = vpop.permute.xlu1 %3569  ;;  %v3886_v34 = vld [vmem:[#allocation5 + $0x58] sm:$0xff] }
 0x84b   : > { %3675 = vst.msk [vmem:[#allocation5 + $0xe7] sm:$0xff] %vm3631_vm5, %v3572_v47  ;;  %4589 = vmatmul.msk.f32.gmra.mxu1 %vm3908_vm3, %v3886_v34 }
 0x84c   : > { %v4153_v11 = vmin.f32 %v4121_v55, 6.0  ;;  %3674 = vst.msk [vmem:[#allocation5 + $0xdf] sm:$0xfe] %vm3629_vm13, %v3570_v63 }
 0x84d   : > { %3869 = vst.msk [vmem:[#allocation5 + $0xde] sm:$0xfc] %vm3824_vm14, %v3765_v36  ;;  %v4319_v36 = vadd.f32 %v7751_v9, %v7875_v20 }
 0x84e   : > { %v4399_v1 = vadd.f32 %v4310_v10, %v4153_v11 }
 0x84f   : > { %3736 = vrot.lane.b32.xlu2 %v6808_v59, %s4833_s26  ;;  %3543 = vrot.lane.b32.xlu0 %v4755_v33, %s4832_s25 }
 0x850   : > { %4431 = vst [vmem:[%s7900_s17 + $0x18] sm:$0xff] %v4399_v1  ;;  %3738 = vrot.lane.b32.xlu1 %v4755_v33, %s4833_s26  ;;  %v4034_v38 = vpop.f32.mrf.mxu1 }
 0x851   : > { %v4035_v26 = vadd.f32 %v4034_v38, %v7873_v29  ;;  %v3574_v41 = vpop.permute.xlu2 %3573  ;;  %v3380_v50 = vpop.permute.xlu0 %3379 }
 0x852   : > { %3676 = vst.msk [vmem:[#allocation5 + $0xef] sm:$0x1] %vm3633_vm1, %v3574_v41  ;;  %v3382_v52 = vpop.permute.xlu1 %3381  ;;  %v4322_v41 = vadd.f32 %v7763_v13, %v7875_v20 }
 0x853   : > { %v4122_v58 = vmax.f32 %v4035_v26, 0.0  ;;  %3464 = vst.msk [vmem:[#allocation5 + $0x60] sm:$0xff] %vm3451_vm12, %v3380_v50 }
 0x854   : > { %3465 = vst.msk [vmem:[#allocation5 + $0x68] sm:$0xff] %vm3451_vm12, %v3382_v52 }
 0x855   : > { %v4154_v59 = vmin.f32 %v4122_v58, 6.0  ;;  %3651 = vst.msk [vmem:[#allocation5 + $0x67] sm:$0xff] %vm3631_vm5, %v3524_v53 }
 0x857   : > { %v4400_v56 = vadd.f32 %v4313_v45, %v4154_v59  ;;  %3395 = vrot.lane.b32.xlu2 %v6826_v30, %s4831_s15  ;;  %3397 = vrot.lane.b32.xlu0 %v6843_v37, %s4831_s15  ;;  %s4649_s15 = sshll.u32 %s4886_s22, 8  ;;  %s4461_s22 = scalar_lea.sflag [#allocation7], %s215_s16 }
 0x858   : > { %3545 = vrot.lane.b32.xlu1 %v6826_v30, %s4832_s25  ;;  %v4037_v27 = vpop.f32.mrf.mxu1  ;;  %s4472_s23 = scalar_lea.hbm %s8202_s5, %s4649_s15 }
 0x859   : > { %4432 = vst [vmem:[%s7900_s17 + $0x20] sm:$0xff] %v4400_v56  ;;  %v4038_v4 = vadd.f32 %v4037_v27, %v7873_v29  ;;  %v3721_v35 = vpop.permute.xlu2 %3720  ;;  %v3767_v3 = vpop.permute.xlu0 %3766  ;;  %s4475_s6 = sshll.u32 %s4472_s23, 4  ;;  %s4476_s6 = int_to_ptr.hbm [resolvable:$true] %s4475_s6 }
 0x85a   : > { %3870 = vst.msk [vmem:[#allocation5 + $0xe6] sm:$0xff] %vm3826_vm15, %v3767_v3  ;;  %v3522_v47 = vpop.permute.xlu1 %3521  ;;  %s4771_s7 = sshra.s32 %s4476_s6, 4  ;;  %s4772_s7 = int_to_ptr.hbm [resolvable:$true] %s4771_s7 }
 0x85b   : > { %v4123_v23 = vmax.f32 %v4038_v4, 0.0  ;;  %3650 = vst.msk [vmem:[#allocation5 + $0x5f] sm:$0xfe] %vm3629_vm13, %v3522_v47  ;;  %s4773_s8 = scalar_lea.hbm %s4772_s7, 256  ;;  %p4778_p0 = scmp.lt.s32.totalorder %s4772_s7, %s8202_s5 }
 0x85c   : > { %p4774_p11 = scmp.ne.s32.totalorder %s4772_s7, %s4773_s8  ;;  %p4779_p1 = scmp.lt.s32.totalorder %s4777_s12, %s4773_s8 }
 0x85d   : > { %v4155_v61 = vmin.f32 %v4123_v23, 6.0 }
 0x85e   : > { %p4775_p12 = pnand %p4774_p11, %p4903_p5  ;;  %p4780_p2 = por %p4779_p1, %p4778_p0 }
 0x85f   : > { %v4401_v25 = vadd.f32 %v4316_v54, %v4155_v61  ;;  %3547 = vrot.lane.b32.xlu2 %v6843_v37, %s4832_s25  ;;  %3740 = vrot.lane.b32.xlu0 %v6826_v30, %s4833_s26 }
 0x860   : > { %3742 = vrot.lane.b32.xlu1 %v6843_v37, %s4833_s26  ;;  %v4040_v0 = vpop.f32.mrf.mxu1  ;;  %v7984_v37 = vpop.f32.mrf.mxu2  ;;  %p4776_p13 = pneg %p4775_p12 }
 0x861   : > { %4433 = vst [vmem:[%s7900_s17 + $0x28] sm:$0xff] %v4401_v25  ;;  %v4041_v42 = vadd.f32 %v4040_v0, %v7873_v29  ;;  %v3576_v46 = vpop.permute.xlu2 %3575  ;;  %v3717_v60 = vpop.permute.xlu0 %3716  ;;  %v3903_v2 = vld [vmem:[#allocation5 + $0xe0] sm:$0xff] }
 0x862   : > { %3845 = vst.msk [vmem:[#allocation5 + $0x5e] sm:$0xfc] %vm3824_vm14, %v3717_v60  ;;  %v3719_v44 = vpop.permute.xlu1 %3718  ;;  %4606 = vmatmul.msk.f32.gmra.mxu3 %vm3908_vm3, %v3903_v2  ;;  %p4781_p3 = pnand %p4780_p2, %p4776_p13 }
 0x863   : > { %v4124_v30 = vmax.f32 %v4041_v42, 0.0  ;;  %3846 = vst.msk [vmem:[#allocation5 + $0x66] sm:$0xff] %vm3826_vm15, %v3719_v44 }
 0x865   : > { %v4156_v51 = vmin.f32 %v4124_v30, 6.0 }
 0x867   : > { %v4402_v62 = vadd.f32 %v4319_v36, %v4156_v51  ;;  %3549 = vrot.lane.b32.xlu2 %v4756_v6, %s4832_s25  ;;  %3744 = vrot.lane.b32.xlu0 %v4756_v6, %s4833_s26  ;;  %v4325_v51 = vadd.f32 %v7776_v18, %v7875_v20 }
 0x868   : > { %3746 = vrot.lane.b32.xlu1 %v6800_v12, %s4833_s26  ;;  %v7996_v43 = vpop.f32.mrf.mxu2 }
 0x869   : > { %4434 = vst [vmem:[%s7900_s17 + $0x30] sm:$0xff] %v4402_v62  ;;  %v3386_v57 = vpop.permute.xlu2 %3385  ;;  %v3769_v40 = vpop.permute.xlu0 %3768 }
 0x86a   : > { %3467 = vst.msk [vmem:[#allocation5 + $0x78] sm:$0xff] %vm3451_vm12, %v3386_v57  ;;  %v3526_v9 = vpop.permute.xlu1 %3525  ;;  %v3887_v7 = vld [vmem:[#allocation5 + $0x60] sm:$0xff] }
 0x86b   : > { %3871 = vst.msk [vmem:[#allocation5 + $0xee] sm:$0x3] %vm3828_vm2, %v3769_v40  ;;  %4590 = vmatmul.msk.f32.gmra.mxu1 %vm3908_vm3, %v3887_v7 }
 0x86c   : > { %3652 = vst.msk [vmem:[#allocation5 + $0x6f] sm:$0x1] %vm3633_vm1, %v3526_v9 }
 0x86d   : > { %3847 = vst.msk [vmem:[#allocation5 + $0x6e] sm:$0x3] %vm3828_vm2, %v3721_v35 }
 0x870   : > { %v4369_v10 = vpop.f32.mrf.mxu2 }
 0x871   : > { %v3528_v16 = vpop.permute.xlu2 %3527  ;;  %v3416_v22 = vpop.permute.xlu0 %3415  ;;  %v4370_v38 = vadd.f32 %v4369_v10, %v7875_v20  ;;  %v4328_v10 = vadd.f32 %v7786_v21, %v7875_v20 }
 0x872   : > { %3482 = vst.msk [vmem:[#allocation5 + $0xf0] sm:$0xff] %vm3451_vm12, %v3416_v22  ;;  %v3418_v12 = vpop.permute.xlu1 %3417  ;;  %v3904_v32 = vld [vmem:[#allocation5 + $0xe8] sm:$0xff] }
 0x873   : > { %3677 = vst.msk [vmem:[#allocation5 + $0xef] sm:$0xfe] %vm3629_vm13, %v3576_v46  ;;  %4607 = vmatmul.msk.f32.gmra.mxu3 %vm3908_vm3, %v3904_v32 }
 0x874   : > { %3483 = vst.msk [vmem:[#allocation5 + $0xf8] sm:$0xff] %vm3451_vm12, %v3418_v12  ;;  %v3888_v53 = vld [vmem:[#allocation5 + $0x68] sm:$0xff] }
 0x875   : > { %4591 = vmatmul.msk.f32.gmra.mxu1 %vm3908_vm3, %v3888_v53 }
 0x877   : > { %v4091_v14 = vpop.f32.mrf.mxu3 }
 0x878   : > { %v4092_v55 = vadd.f32 %v4091_v14, %v7873_v29  ;;  %v4043_v63 = vpop.f32.mrf.mxu1  ;;  %v4372_v23 = vpop.f32.mrf.mxu2 }
 0x879   : > { %v4044_v34 = vadd.f32 %v4043_v63, %v7873_v29  ;;  %v3725_v11 = vpop.permute.xlu2 %3724  ;;  %v3578_v1 = vpop.permute.xlu0 %3577  ;;  %v4373_v60 = vadd.f32 %v4372_v23, %v7875_v20 }
 0x87a   : > { %v4141_v33 = vmax.f32 %v4092_v55, 0.0  ;;  %3678 = vst.msk [vmem:[#allocation5 + $0xf7] sm:$0xff] %vm3631_vm5, %v3578_v1  ;;  %v3384_v26 = vpop.permute.xlu1 %3383 }
 0x87b   : > { %v4125_v50 = vmax.f32 %v4044_v34, 0.0  ;;  %3466 = vst.msk [vmem:[#allocation5 + $0x70] sm:$0xff] %vm3451_vm12, %v3384_v26  ;;  %v8264_v34 = vld [vmem:[#allocation23_spill] sm:$0xff]  ;;  %v8265_v26 = vld [vmem:[#allocation24_spill] sm:$0xff] }
 0x87c   : > { %v4173_v52 = vmin.f32 %v4141_v33, 6.0  ;;  %3653 = vst.msk [vmem:[#allocation5 + $0x6f] sm:$0xfe] %vm3629_vm13, %v3528_v16 }
 0x87d   : > { %v4157_v45 = vmin.f32 %v4125_v50, 6.0 }
 0x87e   : > { %v4419_v58 = vadd.f32 %v4370_v38, %v4173_v52 }
 0x87f   : > { %v4403_v59 = vadd.f32 %v4322_v41, %v4157_v45 }
 0x880   : > { %4451 = vst [vmem:[%s7900_s17 + $0xb8] sm:$0xff] %v4419_v58  ;;  %v8266_v58 = vld [vmem:[#allocation25_spill] sm:$0xff] }
 0x881   : > { %4435 = vst [vmem:[%s7900_s17 + $0x38] sm:$0xff] %v4403_v59  ;;  %v3532_v56 = vpop.permute.xlu2 %3531  ;;  %v3771_v27 = vpop.permute.xlu0 %3770 }
 0x882   : > { %3655 = vst.msk [vmem:[#allocation5 + $0x7f] sm:$0x1] %vm3633_vm1, %v3532_v56  ;;  %v3773_v4 = vpop.permute.xlu1 %3772 }
 0x883   : > { %3872 = vst.msk [vmem:[#allocation5 + $0xee] sm:$0xfc] %vm3824_vm14, %v3771_v27 }
 0x884   : > { %3873 = vst.msk [vmem:[#allocation5 + $0xf6] sm:$0xff] %vm3826_vm15, %v3773_v4  ;;  %v8267_v4 = vld [vmem:[#allocation26_spill] sm:$0xff] }
 0x889   : > { %v3390_v13 = vpop.permute.xlu2 %3389  ;;  %v3530_v35 = vpop.permute.xlu0 %3529 }
 0x88a   : > { %3469 = vst.msk [vmem:[#allocation5 + $0x88] sm:$0xff] %vm3451_vm12, %v3390_v13  ;;  %v3723_v3 = vpop.permute.xlu1 %3722 }
 0x88b   : > { %3654 = vst.msk [vmem:[#allocation5 + $0x77] sm:$0xff] %vm3631_vm5, %v3530_v35  ;;  %v3905_v47 = vld [vmem:[#allocation5 + $0xf0] sm:$0xff] }
 0x88c   : > { %3849 = vst.msk [vmem:[#allocation5 + $0x76] sm:$0xff] %vm3826_vm15, %v3725_v11  ;;  %4608 = vmatmul.msk.f32.gmra.mxu3 %vm3908_vm3, %v3905_v47 }
 0x88d   : > { %3848 = vst.msk [vmem:[#allocation5 + $0x6e] sm:$0xfc] %vm3824_vm14, %v3723_v3 }
 0x88f   : > { %v4094_v54 = vpop.f32.mrf.mxu3 }
 0x890   : > { %v4095_v61 = vadd.f32 %v4094_v54, %v7873_v29  ;;  %v4331_v54 = vadd.f32 %v7800_v17, %v7875_v20 }
 0x891   : > { %v3729_v25 = vpop.permute.xlu2 %3728  ;;  %v3580_v0 = vpop.permute.xlu0 %3579 }
 0x892   : > { %v4142_v42 = vmax.f32 %v4095_v61, 0.0  ;;  %v4046_v46 = vpop.f32.mrf.mxu1  ;;  %3679 = vst.msk [vmem:[#allocation5 + $0xff] sm:$0x1] %vm3633_vm1, %v3580_v0  ;;  %v3775_v2 = vpop.permute.xlu1 %3774  ;;  %v8268_v0 = vld [vmem:[#allocation27_spill] sm:$0xff] }
 0x893   : > { %v4047_v44 = vadd.f32 %v4046_v46, %v7873_v29  ;;  %3874 = vst.msk [vmem:[#allocation5 + $0xfe] sm:$0x3] %vm3828_vm2, %v3775_v2 }
 0x894   : > { %v4174_v36 = vmin.f32 %v4142_v42, 6.0  ;;  %v3889_v30 = vld [vmem:[#allocation5 + $0x70] sm:$0xff] }
 0x895   : > { %v4126_v62 = vmax.f32 %v4047_v44, 0.0  ;;  %4592 = vmatmul.msk.f32.gmra.mxu1 %vm3908_vm3, %v3889_v30 }
 0x896   : > { %v4420_v6 = vadd.f32 %v4373_v60, %v4174_v36 }
 0x897   : > { %v4158_v57 = vmin.f32 %v4126_v62, 6.0 }
 0x898   : > { %4452 = vst [vmem:[%s7900_s17 + $0xc0] sm:$0xff] %v4420_v6  ;;  %v8269_v6 = vld [vmem:[#allocation28_spill] sm:$0xff] }
 0x899   : > { %v4404_v40 = vadd.f32 %v4325_v51, %v4158_v57  ;;  %v3733_v9 = vpop.permute.xlu2 %3732  ;;  %v3727_v7 = vpop.permute.xlu0 %3726  ;;  %v4334_v51 = vadd.f32 %v7811_v8, %v7875_v20  ;;  %v8270_v8 = vld [vmem:[#allocation29_spill] sm:$0xff] }
 0x89a   : > { %3850 = vst.msk [vmem:[#allocation5 + $0x7e] sm:$0x3] %vm3828_vm2, %v3727_v7  ;;  %v3388_v16 = vpop.permute.xlu1 %3387  ;;  %v3906_v22 = vld [vmem:[#allocation5 + $0xf8] sm:$0xff] }
 0x89b   : > { %4436 = vst [vmem:[%s7900_s17 + $0x40] sm:$0xff] %v4404_v40  ;;  %4609 = vmatmul.msk.f32.gmra.mxu3 %vm3908_vm3, %v3906_v22 }
 0x89c   : > { %3468 = vst.msk [vmem:[#allocation5 + $0x80] sm:$0xff] %vm3451_vm12, %v3388_v16 }
 0x89f   : > { %v4049_v18 = vpop.f32.mrf.mxu1 }
 0x8a0   : > { %v4050_v12 = vadd.f32 %v4049_v18, %v7873_v29 }
 0x8a1   : > { %v3540_v32 = vpop.permute.xlu2 %3539  ;;  %v3534_v53 = vpop.permute.xlu0 %3533  ;;  %v3890_v14 = vld [vmem:[#allocation5 + $0x78] sm:$0xff] }
 0x8a2   : > { %v4127_v55 = vmax.f32 %v4050_v12, 0.0  ;;  %3656 = vst.msk [vmem:[#allocation5 + $0x7f] sm:$0xfe] %vm3629_vm13, %v3534_v53  ;;  %v3536_v63 = vpop.permute.xlu1 %3535  ;;  %4593 = vmatmul.msk.f32.gmra.mxu1 %vm3908_vm3, %v3890_v14 }
 0x8a3   : > { %3851 = vst.msk [vmem:[#allocation5 + $0x7e] sm:$0xfc] %vm3824_vm14, %v3729_v25  ;;  %4636 = vmatmul.msk.f32.vlgmr.msra.gmra.mxu3 %vm261_vm0, %v8264_v34  ;;  %v4097_v34 = vpop.f32.mrf.mxu3 }
 0x8a4   : > { %v4159_v11 = vmin.f32 %v4127_v55, 6.0  ;;  %3657 = vst.msk [vmem:[#allocation5 + $0x87] sm:$0xff] %vm3631_vm5, %v3536_v63 }
 0x8a6   : > { %v4405_v1 = vadd.f32 %v4328_v10, %v4159_v11  ;;  %v4337_v10 = vadd.f32 %v7824_v24, %v7875_v20 }
 0x8a8   : > { %4437 = vst [vmem:[%s7900_s17 + $0x48] sm:$0xff] %v4405_v1 }
 0x8a9   : > { %v3737_v33 = vpop.permute.xlu2 %3736  ;;  %v3731_v38 = vpop.permute.xlu0 %3730 }
 0x8aa   : > { %3852 = vst.msk [vmem:[#allocation5 + $0x86] sm:$0xff] %vm3826_vm15, %v3731_v38  ;;  %v3538_v21 = vpop.permute.xlu1 %3537  ;;  %v4340_v38 = vadd.f32 %v7836_v31, %v7875_v20 }
 0x8ab   : > { %3658 = vst.msk [vmem:[#allocation5 + $0x8f] sm:$0x1] %vm3633_vm1, %v3538_v21  ;;  %4637 = vmatmul.msk.f32.gmra.mxu3 %vm261_vm0, %v8265_v26 }
 0x8ac   : > { %3853 = vst.msk [vmem:[#allocation5 + $0x8e] sm:$0x3] %vm3828_vm2, %v3733_v9 }
 0x8b1   : > { %v3396_v41 = vpop.permute.xlu2 %3395  ;;  %v3392_v50 = vpop.permute.xlu0 %3391  ;;  %v3891_v52 = vld [vmem:[#allocation5 + $0x80] sm:$0xff] }
 0x8b2   : > { %3472 = vst.msk [vmem:[#allocation5 + $0xa0] sm:$0xff] %vm3451_vm12, %v3396_v41  ;;  %v3394_v45 = vpop.permute.xlu1 %3393  ;;  %4594 = vmatmul.msk.f32.gmra.mxu1 %vm3908_vm3, %v3891_v52 }
 0x8b3   : > { %3470 = vst.msk [vmem:[#allocation5 + $0x90] sm:$0xff] %vm3451_vm12, %v3392_v50  ;;  %4638 = vmatmul.msk.f32.gmra.mxu3 %vm261_vm0, %v8266_v58  ;;  %v3892_v56 = vld [vmem:[#allocation5 + $0x88] sm:$0xff] }
 0x8b4   : > { %3659 = vst.msk [vmem:[#allocation5 + $0x8f] sm:$0xfe] %vm3629_vm13, %v3540_v32 }
 0x8b5   : > { %3471 = vst.msk [vmem:[#allocation5 + $0x98] sm:$0xff] %vm3451_vm12, %v3394_v45 }
 0x8b6   : > { %v4100_v26 = vpop.f32.mrf.mxu3 }
 0x8b9   : > { %v3542_v59 = vpop.permute.xlu0 %3541  ;;  %v3548_v35 = vpop.permute.xlu2 %3547 }
 0x8ba   : > { %3660 = vst.msk [vmem:[#allocation5 + $0x97] sm:$0xff] %vm3631_vm5, %v3542_v59  ;;  %v3735_v27 = vpop.permute.xlu1 %3734  ;;  %4595 = vmatmul.msk.f32.gmra.mxu1 %vm3908_vm3, %v3892_v56  ;;  %v4343_v56 = vadd.f32 %v7850_v49, %v7875_v20 }
 0x8bb   : > { %3855 = vst.msk [vmem:[#allocation5 + $0x96] sm:$0xff] %vm3826_vm15, %v3737_v33  ;;  %4639 = vmatmul.msk.f32.gmra.mxu3 %vm261_vm0, %v8267_v4 }
 0x8bc   : > { %3854 = vst.msk [vmem:[#allocation5 + $0x8e] sm:$0xfc] %vm3824_vm14, %v3735_v27 }
 0x8bf   : > { %v4052_v13 = vpop.f32.mrf.mxu1 }
 0x8c0   : > { %v4053_v3 = vadd.f32 %v4052_v13, %v7873_v29 }
 0x8c1   : > { %v3544_v47 = vpop.permute.xlu0 %3543  ;;  %v3550_v44 = vpop.permute.xlu2 %3549 }
 0x8c2   : > { %v4128_v23 = vmax.f32 %v4053_v3, 0.0  ;;  %3661 = vst.msk [vmem:[#allocation5 + $0x9f] sm:$0x1] %vm3633_vm1, %v3544_v47  ;;  %v3739_v61 = vpop.permute.xlu1 %3738  ;;  %v4098_v3 = vadd.f32 %v4097_v34, %v7873_v29 }
 0x8c3   : > { %3856 = vst.msk [vmem:[#allocation5 + $0x9e] sm:$0x3] %vm3828_vm2, %v3739_v61  ;;  %v3893_v25 = vld [vmem:[#allocation5 + $0x90] sm:$0xff]  ;;  %4640 = vmatmul.msk.f32.gmra.mxu3 %vm261_vm0, %v8268_v0 }
 0x8c4   : > { %v4160_v42 = vmin.f32 %v4128_v23, 6.0  ;;  %4596 = vmatmul.msk.f32.gmra.mxu1 %vm3908_vm3, %v3893_v25  ;;  %v4346_v23 = vadd.f32 %v7860_v39, %v7875_v20  ;;  %v4143_v49 = vmax.f32 %v4098_v3, 0.0 }
 0x8c6   : > { %v4406_v46 = vadd.f32 %v4331_v54, %v4160_v42 }
 0x8c7   : > { %v4103_v24 = vpop.f32.mrf.mxu3 }
 0x8c8   : > { %4438 = vst [vmem:[%s7900_s17 + $0x50] sm:$0xff] %v4406_v46  ;;  %v4055_v60 = vpop.f32.mrf.mxu1  ;;  %v4175_v46 = vmin.f32 %v4143_v49, 6.0 }
 0x8c9   : > { %v4056_v2 = vadd.f32 %v4055_v60, %v7873_v29  ;;  %v3398_v17 = vpop.permute.xlu0 %3397  ;;  %v4101_v60 = vadd.f32 %v4100_v26, %v7873_v29 }
 0x8ca   : > { %3473 = vst.msk [vmem:[#allocation5 + $0xa8] sm:$0xff] %vm3451_vm12, %v3398_v17  ;;  %v3546_v36 = vpop.permute.xlu1 %3545  ;;  %v3894_v30 = vld [vmem:[#allocation5 + $0x98] sm:$0xff] }
 0x8cb   : > { %v4129_v62 = vmax.f32 %v4056_v2, 0.0  ;;  %3664 = vst.msk [vmem:[#allocation5 + $0xaf] sm:$0x1] %vm3633_vm1, %v3550_v44  ;;  %4641 = vmatmul.msk.f32.gmra.mxu3 %vm261_vm0, %v8269_v6  ;;  %v4144_v44 = vmax.f32 %v4101_v60, 0.0 }
 0x8cc   : > { %3663 = vst.msk [vmem:[#allocation5 + $0xa7] sm:$0xff] %vm3631_vm5, %v3548_v35  ;;  %4597 = vmatmul.msk.f32.gmra.mxu1 %vm3908_vm3, %v3894_v30 }
 0x8cd   : > { %v4161_v57 = vmin.f32 %v4129_v62, 6.0  ;;  %3662 = vst.msk [vmem:[#allocation5 + $0x9f] sm:$0xfe] %vm3629_vm13, %v3546_v36  ;;  %v4176_v30 = vmin.f32 %v4144_v44, 6.0 }
 0x8cf   : > { %v4407_v40 = vadd.f32 %v4334_v51, %v4161_v57  ;;  %v4104_v51 = vadd.f32 %v4103_v24, %v7873_v29 }
 0x8d1   : > { %4439 = vst [vmem:[%s7900_s17 + $0x58] sm:$0xff] %v4407_v40  ;;  %v3741_v9 = vpop.permute.xlu0 %3740 }
 0x8d2   : > { %3857 = vst.msk [vmem:[#allocation5 + $0x9e] sm:$0xfc] %vm3824_vm14, %v3741_v9  ;;  %v3743_v7 = vpop.permute.xlu1 %3742  ;;  %v4145_v9 = vmax.f32 %v4104_v51, 0.0  ;;  %v4361_v51 = vadd.f32 %v7963_v5, %v7875_v20 }
 0x8d3   : > { %3858 = vst.msk [vmem:[#allocation5 + $0xa6] sm:$0xff] %vm3826_vm15, %v3743_v7  ;;  %4642 = vmatmul.msk.f32.gmra.mxu3 %vm261_vm0, %v8270_v8  ;;  %v4349_v7 = vadd.f32 %v7885_v19, %v7875_v20  ;;  %v4352_v19 = vadd.f32 %v7909_v15, %v7875_v20  ;;  %v4355_v15 = vadd.f32 %v7926_v28, %v7875_v20 }
 0x8d4   : > { %v4358_v28 = vadd.f32 %v7943_v48, %v7875_v20 }
 0x8d9   : > { %v3745_v16 = vpop.permute.xlu0 %3744 }
 0x8da   : > { %3859 = vst.msk [vmem:[#allocation5 + $0xae] sm:$0x3] %vm3828_vm2, %v3745_v16  ;;  %v3747_v22 = vpop.permute.xlu1 %3746  ;;  %v3895_v18 = vld [vmem:[#allocation5 + $0xa0] sm:$0xff] }
 0x8db   : > { %3860 = vst.msk [vmem:[#allocation5 + $0xae] sm:$0xfc] %vm3824_vm14, %v3747_v22  ;;  %4598 = vmatmul.msk.f32.gmra.mxu1 %vm3908_vm3, %v3895_v18  ;;  %v4177_v18 = vmin.f32 %v4145_v9, 6.0  ;;  %v4364_v9 = vadd.f32 %v7984_v37, %v7875_v20  ;;  %v4367_v37 = vadd.f32 %v7996_v43, %v7875_v20 }
 0x8e1   : > { %v3896_v12 = vld [vmem:[#allocation5 + $0xa8] sm:$0xff] }
 0x8e2   : > { %v3897_v14 = vld [vmem:[#allocation5 + $0xb0] sm:$0xff] }
 0x8e3   : > { %4599 = vmatmul.msk.f32.gmra.mxu1 %vm3908_vm3, %v3896_v12 }
 0x8e5   : > { %v4106_v52 = vpop.f32.mrf.mxu3 }
 0x8e6   : > { %v4107_v12 = vadd.f32 %v4106_v52, %v7873_v29 }
 0x8e8   : > { %v4058_v32 = vpop.f32.mrf.mxu1 }
 0x8e9   : > { %v4059_v53 = vadd.f32 %v4058_v32, %v7873_v29 }
 0x8eb   : > { %v4130_v55 = vmax.f32 %v4059_v53, 0.0  ;;  %4600 = vmatmul.msk.f32.gmra.mxu1 %vm3908_vm3, %v3897_v14 }
 0x8ed   : > { %v4162_v63 = vmin.f32 %v4130_v55, 6.0 }
 0x8ef   : > { %v4408_v11 = vadd.f32 %v4337_v10, %v4162_v63  ;;  %v4146_v63 = vmax.f32 %v4107_v12, 0.0 }
 0x8f1   : > { %4440 = vst [vmem:[%s7900_s17 + $0x60] sm:$0xff] %v4408_v11 }
 0x8f2   : > { %v4061_v1 = vpop.f32.mrf.mxu1 }
 0x8f3   : > { %v4062_v33 = vadd.f32 %v4061_v1, %v7873_v29 }
 0x8f5   : > { %v4131_v21 = vmax.f32 %v4062_v33, 0.0  ;;  %v4178_v33 = vmin.f32 %v4146_v63, 6.0 }
 0x8f6   : > { %v4109_v45 = vpop.f32.mrf.mxu3 }
 0x8f7   : > { %v4163_v41 = vmin.f32 %v4131_v21, 6.0 }
 0x8f9   : > { %v4409_v50 = vadd.f32 %v4340_v38, %v4163_v41  ;;  %v4110_v38 = vadd.f32 %v4109_v45, %v7873_v29 }
 0x8fb   : > { %4441 = vst [vmem:[%s7900_s17 + $0x68] sm:$0xff] %v4409_v50  ;;  %v4147_v24 = vmax.f32 %v4110_v38, 0.0 }
 0x90f   : > { %v8102_v4 = vpop.f32.mrf.mxu3 }
 0x910   : > { %v4113_v45 = vadd.f32 %v8102_v4, %v7873_v29 }
 0x912   : > { %v4064_v58 = vpop.f32.mrf.mxu1 }
 0x913   : > { %v4065_v59 = vadd.f32 %v4064_v58, %v7873_v29 }
 0x915   : > { %v4132_v27 = vmax.f32 %v4065_v59, 0.0 }
 0x917   : > { %v4164_v13 = vmin.f32 %v4132_v27, 6.0 }
 0x919   : > { %v4410_v31 = vadd.f32 %v4343_v56, %v4164_v13  ;;  %v4179_v56 = vmin.f32 %v4147_v24, 6.0 }
 0x91b   : > { %4442 = vst [vmem:[%s7900_s17 + $0x70] sm:$0xff] %v4410_v31 }
 0x91e   : > { %v8105_v35 = vpop.f32.mrf.mxu3 }
 0x91f   : > { %v4067_v47 = vpop.f32.mrf.mxu1 }
 0x920   : > { %v4068_v54 = vadd.f32 %v4067_v47, %v7873_v29 }
 0x922   : > { %v4133_v61 = vmax.f32 %v4068_v54, 0.0  ;;  %v4148_v54 = vmax.f32 %v4113_v45, 0.0 }
 0x924   : > { %v4165_v25 = vmin.f32 %v4133_v61, 6.0  ;;  %v4180_v4 = vmin.f32 %v4148_v54, 6.0 }
 0x926   : > { %v4411_v0 = vadd.f32 %v4346_v23, %v4165_v25  ;;  %v4375_v42 = vpop.f32.mrf.mxu3  ;;  %v4116_v25 = vadd.f32 %v8105_v35, %v7873_v29 }
 0x927   : > { %v4376_v2 = vadd.f32 %v4375_v42, %v7875_v20 }
 0x928   : > { %4443 = vst [vmem:[%s7900_s17 + $0x78] sm:$0xff] %v4411_v0  ;;  %v4149_v60 = vmax.f32 %v4116_v25, 0.0 }
 0x929   : > { %v4421_v17 = vadd.f32 %v4376_v2, %v4175_v46 }
 0x92b   : > { %4453 = vst [vmem:[%s7900_s17 + $0xc8] sm:$0xff] %v4421_v17  ;;  %v4181_v17 = vmin.f32 %v4149_v60, 6.0 }
 0x92e   : > { %v4378_v36 = vpop.f32.mrf.mxu3 }
 0x92f   : > { %v4379_v39 = vadd.f32 %v4378_v36, %v7875_v20  ;;  %v4070_v62 = vpop.f32.mrf.mxu1 }
 0x930   : > { %v4071_v6 = vadd.f32 %v4070_v62, %v7873_v29 }
 0x931   : > { %v4422_v57 = vadd.f32 %v4379_v39, %v4176_v30 }
 0x932   : > { %v4134_v40 = vmax.f32 %v4071_v6, 0.0 }
 0x933   : > { %4454 = vst [vmem:[%s7900_s17 + $0xd0] sm:$0xff] %v4422_v57 }
 0x934   : > { %v4166_v8 = vmin.f32 %v4134_v40, 6.0 }
 0x936   : > { %v4412_v16 = vadd.f32 %v4349_v7, %v4166_v8  ;;  %v4381_v22 = vpop.f32.mrf.mxu3 }
 0x937   : > { %v4382_v32 = vadd.f32 %v4381_v22, %v7875_v20  ;;  %v4073_v53 = vpop.f32.mrf.mxu1 }
 0x938   : > { %4444 = vst [vmem:[%s7900_s17 + $0x80] sm:$0xff] %v4412_v16  ;;  %v4074_v14 = vadd.f32 %v4073_v53, %v7873_v29 }
 0x939   : > { %v4423_v10 = vadd.f32 %v4382_v32, %v4177_v18 }
 0x93a   : > { %v4135_v55 = vmax.f32 %v4074_v14, 0.0 }
 0x93b   : > { %4455 = vst [vmem:[%s7900_s17 + $0xd8] sm:$0xff] %v4423_v10 }
 0x93c   : > { %v4167_v34 = vmin.f32 %v4135_v55, 6.0 }
 0x93e   : > { %v4413_v11 = vadd.f32 %v4352_v19, %v4167_v34  ;;  %v4384_v1 = vpop.f32.mrf.mxu3 }
 0x93f   : > { %v4385_v21 = vadd.f32 %v4384_v1, %v7875_v20 }
 0x940   : > { %4445 = vst [vmem:[%s7900_s17 + $0x88] sm:$0xff] %v4413_v11 }
 0x941   : > { %v4424_v26 = vadd.f32 %v4385_v21, %v4178_v33  ;;  %v4076_v41 = vpop.f32.mrf.mxu1 }
 0x942   : > { %v4077_v50 = vadd.f32 %v4076_v41, %v7873_v29 }
 0x943   : > { %4456 = vst [vmem:[%s7900_s17 + $0xe0] sm:$0xff] %v4424_v26 }
 0x944   : > { %v4136_v52 = vmax.f32 %v4077_v50, 0.0 }
 0x946   : > { %v4168_v58 = vmin.f32 %v4136_v52, 6.0  ;;  %v4387_v59 = vpop.f32.mrf.mxu3 }
 0x947   : > { %v4388_v27 = vadd.f32 %v4387_v59, %v7875_v20 }
 0x948   : > { %v4414_v13 = vadd.f32 %v4355_v15, %v4168_v58 }
 0x949   : > { %v4425_v31 = vadd.f32 %v4388_v27, %v4179_v56  ;;  %v4079_v3 = vpop.f32.mrf.mxu1 }
 0x94a   : > { %4446 = vst [vmem:[%s7900_s17 + $0x90] sm:$0xff] %v4414_v13  ;;  %v4080_v47 = vadd.f32 %v4079_v3, %v7873_v29 }
 0x94b   : > { %4457 = vst [vmem:[%s7900_s17 + $0xe8] sm:$0xff] %v4425_v31 }
 0x94c   : > { %v4137_v23 = vmax.f32 %v4080_v47, 0.0 }
 0x94e   : > { %v4169_v61 = vmin.f32 %v4137_v23, 6.0  ;;  %v4390_v49 = vpop.f32.mrf.mxu3 }
 0x94f   : > { %v4391_v0 = vadd.f32 %v4390_v49, %v7875_v20 }
 0x950   : > { %v4415_v42 = vadd.f32 %v4358_v28, %v4169_v61 }
 0x951   : > { %v4426_v46 = vadd.f32 %v4391_v0, %v4180_v4 }
 0x952   : > { %4447 = vst [vmem:[%s7900_s17 + $0x98] sm:$0xff] %v4415_v42 }
 0x953   : > { %4458 = vst [vmem:[%s7900_s17 + $0xf0] sm:$0xff] %v4426_v46 }
 0x956   : > { %v4393_v2 = vpop.f32.mrf.mxu3 }
 0x957   : > { %v4394_v48 = vadd.f32 %v4393_v2, %v7875_v20 }
 0x958   : > { %v4082_v44 = vpop.f32.mrf.mxu1 }
 0x959   : > { %v4427_v36 = vadd.f32 %v4394_v48, %v4181_v17  ;;  %v4083_v30 = vadd.f32 %v4082_v44, %v7873_v29 }
 0x95b   : > { %4459 = vst [vmem:[%s7900_s17 + $0xf8] sm:$0xff] %v4427_v36  ;;  %v4138_v35 = vmax.f32 %v4083_v30, 0.0 }
 0x95d   : > { %v4170_v39 = vmin.f32 %v4138_v35, 6.0 }
 0x95f   : > { %v4416_v62 = vadd.f32 %v4361_v51, %v4170_v39 }
 0x960   : > { %v4085_v6 = vpop.f32.mrf.mxu1 }
 0x961   : > { %4448 = vst [vmem:[%s7900_s17 + $0xa0] sm:$0xff] %v4416_v62  ;;  %v4086_v57 = vadd.f32 %v4085_v6, %v7873_v29 }
 0x963   : > { %v4139_v40 = vmax.f32 %v4086_v57, 0.0 }
 0x965   : > { %v4171_v7 = vmin.f32 %v4139_v40, 6.0 }
 0x967   : > { %v4417_v8 = vadd.f32 %v4364_v9, %v4171_v7 }
 0x968   : > { %v4088_v16 = vpop.f32.mrf.mxu1 }
 0x969   : > { %4449 = vst [vmem:[%s7900_s17 + $0xa8] sm:$0xff] %v4417_v8  ;;  %v4089_v5 = vadd.f32 %v4088_v16, %v7873_v29 }
 0x96b   : > { %v4140_v22 = vmax.f32 %v4089_v5, 0.0 }
 0x96d   : > { %v4172_v18 = vmin.f32 %v4140_v22, 6.0 }
 0x96f   : > { %v4418_v12 = vadd.f32 %v4367_v37, %v4172_v18 }
 0x971   : > { %4450 = vst [vmem:[%s7900_s17 + $0xb0] sm:$0xff] %v4418_v12 }
 0x972   : > { %4784 = shalt.err (!%p4781_p3)
}
 0x973   : > { %s4834_s16 = smov 128  }
 0x974   : > { %4665 = dma.vmem_to_hbm [thread:$0]  (%p4903_p5), %s4474_s30, 4096, %s4476_s6, %s4461_s22, %s4834_s16, %s4834_s16, %s4823_s11  }
 0x975 PF: > { %p4671_p4 = scmp.ge.s32.totalorder %s4819_s21, 2  ;;  %s4490_s17 = sand.u32 1, %s4807_s18  }
 0x976   : > { %s4491_s15 = scalar_lea.sflag [#allocation7], %s4490_s17 }
 0x977   : > { %p4668_p7 = pnand %p4671_p4, %p4907_p6 }
 0x979   : > { %p4669_p8 = pneg %p4668_p7 }
 0x97b   : > { %4802 = dma.done.wait (%p4669_p8), %s4491_s15, 4096  }
 0x97c   : > { %4804 = vsyncadd (%p4669_p8), %s4491_s15, 4294963200  ;;  %p15_p9 = scmp.ge.s32.totalorder %s4890_s24, 4   ;;  %s8271_s18 = smov %s4811_s19 }
 0x97d   : > { %s8272_s19 = smov %s4815_s20  ;;  %s8273_s20 = smov %s4901_s27 }
 0x97e   : > { %s8274_s21 = smov %s4890_s24  ;;  %17 = sbr.rel (!%p15_p9) target bundleno = 3 (0x3), region = 79 }
 0x983   :  { %4497 = vsyncpa [#allocation7], 1 }
 0x984   :  { %4499 = vsyncpa [#allocation7 + $0x1], 1 }

</bundles_post_ra>
